<compile_context>
chip_gen: v6e
topology: v6e:2x2x1
jax: 0.10.0
libtpu: 0.0.40
codegen_flags: <defaults>
</compile_context>

<pallas_src>
import functools

import jax
import jax.numpy as jnp
from jax.experimental import pallas as pl
from jax.experimental.pallas import tpu as pltpu


_LANE = 128                       # lane width: Cout is padded to multiples of this
_SUB = 8                          # sublane width: M tiles are multiples of this
_EPS = 1e-5                       # PyTorch BatchNorm2d default eps
_NEG_SLOPE = 0.2                  # LeakyReLU slope
_TM_CAP = 1024                    # M-tile cap (mem-bound roofline ~flat past 1024)


def _tpu_vmem_capacity_bytes():
    """Best-effort VMEM capacity query; conservative (v7x-sized) fallback."""
    try:
        info = pltpu.get_tpu_info()
        cap = getattr(info, "vmem_capacity_bytes", None)
        if cap:
            return int(cap)
    except Exception:
        pass
    return 64 * 1024 * 1024


_VMEM_CAP = _tpu_vmem_capacity_bytes()
if _VMEM_CAP >= (128 << 20):            # v5e / v6e: 128 MiB VMEM
    _DATA_BUDGET = 40 << 20
    _VMEM_LIMIT = 64 << 20
elif _VMEM_CAP >= (64 << 20):           # v7x: 64 MiB VMEM per TensorCore
    _DATA_BUDGET = 24 << 20
    _VMEM_LIMIT = 48 << 20
else:                                   # unknown / tiny: stay conservative
    _DATA_BUDGET = 12 << 20
    _VMEM_LIMIT = 32 << 20


def _round_up(x, m):
    return ((x + m - 1) // m) * m


def _pick_tm(m_rows, k, np_):
    """Largest M tile (multiple of 8, capped) whose footprint fits the budget.

    Patch tiles are bf16 (2 B) and double-buffered; output tiles are f32 (4 B)
    and double-buffered; the bf16 weight and f32 stat/affine rows are resident.
    """
    m8 = _round_up(m_rows, _SUB)
    resident = 2 * k * np_ + 4 * 4 * np_
    per_row = 2 * (2 * k) + 4 * (2 * np_)
    budget_rows = max((_DATA_BUDGET - resident) // per_row, _SUB)
    budget_rows = max((budget_rows // _SUB) * _SUB, _SUB)
    return int(min(m8, _TM_CAP, budget_rows))


# ----------------------------------------------------------------------------
# Pallas kernels
# ----------------------------------------------------------------------------
def _conv_act_kernel(p_ref, w_ref, o_ref, *, act):
    """One M tile of the im2col matmul fused with the pointwise activation."""
    y = jnp.dot(p_ref[...], w_ref[...], preferred_element_type=jnp.float32)
    if act == "leaky":
        y = jnp.where(y > 0, y, _NEG_SLOPE * y)
    elif act == "sigmoid":
        y = 1.0 / (1.0 + jnp.exp(-y))        # exact sigmoid (exp on EUP)
    # act == "none": raw conv output (wasserstein head)
    o_ref[...] = y


def _conv_bn_lrelu_resident_kernel(p_ref, w_ref, g_ref, b_ref, o_ref,
                                   y_ref, sum_ref, ssq_ref, *, m_total):
    """Conv + training-mode BatchNorm2d + LeakyReLU with a VMEM-resident y.

    Grid = (2 phases, M tiles), phase outer.
      phase 0: matmul -> y tile stored into the persistent VMEM scratch; per-
               channel sum / sum-of-squares accumulated in f32.
      phase 1: read the y tile back from VMEM (no HBM patch re-read, no MXU
               recompute), normalize + affine + LeakyReLU, single HBM write.
    Zero-padded rows contribute nothing to the sums, so stats use the true M.
    """
    phase = pl.program_id(0)
    tile = pl.program_id(1)

    @pl.when((phase == 0) & (tile == 0))
    def _():
        sum_ref[...] = jnp.zeros_like(sum_ref)
        ssq_ref[...] = jnp.zeros_like(ssq_ref)

    @pl.when(phase == 0)
    def _():
        y = jnp.dot(p_ref[...], w_ref[...], preferred_element_type=jnp.float32)
        sum_ref[...] += jnp.sum(y, axis=0, keepdims=True)
        ssq_ref[...] += jnp.sum(y * y, axis=0, keepdims=True)
        y_ref[tile] = y

    @pl.when(phase == 1)
    def _():
        inv_m = jnp.float32(1.0 / m_total)
        mean = sum_ref[...] * inv_m
        var = jnp.maximum(ssq_ref[...] * inv_m - mean * mean, 0.0)
        y = y_ref[tile]
        xhat = (y - mean) * jax.lax.rsqrt(var + _EPS)
        z = xhat * g_ref[...] + b_ref[...]
        o_ref[...] = jnp.where(z > 0, z, _NEG_SLOPE * z)


def _conv_bn_lrelu_recompute_kernel(p_ref, w_ref, g_ref, b_ref, o_ref,
                                    sum_ref, ssq_ref, *, m_total):
    """Fallback when the conv output does not fit VMEM: recompute the matmul in
    phase 1, but still write the output only once (no phase-0 placeholder)."""
    phase = pl.program_id(0)
    tile = pl.program_id(1)

    y = jnp.dot(p_ref[...], w_ref[...], preferred_element_type=jnp.float32)

    @pl.when((phase == 0) & (tile == 0))
    def _():
        sum_ref[...] = jnp.zeros_like(sum_ref)
        ssq_ref[...] = jnp.zeros_like(ssq_ref)

    @pl.when(phase == 0)
    def _():
        sum_ref[...] += jnp.sum(y, axis=0, keepdims=True)
        ssq_ref[...] += jnp.sum(y * y, axis=0, keepdims=True)

    @pl.when(phase == 1)
    def _():
        inv_m = jnp.float32(1.0 / m_total)
        mean = sum_ref[...] * inv_m
        var = jnp.maximum(ssq_ref[...] * inv_m - mean * mean, 0.0)
        xhat = (y - mean) * jax.lax.rsqrt(var + _EPS)
        z = xhat * g_ref[...] + b_ref[...]
        o_ref[...] = jnp.where(z > 0, z, _NEG_SLOPE * z)


# ----------------------------------------------------------------------------
# im2col / weight packing glue (plain JAX, outside the hot kernels)
# ----------------------------------------------------------------------------
def _im2col(x_nhwc, kh, kw, stride, pad):
    """Patch matrix with columns in (i, j, c) order (matches packed weight)."""
    N, H, W, C = x_nhwc.shape
    xp = jnp.pad(x_nhwc, ((0, 0), (pad, pad), (pad, pad), (0, 0)))
    Hp, Wp = H + 2 * pad, W + 2 * pad
    Ho = (Hp - kh) // stride + 1
    Wo = (Wp - kw) // stride + 1
    pats = [xp[:, i:i + stride * Ho:stride, j:j + stride * Wo:stride, :]
            for i in range(kh) for j in range(kw)]
    p = jnp.concatenate(pats, axis=-1)              # (N, Ho, Wo, kh*kw*C)
    return p.reshape(N * Ho * Wo, kh * kw * C), Ho, Wo


def _prep_weight(w_oihw, np_):
    """(Cout, Cin, kh, kw) -> bf16 (K, Np) matrix in (i, j, c) row order.

    K is left unpadded (legal: the block's K dim equals the full array dim);
    only Cout is zero-padded to the lane width for an unmasked, lane-dense
    output store.
    """
    Cout, Cin, kh, kw = w_oihw.shape
    K = kh * kw * Cin
    wmat = jnp.transpose(w_oihw.astype(jnp.float32), (2, 3, 1, 0)).reshape(K, Cout)
    return jnp.pad(wmat, ((0, 0), (0, np_ - Cout))).astype(jnp.bfloat16)


# ----------------------------------------------------------------------------
# Layer wrappers
# ----------------------------------------------------------------------------
def conv2d_act_pallas(x_nhwc, w_oihw, *, stride, pad, act):
    """Conv2d (bias=False) + activation via one Pallas matmul kernel."""
    N, H, W, C = x_nhwc.shape
    Cout, Cin, kh, kw = w_oihw.shape
    assert Cin == C

    p, Ho, Wo = _im2col(x_nhwc.astype(jnp.float32), kh, kw, stride, pad)
    M, K = p.shape
    Np = _round_up(Cout, _LANE)
    tm = _pick_tm(M, K, Np)
    Mp = _round_up(M, tm)

    p = jnp.pad(p, ((0, Mp - M), (0, 0))).astype(jnp.bfloat16)   # no K padding
    wmat = _prep_weight(w_oihw, Np)

    out = pl.pallas_call(
        functools.partial(_conv_act_kernel, act=act),
        out_shape=jax.ShapeDtypeStruct((Mp, Np), jnp.float32),
        grid=(Mp // tm,),
        in_specs=[
            pl.BlockSpec((tm, K), lambda i: (i, 0)),
            pl.BlockSpec((K, Np), lambda i: (0, 0)),
        ],
        out_specs=pl.BlockSpec((tm, Np), lambda i: (i, 0)),
        compiler_params=pltpu.CompilerParams(
            dimension_semantics=("parallel",),
            vmem_limit_bytes=_VMEM_LIMIT),
    )(p, wmat)
    return out[:M, :Cout].reshape(N, Ho, Wo, Cout)


def conv2d_bn_lrelu_pallas(x_nhwc, w_oihw, gamma, beta, *, stride, pad):
    """Conv2d (bias=False) + training-mode BatchNorm2d + LeakyReLU, one kernel."""
    N, H, W, C = x_nhwc.shape
    Cout, Cin, kh, kw = w_oihw.shape
    assert Cin == C

    p, Ho, Wo = _im2col(x_nhwc.astype(jnp.float32), kh, kw, stride, pad)
    M, K = p.shape
    Np = _round_up(Cout, _LANE)
    tm = _pick_tm(M, K, Np)
    Mp = _round_up(M, tm)
    T = Mp // tm

    p = jnp.pad(p, ((0, Mp - M), (0, 0))).astype(jnp.bfloat16)   # no K padding
    wmat = _prep_weight(w_oihw, Np)
    g = jnp.pad(gamma.reshape(1, Cout).astype(jnp.float32), ((0, 0), (0, Np - Cout)))
    b = jnp.pad(beta.reshape(1, Cout).astype(jnp.float32), ((0, 0), (0, Np - Cout)))

    # Generation-gated choice: keep the raw conv output resident in VMEM
    # (phase 1 reads it back instead of re-reading patches / re-running the
    # MXU) only if it fits the per-generation data budget.
    y_bytes = Mp * Np * 4
    stream_bytes = tm * (2 * 2 * K + 2 * 4 * Np)       # double-buffered in/out tiles
    resident_ok = (y_bytes + 2 * K * Np + stream_bytes + 16 * Np) <= _DATA_BUDGET

    if resident_ok:
        kernel = functools.partial(_conv_bn_lrelu_resident_kernel, m_total=M)
        p_map = lambda ph, j: ((1 - ph) * j, 0)        # phase 1: no patch re-stream
        scratch = [pltpu.VMEM((T, tm, Np), jnp.float32),   # resident conv output
                   pltpu.VMEM((1, Np), jnp.float32),       # per-channel sum
                   pltpu.VMEM((1, Np), jnp.float32)]       # per-channel sum of sq
    else:
        kernel = functools.partial(_conv_bn_lrelu_recompute_kernel, m_total=M)
        p_map = lambda ph, j: (j, 0)                   # phase 1 recomputes matmul
        scratch = [pltpu.VMEM((1, Np), jnp.float32),
                   pltpu.VMEM((1, Np), jnp.float32)]

    out = pl.pallas_call(
        kernel,
        out_shape=jax.ShapeDtypeStruct((Mp, Np), jnp.float32),
        grid=(2, T),                                   # (phase, M tile), phase outer
        in_specs=[
            pl.BlockSpec((tm, K), p_map),
            pl.BlockSpec((K, Np), lambda ph, j: (0, 0)),
            pl.BlockSpec((1, Np), lambda ph, j: (0, 0)),
            pl.BlockSpec((1, Np), lambda ph, j: (0, 0)),
        ],
        # Phase 0 never writes the output; keep its block index pinned at 0 so
        # no garbage/duplicate writebacks reach HBM.  Phase 1 writes each block
        # exactly once.
        out_specs=pl.BlockSpec((tm, Np), lambda ph, j: (ph * j, 0)),
        scratch_shapes=scratch,
        compiler_params=pltpu.CompilerParams(
            dimension_semantics=("arbitrary", "arbitrary"),
            vmem_limit_bytes=_VMEM_LIMIT),
    )(p, wmat, g, b)
    # TODO(synk): shard the M axis across v7x's two TensorCores (per-core
    # partial sums combined at the phase boundary) for another ~2x on layers 2-4.
    return out[:M, :Cout].reshape(N, Ho, Wo, Cout)


# ----------------------------------------------------------------------------
# Full Discriminator forward
# ----------------------------------------------------------------------------
def discriminator_forward(x_nchw, params, wasserstein=False):
    # NCHW (PyTorch) -> NHWC (kernel layout)
    x = jnp.transpose(x_nchw, (0, 2, 3, 1)).astype(jnp.float32)

    x = conv2d_act_pallas(x, params["w1"], stride=2, pad=1, act="leaky")
    x = conv2d_bn_lrelu_pallas(x, params["w2"], params["g2"], params["b2"],
                               stride=2, pad=1)
    x = conv2d_bn_lrelu_pallas(x, params["w3"], params["g3"], params["b3"],
                               stride=2, pad=1)
    x = conv2d_bn_lrelu_pallas(x, params["w4"], params["g4"], params["b4"],
                               stride=2, pad=1)
    x = conv2d_act_pallas(x, params["w5"], stride=2, pad=0,
                          act=("none" if wasserstein else "sigmoid"))

    # NHWC -> NCHW; final shape (N, 1, 1, 1)
    return jnp.transpose(x, (0, 3, 1, 2))


def init_params(key, num_disc_feat=8, color_channels=1):
    """DCGAN-style init: conv weights ~ N(0, 0.02), BN gamma=1, beta=0."""
    F = num_disc_feat
    ks = jax.random.split(key, 5)
    return {
        "w1": 0.02 * jax.random.normal(ks[0], (F,     color_channels, 4, 4), jnp.float32),
        "w2": 0.02 * jax.random.normal(ks[1], (2 * F, F,              4, 4), jnp.float32),
        "w3": 0.02 * jax.random.normal(ks[2], (4 * F, 2 * F,          4, 4), jnp.float32),
        "w4": 0.02 * jax.random.normal(ks[3], (8 * F, 4 * F,          4, 4), jnp.float32),
        "w5": 0.02 * jax.random.normal(ks[4], (1,     8 * F,          4, 4), jnp.float32),
        "g2": jnp.ones((2 * F,), jnp.float32), "b2": jnp.zeros((2 * F,), jnp.float32),
        "g3": jnp.ones((4 * F,), jnp.float32), "b3": jnp.zeros((4 * F,), jnp.float32),
        "g4": jnp.ones((8 * F,), jnp.float32), "b4": jnp.zeros((8 * F,), jnp.float32),
    }


if __name__ == "__main__":
    key = jax.random.PRNGKey(0)
    kx, kp = jax.random.split(key)

    # Small-but-valid DCGAN discriminator config: batch=2, 1 color channel,
    # 64x64 spatial (required for the final 4x4/s2/p0 conv -> 1x1), F=8.
    x = jax.random.normal(kx, (2, 1, 64, 64), jnp.float32)
    params = init_params(kp, num_disc_feat=8, color_channels=1)

    fwd = jax.jit(functools.partial(discriminator_forward, wasserstein=False))
    out = fwd(x, params)
    out = jax.block_until_ready(out)

    assert out.shape == (2, 1, 1, 1), out.shape
    assert bool(jnp.all(jnp.isfinite(out)))
    assert bool(jnp.all((out >= 0.0) & (out <= 1.0)))  # sigmoid range
    print("KERNEL_OK")
</pallas_src>

<mosaic_0001>
module attributes {stable_mosaic.version = 11 : i64} {
  func.func @_conv_act_kernel(%arg0: i32, %arg1: memref<1024x16xbf16, #tpu.memory_space<vmem>>, %arg2: memref<16x128xbf16, #tpu.memory_space<vmem>>, %arg3: memref<1024x128xf32, #tpu.memory_space<vmem>>) attributes {dimension_semantics = [#tpu.dimension_semantics<parallel>], iteration_bounds = array<i64: 2>, scalar_prefetch = 0 : i64, scratch_operands = 0 : i64, tpu.core_type = #tpu.core_type<tc>, window_params = [{transform_indices = @transform_0, window_bounds = array<i64: 1024, 16>}, {pipeline_mode = #tpu.pipeline_mode<synchronous>, transform_indices = @transform_1, window_bounds = array<i64: 16, 128>}, {transform_indices = @transform_2, window_bounds = array<i64: 1024, 128>}]} {
    %c0 = arith.constant 0 : index
    %c0_0 = arith.constant 0 : index
    %0 = vector.load %arg1[%c0, %c0_0] : memref<1024x16xbf16, #tpu.memory_space<vmem>>, vector<1024x16xbf16>
    %c0_1 = arith.constant 0 : index
    %c0_2 = arith.constant 0 : index
    %1 = vector.load %arg2[%c0_1, %c0_2] : memref<16x128xbf16, #tpu.memory_space<vmem>>, vector<16x128xbf16>
    %cst = arith.constant dense<0.000000e+00> : vector<1024x128xf32>
    %2 = tpu.matmul %0, %1, %cst {dimension_numbers = #tpu.dot_dimension_numbers<[1], [0], [0], [1], [0, 0, 1, 1], [], []>} : vector<1024x16xbf16>, vector<16x128xbf16>, vector<1024x128xf32> -> vector<1024x128xf32>
    %cst_3 = arith.constant 0.000000e+00 : f32
    %3 = vector.broadcast %cst_3 : f32 to vector<1024x128xf32>
    %4 = arith.cmpf ogt, %2, %3 : vector<1024x128xf32>
    %cst_4 = arith.constant 2.000000e-01 : f32
    %5 = vector.broadcast %cst_4 : f32 to vector<1024x128xf32>
    %6 = arith.mulf %5, %2 : vector<1024x128xf32>
    %7 = arith.select %4, %2, %6 : vector<1024x128xi1>, vector<1024x128xf32>
    %c0_5 = arith.constant 0 : index
    %c0_6 = arith.constant 0 : index
    %8 = vector.load %arg3[%c0_5, %c0_6] : memref<1024x128xf32, #tpu.memory_space<vmem>>, vector<1024x128xf32>
    tpu.vector_store %arg3[%c0_5, %c0_6], %7 {strides = array<i32>} : memref<1024x128xf32, #tpu.memory_space<vmem>>, vector<1024x128xf32>,
    return
  }
  func.func @transform_0(%arg0: i32) -> (i32, i32) {
    %c0_i32 = arith.constant 0 : i32
    %c0_i32_0 = arith.constant 0 : i32
    return %arg0, %c0_i32 : i32, i32
  }
  func.func @transform_1(%arg0: i32) -> (i32, i32) {
    %c0_i32 = arith.constant 0 : i32
    %c0_i32_0 = arith.constant 0 : i32
    %c0_i32_1 = arith.constant 0 : i32
    return %c0_i32, %c0_i32_0 : i32, i32
  }
  func.func @transform_2(%arg0: i32) -> (i32, i32) {
    %c0_i32 = arith.constant 0 : i32
    %c0_i32_0 = arith.constant 0 : i32
    return %arg0, %c0_i32 : i32, i32
  }
}

module attributes {stable_mosaic.version = 11 : i64} {
  func.func @_conv_bn_lrelu_resident_kernel(%arg0: i32, %arg1: i32, %arg2: memref<512x128xbf16, #tpu.memory_space<vmem>>, %arg3: memref<128x128xbf16, #tpu.memory_space<vmem>>, %arg4: memref<1x128xf32, #tpu.memory_space<vmem>>, %arg5: memref<1x128xf32, #tpu.memory_space<vmem>>, %arg6: memref<512x128xf32, #tpu.memory_space<vmem>>, %arg7: memref<1x512x128xf32, #tpu.memory_space<vmem>>, %arg8: memref<1x128xf32, #tpu.memory_space<vmem>>, %arg9: memref<1x128xf32, #tpu.memory_space<vmem>>) attributes {dimension_semantics = [#tpu.dimension_semantics<arbitrary>, #tpu.dimension_semantics<arbitrary>], iteration_bounds = array<i64: 2, 1>, scalar_prefetch = 0 : i64, scratch_operands = 3 : i64, tpu.core_type = #tpu.core_type<tc>, window_params = [{transform_indices = @transform_0, window_bounds = array<i64: 512, 128>}, {pipeline_mode = #tpu.pipeline_mode<synchronous>, transform_indices = @transform_1, window_bounds = array<i64: 128, 128>}, {pipeline_mode = #tpu.pipeline_mode<synchronous>, transform_indices = @transform_2, window_bounds = array<i64: 1, 128>}, {pipeline_mode = #tpu.pipeline_mode<synchronous>, transform_indices = @transform_3, window_bounds = array<i64: 1, 128>}, {transform_indices = @transform_4, window_bounds = array<i64: 512, 128>}]} {
    %c0_i32 = arith.constant 0 : i32
    %0 = arith.cmpi eq, %arg0, %c0_i32 : i32
    %c0_i32_0 = arith.constant 0 : i32
    %1 = arith.cmpi eq, %arg1, %c0_i32_0 : i32
    %2 = arith.andi %0, %1 : i1
    %3 = arith.extui %2 : i1 to i32
    %c0_i32_1 = arith.constant 0 : i32
    %4 = arith.cmpi ne, %3, %c0_i32_1 : i32
    scf.if %4 {
      %cst = arith.constant 0.000000e+00 : f32
      %11 = vector.broadcast %cst : f32 to vector<1x128xf32>
      %c0 = arith.constant 0 : index
      %c0_5 = arith.constant 0 : index
      %12 = vector.load %arg8[%c0, %c0_5] : memref<1x128xf32, #tpu.memory_space<vmem>>, vector<1x128xf32>
      tpu.vector_store %arg8[%c0, %c0_5], %11 {strides = array<i32>} : memref<1x128xf32, #tpu.memory_space<vmem>>, vector<1x128xf32>,
      %cst_6 = arith.constant 0.000000e+00 : f32
      %13 = vector.broadcast %cst_6 : f32 to vector<1x128xf32>
      %c0_7 = arith.constant 0 : index
      %c0_8 = arith.constant 0 : index
      %14 = vector.load %arg9[%c0_7, %c0_8] : memref<1x128xf32, #tpu.memory_space<vmem>>, vector<1x128xf32>
      tpu.vector_store %arg9[%c0_7, %c0_8], %13 {strides = array<i32>} : memref<1x128xf32, #tpu.memory_space<vmem>>, vector<1x128xf32>,
    } else {
    }
    %c0_i32_2 = arith.constant 0 : i32
    %5 = arith.cmpi eq, %arg0, %c0_i32_2 : i32
    %6 = arith.extui %5 : i1 to i32
    %c0_i32_3 = arith.constant 0 : i32
    %7 = arith.cmpi ne, %6, %c0_i32_3 : i32
    scf.if %7 {
      %c0 = arith.constant 0 : index
      %c0_5 = arith.constant 0 : index
      %11 = vector.load %arg2[%c0, %c0_5] : memref<512x128xbf16, #tpu.memory_space<vmem>>, vector<512x128xbf16>
      %c0_6 = arith.constant 0 : index
      %c0_7 = arith.constant 0 : index
      %12 = vector.load %arg3[%c0_6, %c0_7] : memref<128x128xbf16, #tpu.memory_space<vmem>>, vector<128x128xbf16>
      %cst = arith.constant dense<0.000000e+00> : vector<512x128xf32>
      %13 = tpu.matmul %11, %12, %cst {dimension_numbers = #tpu.dot_dimension_numbers<[1], [0], [0], [1], [0, 0, 1, 1], [], []>} : vector<512x128xbf16>, vector<128x128xbf16>, vector<512x128xf32> -> vector<512x128xf32>
      %c0_8 = arith.constant 0 : index
      %c0_9 = arith.constant 0 : index
      %14 = vector.load %arg8[%c0_8, %c0_9] : memref<1x128xf32, #tpu.memory_space<vmem>>, vector<1x128xf32>
      %cst_10 = arith.constant dense<0.000000e+00> : vector<128xf32>
      %15 = vector.multi_reduction <add>, %13, %cst_10 [0] : vector<512x128xf32> to vector<128xf32>
      %16 = vector.shape_cast %15 : vector<128xf32> to vector<1x128xf32>
      %17 = arith.addf %14, %16 : vector<1x128xf32>
      %c0_11 = arith.constant 0 : index
      %c0_12 = arith.constant 0 : index
      %18 = vector.load %arg8[%c0_11, %c0_12] : memref<1x128xf32, #tpu.memory_space<vmem>>, vector<1x128xf32>
      tpu.vector_store %arg8[%c0_11, %c0_12], %17 {strides = array<i32>} : memref<1x128xf32, #tpu.memory_space<vmem>>, vector<1x128xf32>,
      %c0_13 = arith.constant 0 : index
      %c0_14 = arith.constant 0 : index
      %19 = vector.load %arg9[%c0_13, %c0_14] : memref<1x128xf32, #tpu.memory_space<vmem>>, vector<1x128xf32>
      %20 = arith.mulf %13, %13 : vector<512x128xf32>
      %cst_15 = arith.constant dense<0.000000e+00> : vector<128xf32>
      %21 = vector.multi_reduction <add>, %20, %cst_15 [0] : vector<512x128xf32> to vector<128xf32>
      %22 = vector.shape_cast %21 : vector<128xf32> to vector<1x128xf32>
      %23 = arith.addf %19, %22 : vector<1x128xf32>
      %c0_16 = arith.constant 0 : index
      %c0_17 = arith.constant 0 : index
      %24 = vector.load %arg9[%c0_16, %c0_17] : memref<1x128xf32, #tpu.memory_space<vmem>>, vector<1x128xf32>
      tpu.vector_store %arg9[%c0_16, %c0_17], %23 {strides = array<i32>} : memref<1x128xf32, #tpu.memory_space<vmem>>, vector<1x128xf32>,
      %25 = arith.index_cast %arg1 : i32 to index
      %c0_18 = arith.constant 0 : index
      %c0_19 = arith.constant 0 : index
      %26 = vector.load %arg7[%25, %c0_18, %c0_19] : memref<1x512x128xf32, #tpu.memory_space<vmem>>, vector<1x512x128xf32>
      %27 = vector.shape_cast %26 : vector<1x512x128xf32> to vector<512x128xf32>
      %28 = vector.shape_cast %13 : vector<512x128xf32> to vector<1x512x128xf32>
      tpu.vector_store %arg7[%25, %c0_18, %c0_19], %28 {strides = array<i32>} : memref<1x512x128xf32, #tpu.memory_space<vmem>>, vector<1x512x128xf32>,
    } else {
    }
    %c1_i32 = arith.constant 1 : i32
    %8 = arith.cmpi eq, %arg0, %c1_i32 : i32
    %9 = arith.extui %8 : i1 to i32
    %c0_i32_4 = arith.constant 0 : i32
    %10 = arith.cmpi ne, %9, %c0_i32_4 : i32
    scf.if %10 {
      %c0 = arith.constant 0 : index
      %c0_5 = arith.constant 0 : index
      %11 = vector.load %arg8[%c0, %c0_5] : memref<1x128xf32, #tpu.memory_space<vmem>>, vector<1x128xf32>
      %cst = arith.constant 0.001953125 : f32
      %12 = vector.broadcast %cst : f32 to vector<1x128xf32>
      %13 = arith.mulf %11, %12 : vector<1x128xf32>
      %c0_6 = arith.constant 0 : index
      %c0_7 = arith.constant 0 : index
      %14 = vector.load %arg9[%c0_6, %c0_7] : memref<1x128xf32, #tpu.memory_space<vmem>>, vector<1x128xf32>
      %cst_8 = arith.constant 0.001953125 : f32
      %15 = vector.broadcast %cst_8 : f32 to vector<1x128xf32>
      %16 = arith.mulf %14, %15 : vector<1x128xf32>
      %17 = arith.mulf %13, %13 : vector<1x128xf32>
      %18 = arith.subf %16, %17 : vector<1x128xf32>
      %cst_9 = arith.constant 0.000000e+00 : f32
      %19 = vector.broadcast %cst_9 : f32 to vector<1x128xf32>
      %20 = arith.maximumf %18, %19 : vector<1x128xf32>
      %21 = arith.index_cast %arg1 : i32 to index
      %c0_10 = arith.constant 0 : index
      %c0_11 = arith.constant 0 : index
      %22 = vector.load %arg7[%21, %c0_10, %c0_11] : memref<1x512x128xf32, #tpu.memory_space<vmem>>, vector<1x512x128xf32>
      %23 = vector.shape_cast %22 : vector<1x512x128xf32> to vector<512x128xf32>
      %24 = vector.broadcast %13 : vector<1x128xf32> to vector<512x128xf32>
      %25 = arith.subf %23, %24 : vector<512x128xf32>
      %cst_12 = arith.constant 9.99999974E-6 : f32
      %26 = vector.broadcast %cst_12 : f32 to vector<1x128xf32>
      %27 = arith.addf %20, %26 : vector<1x128xf32>
      %28 = math.rsqrt %27 : vector<1x128xf32>
      %29 = vector.broadcast %28 : vector<1x128xf32> to vector<512x128xf32>
      %30 = arith.mulf %25, %29 : vector<512x128xf32>
      %c0_13 = arith.constant 0 : index
      %c0_14 = arith.constant 0 : index
      %31 = vector.load %arg4[%c0_13, %c0_14] : memref<1x128xf32, #tpu.memory_space<vmem>>, vector<1x128xf32>
      %32 = vector.broadcast %31 : vector<1x128xf32> to vector<512x128xf32>
      %33 = arith.mulf %30, %32 : vector<512x128xf32>
      %c0_15 = arith.constant 0 : index
      %c0_16 = arith.constant 0 : index
      %34 = vector.load %arg5[%c0_15, %c0_16] : memref<1x128xf32, #tpu.memory_space<vmem>>, vector<1x128xf32>
      %35 = vector.broadcast %34 : vector<1x128xf32> to vector<512x128xf32>
      %36 = arith.addf %33, %35 : vector<512x128xf32>
      %cst_17 = arith.constant 0.000000e+00 : f32
      %37 = vector.broadcast %cst_17 : f32 to vector<512x128xf32>
      %38 = arith.cmpf ogt, %36, %37 : vector<512x128xf32>
      %cst_18 = arith.constant 2.000000e-01 : f32
      %39 = vector.broadcast %cst_18 : f32 to vector<512x128xf32>
      %40 = arith.mulf %39, %36 : vector<512x128xf32>
      %41 = arith.select %38, %36, %40 : vector<512x128xi1>, vector<512x128xf32>
      %c0_19 = arith.constant 0 : index
      %c0_20 = arith.constant 0 : index
      %42 = vector.load %arg6[%c0_19, %c0_20] : memref<512x128xf32, #tpu.memory_space<vmem>>, vector<512x128xf32>
      tpu.vector_store %arg6[%c0_19, %c0_20], %41 {strides = array<i32>} : memref<512x128xf32, #tpu.memory_space<vmem>>, vector<512x128xf32>,
    } else {
    }
    return
  }
  func.func @transform_0(%arg0: i32, %arg1: i32) -> (i32, i32) {
    %c1_i32 = arith.constant 1 : i32
    %0 = arith.subi %c1_i32, %arg0 : i32
    %1 = arith.muli %0, %arg1 : i32
    %c0_i32 = arith.constant 0 : i32
    %c0_i32_0 = arith.constant 0 : i32
    return %1, %c0_i32 : i32, i32
  }
  func.func @transform_1(%arg0: i32, %arg1: i32) -> (i32, i32) {
    %c0_i32 = arith.constant 0 : i32
    %c0_i32_0 = arith.constant 0 : i32
    %c0_i32_1 = arith.constant 0 : i32
    return %c0_i32, %c0_i32_0 : i32, i32
  }
  func.func @transform_2(%arg0: i32, %arg1: i32) -> (i32, i32) {
    %c0_i32 = arith.constant 0 : i32
    %c0_i32_0 = arith.constant 0 : i32
    %c0_i32_1 = arith.constant 0 : i32
    return %c0_i32, %c0_i32_0 : i32, i32
  }
  func.func @transform_3(%arg0: i32, %arg1: i32) -> (i32, i32) {
    %c0_i32 = arith.constant 0 : i32
    %c0_i32_0 = arith.constant 0 : i32
    %c0_i32_1 = arith.constant 0 : i32
    return %c0_i32, %c0_i32_0 : i32, i32
  }
  func.func @transform_4(%arg0: i32, %arg1: i32) -> (i32, i32) {
    %0 = arith.muli %arg0, %arg1 : i32
    %c0_i32 = arith.constant 0 : i32
    %c0_i32_0 = arith.constant 0 : i32
    return %0, %c0_i32 : i32, i32
  }
}

module attributes {stable_mosaic.version = 11 : i64} {
  func.func @_conv_bn_lrelu_resident_kernel(%arg0: i32, %arg1: i32, %arg2: memref<128x256xbf16, #tpu.memory_space<vmem>>, %arg3: memref<256x128xbf16, #tpu.memory_space<vmem>>, %arg4: memref<1x128xf32, #tpu.memory_space<vmem>>, %arg5: memref<1x128xf32, #tpu.memory_space<vmem>>, %arg6: memref<128x128xf32, #tpu.memory_space<vmem>>, %arg7: memref<1x128x128xf32, #tpu.memory_space<vmem>>, %arg8: memref<1x128xf32, #tpu.memory_space<vmem>>, %arg9: memref<1x128xf32, #tpu.memory_space<vmem>>) attributes {dimension_semantics = [#tpu.dimension_semantics<arbitrary>, #tpu.dimension_semantics<arbitrary>], iteration_bounds = array<i64: 2, 1>, scalar_prefetch = 0 : i64, scratch_operands = 3 : i64, tpu.core_type = #tpu.core_type<tc>, window_params = [{transform_indices = @transform_0, window_bounds = array<i64: 128, 256>}, {pipeline_mode = #tpu.pipeline_mode<synchronous>, transform_indices = @transform_1, window_bounds = array<i64: 256, 128>}, {pipeline_mode = #tpu.pipeline_mode<synchronous>, transform_indices = @transform_2, window_bounds = array<i64: 1, 128>}, {pipeline_mode = #tpu.pipeline_mode<synchronous>, transform_indices = @transform_3, window_bounds = array<i64: 1, 128>}, {transform_indices = @transform_4, window_bounds = array<i64: 128, 128>}]} {
    %c0_i32 = arith.constant 0 : i32
    %0 = arith.cmpi eq, %arg0, %c0_i32 : i32
    %c0_i32_0 = arith.constant 0 : i32
    %1 = arith.cmpi eq, %arg1, %c0_i32_0 : i32
    %2 = arith.andi %0, %1 : i1
    %3 = arith.extui %2 : i1 to i32
    %c0_i32_1 = arith.constant 0 : i32
    %4 = arith.cmpi ne, %3, %c0_i32_1 : i32
    scf.if %4 {
      %cst = arith.constant 0.000000e+00 : f32
      %11 = vector.broadcast %cst : f32 to vector<1x128xf32>
      %c0 = arith.constant 0 : index
      %c0_5 = arith.constant 0 : index
      %12 = vector.load %arg8[%c0, %c0_5] : memref<1x128xf32, #tpu.memory_space<vmem>>, vector<1x128xf32>
      tpu.vector_store %arg8[%c0, %c0_5], %11 {strides = array<i32>} : memref<1x128xf32, #tpu.memory_space<vmem>>, vector<1x128xf32>,
      %cst_6 = arith.constant 0.000000e+00 : f32
      %13 = vector.broadcast %cst_6 : f32 to vector<1x128xf32>
      %c0_7 = arith.constant 0 : index
      %c0_8 = arith.constant 0 : index
      %14 = vector.load %arg9[%c0_7, %c0_8] : memref<1x128xf32, #tpu.memory_space<vmem>>, vector<1x128xf32>
      tpu.vector_store %arg9[%c0_7, %c0_8], %13 {strides = array<i32>} : memref<1x128xf32, #tpu.memory_space<vmem>>, vector<1x128xf32>,
    } else {
    }
    %c0_i32_2 = arith.constant 0 : i32
    %5 = arith.cmpi eq, %arg0, %c0_i32_2 : i32
    %6 = arith.extui %5 : i1 to i32
    %c0_i32_3 = arith.constant 0 : i32
    %7 = arith.cmpi ne, %6, %c0_i32_3 : i32
    scf.if %7 {
      %c0 = arith.constant 0 : index
      %c0_5 = arith.constant 0 : index
      %11 = vector.load %arg2[%c0, %c0_5] : memref<128x256xbf16, #tpu.memory_space<vmem>>, vector<128x256xbf16>
      %c0_6 = arith.constant 0 : index
      %c0_7 = arith.constant 0 : index
      %12 = vector.load %arg3[%c0_6, %c0_7] : memref<256x128xbf16, #tpu.memory_space<vmem>>, vector<256x128xbf16>
      %cst = arith.constant dense<0.000000e+00> : vector<128x128xf32>
      %13 = tpu.matmul %11, %12, %cst {dimension_numbers = #tpu.dot_dimension_numbers<[1], [0], [0], [1], [0, 0, 1, 1], [], []>} : vector<128x256xbf16>, vector<256x128xbf16>, vector<128x128xf32> -> vector<128x128xf32>
      %c0_8 = arith.constant 0 : index
      %c0_9 = arith.constant 0 : index
      %14 = vector.load %arg8[%c0_8, %c0_9] : memref<1x128xf32, #tpu.memory_space<vmem>>, vector<1x128xf32>
      %cst_10 = arith.constant dense<0.000000e+00> : vector<128xf32>
      %15 = vector.multi_reduction <add>, %13, %cst_10 [0] : vector<128x128xf32> to vector<128xf32>
      %16 = vector.shape_cast %15 : vector<128xf32> to vector<1x128xf32>
      %17 = arith.addf %14, %16 : vector<1x128xf32>
      %c0_11 = arith.constant 0 : index
      %c0_12 = arith.constant 0 : index
      %18 = vector.load %arg8[%c0_11, %c0_12] : memref<1x128xf32, #tpu.memory_space<vmem>>, vector<1x128xf32>
      tpu.vector_store %arg8[%c0_11, %c0_12], %17 {strides = array<i32>} : memref<1x128xf32, #tpu.memory_space<vmem>>, vector<1x128xf32>,
      %c0_13 = arith.constant 0 : index
      %c0_14 = arith.constant 0 : index
      %19 = vector.load %arg9[%c0_13, %c0_14] : memref<1x128xf32, #tpu.memory_space<vmem>>, vector<1x128xf32>
      %20 = arith.mulf %13, %13 : vector<128x128xf32>
      %cst_15 = arith.constant dense<0.000000e+00> : vector<128xf32>
      %21 = vector.multi_reduction <add>, %20, %cst_15 [0] : vector<128x128xf32> to vector<128xf32>
      %22 = vector.shape_cast %21 : vector<128xf32> to vector<1x128xf32>
      %23 = arith.addf %19, %22 : vector<1x128xf32>
      %c0_16 = arith.constant 0 : index
      %c0_17 = arith.constant 0 : index
      %24 = vector.load %arg9[%c0_16, %c0_17] : memref<1x128xf32, #tpu.memory_space<vmem>>, vector<1x128xf32>
      tpu.vector_store %arg9[%c0_16, %c0_17], %23 {strides = array<i32>} : memref<1x128xf32, #tpu.memory_space<vmem>>, vector<1x128xf32>,
      %25 = arith.index_cast %arg1 : i32 to index
      %c0_18 = arith.constant 0 : index
      %c0_19 = arith.constant 0 : index
      %26 = vector.load %arg7[%25, %c0_18, %c0_19] : memref<1x128x128xf32, #tpu.memory_space<vmem>>, vector<1x128x128xf32>
      %27 = vector.shape_cast %26 : vector<1x128x128xf32> to vector<128x128xf32>
      %28 = vector.shape_cast %13 : vector<128x128xf32> to vector<1x128x128xf32>
      tpu.vector_store %arg7[%25, %c0_18, %c0_19], %28 {strides = array<i32>} : memref<1x128x128xf32, #tpu.memory_space<vmem>>, vector<1x128x128xf32>,
    } else {
    }
    %c1_i32 = arith.constant 1 : i32
    %8 = arith.cmpi eq, %arg0, %c1_i32 : i32
    %9 = arith.extui %8 : i1 to i32
    %c0_i32_4 = arith.constant 0 : i32
    %10 = arith.cmpi ne, %9, %c0_i32_4 : i32
    scf.if %10 {
      %c0 = arith.constant 0 : index
      %c0_5 = arith.constant 0 : index
      %11 = vector.load %arg8[%c0, %c0_5] : memref<1x128xf32, #tpu.memory_space<vmem>>, vector<1x128xf32>
      %cst = arith.constant 7.812500e-03 : f32
      %12 = vector.broadcast %cst : f32 to vector<1x128xf32>
      %13 = arith.mulf %11, %12 : vector<1x128xf32>
      %c0_6 = arith.constant 0 : index
      %c0_7 = arith.constant 0 : index
      %14 = vector.load %arg9[%c0_6, %c0_7] : memref<1x128xf32, #tpu.memory_space<vmem>>, vector<1x128xf32>
      %cst_8 = arith.constant 7.812500e-03 : f32
      %15 = vector.broadcast %cst_8 : f32 to vector<1x128xf32>
      %16 = arith.mulf %14, %15 : vector<1x128xf32>
      %17 = arith.mulf %13, %13 : vector<1x128xf32>
      %18 = arith.subf %16, %17 : vector<1x128xf32>
      %cst_9 = arith.constant 0.000000e+00 : f32
      %19 = vector.broadcast %cst_9 : f32 to vector<1x128xf32>
      %20 = arith.maximumf %18, %19 : vector<1x128xf32>
      %21 = arith.index_cast %arg1 : i32 to index
      %c0_10 = arith.constant 0 : index
      %c0_11 = arith.constant 0 : index
      %22 = vector.load %arg7[%21, %c0_10, %c0_11] : memref<1x128x128xf32, #tpu.memory_space<vmem>>, vector<1x128x128xf32>
      %23 = vector.shape_cast %22 : vector<1x128x128xf32> to vector<128x128xf32>
      %24 = vector.broadcast %13 : vector<1x128xf32> to vector<128x128xf32>
      %25 = arith.subf %23, %24 : vector<128x128xf32>
      %cst_12 = arith.constant 9.99999974E-6 : f32
      %26 = vector.broadcast %cst_12 : f32 to vector<1x128xf32>
      %27 = arith.addf %20, %26 : vector<1x128xf32>
      %28 = math.rsqrt %27 : vector<1x128xf32>
      %29 = vector.broadcast %28 : vector<1x128xf32> to vector<128x128xf32>
      %30 = arith.mulf %25, %29 : vector<128x128xf32>
      %c0_13 = arith.constant 0 : index
      %c0_14 = arith.constant 0 : index
      %31 = vector.load %arg4[%c0_13, %c0_14] : memref<1x128xf32, #tpu.memory_space<vmem>>, vector<1x128xf32>
      %32 = vector.broadcast %31 : vector<1x128xf32> to vector<128x128xf32>
      %33 = arith.mulf %30, %32 : vector<128x128xf32>
      %c0_15 = arith.constant 0 : index
      %c0_16 = arith.constant 0 : index
      %34 = vector.load %arg5[%c0_15, %c0_16] : memref<1x128xf32, #tpu.memory_space<vmem>>, vector<1x128xf32>
      %35 = vector.broadcast %34 : vector<1x128xf32> to vector<128x128xf32>
      %36 = arith.addf %33, %35 : vector<128x128xf32>
      %cst_17 = arith.constant 0.000000e+00 : f32
      %37 = vector.broadcast %cst_17 : f32 to vector<128x128xf32>
      %38 = arith.cmpf ogt, %36, %37 : vector<128x128xf32>
      %cst_18 = arith.constant 2.000000e-01 : f32
      %39 = vector.broadcast %cst_18 : f32 to vector<128x128xf32>
      %40 = arith.mulf %39, %36 : vector<128x128xf32>
      %41 = arith.select %38, %36, %40 : vector<128x128xi1>, vector<128x128xf32>
      %c0_19 = arith.constant 0 : index
      %c0_20 = arith.constant 0 : index
      %42 = vector.load %arg6[%c0_19, %c0_20] : memref<128x128xf32, #tpu.memory_space<vmem>>, vector<128x128xf32>
      tpu.vector_store %arg6[%c0_19, %c0_20], %41 {strides = array<i32>} : memref<128x128xf32, #tpu.memory_space<vmem>>, vector<128x128xf32>,
    } else {
    }
    return
  }
  func.func @transform_0(%arg0: i32, %arg1: i32) -> (i32, i32) {
    %c1_i32 = arith.constant 1 : i32
    %0 = arith.subi %c1_i32, %arg0 : i32
    %1 = arith.muli %0, %arg1 : i32
    %c0_i32 = arith.constant 0 : i32
    %c0_i32_0 = arith.constant 0 : i32
    return %1, %c0_i32 : i32, i32
  }
  func.func @transform_1(%arg0: i32, %arg1: i32) -> (i32, i32) {
    %c0_i32 = arith.constant 0 : i32
    %c0_i32_0 = arith.constant 0 : i32
    %c0_i32_1 = arith.constant 0 : i32
    return %c0_i32, %c0_i32_0 : i32, i32
  }
  func.func @transform_2(%arg0: i32, %arg1: i32) -> (i32, i32) {
    %c0_i32 = arith.constant 0 : i32
    %c0_i32_0 = arith.constant 0 : i32
    %c0_i32_1 = arith.constant 0 : i32
    return %c0_i32, %c0_i32_0 : i32, i32
  }
  func.func @transform_3(%arg0: i32, %arg1: i32) -> (i32, i32) {
    %c0_i32 = arith.constant 0 : i32
    %c0_i32_0 = arith.constant 0 : i32
    %c0_i32_1 = arith.constant 0 : i32
    return %c0_i32, %c0_i32_0 : i32, i32
  }
  func.func @transform_4(%arg0: i32, %arg1: i32) -> (i32, i32) {
    %0 = arith.muli %arg0, %arg1 : i32
    %c0_i32 = arith.constant 0 : i32
    %c0_i32_0 = arith.constant 0 : i32
    return %0, %c0_i32 : i32, i32
  }
}

module attributes {stable_mosaic.version = 11 : i64} {
  func.func @_conv_bn_lrelu_resident_kernel(%arg0: i32, %arg1: i32, %arg2: memref<32x512xbf16, #tpu.memory_space<vmem>>, %arg3: memref<512x128xbf16, #tpu.memory_space<vmem>>, %arg4: memref<1x128xf32, #tpu.memory_space<vmem>>, %arg5: memref<1x128xf32, #tpu.memory_space<vmem>>, %arg6: memref<32x128xf32, #tpu.memory_space<vmem>>, %arg7: memref<1x32x128xf32, #tpu.memory_space<vmem>>, %arg8: memref<1x128xf32, #tpu.memory_space<vmem>>, %arg9: memref<1x128xf32, #tpu.memory_space<vmem>>) attributes {dimension_semantics = [#tpu.dimension_semantics<arbitrary>, #tpu.dimension_semantics<arbitrary>], iteration_bounds = array<i64: 2, 1>, scalar_prefetch = 0 : i64, scratch_operands = 3 : i64, tpu.core_type = #tpu.core_type<tc>, window_params = [{transform_indices = @transform_0, window_bounds = array<i64: 32, 512>}, {pipeline_mode = #tpu.pipeline_mode<synchronous>, transform_indices = @transform_1, window_bounds = array<i64: 512, 128>}, {pipeline_mode = #tpu.pipeline_mode<synchronous>, transform_indices = @transform_2, window_bounds = array<i64: 1, 128>}, {pipeline_mode = #tpu.pipeline_mode<synchronous>, transform_indices = @transform_3, window_bounds = array<i64: 1, 128>}, {transform_indices = @transform_4, window_bounds = array<i64: 32, 128>}]} {
    %c0_i32 = arith.constant 0 : i32
    %0 = arith.cmpi eq, %arg0, %c0_i32 : i32
    %c0_i32_0 = arith.constant 0 : i32
    %1 = arith.cmpi eq, %arg1, %c0_i32_0 : i32
    %2 = arith.andi %0, %1 : i1
    %3 = arith.extui %2 : i1 to i32
    %c0_i32_1 = arith.constant 0 : i32
    %4 = arith.cmpi ne, %3, %c0_i32_1 : i32
    scf.if %4 {
      %cst = arith.constant 0.000000e+00 : f32
      %11 = vector.broadcast %cst : f32 to vector<1x128xf32>
      %c0 = arith.constant 0 : index
      %c0_5 = arith.constant 0 : index
      %12 = vector.load %arg8[%c0, %c0_5] : memref<1x128xf32, #tpu.memory_space<vmem>>, vector<1x128xf32>
      tpu.vector_store %arg8[%c0, %c0_5], %11 {strides = array<i32>} : memref<1x128xf32, #tpu.memory_space<vmem>>, vector<1x128xf32>,
      %cst_6 = arith.constant 0.000000e+00 : f32
      %13 = vector.broadcast %cst_6 : f32 to vector<1x128xf32>
      %c0_7 = arith.constant 0 : index
      %c0_8 = arith.constant 0 : index
      %14 = vector.load %arg9[%c0_7, %c0_8] : memref<1x128xf32, #tpu.memory_space<vmem>>, vector<1x128xf32>
      tpu.vector_store %arg9[%c0_7, %c0_8], %13 {strides = array<i32>} : memref<1x128xf32, #tpu.memory_space<vmem>>, vector<1x128xf32>,
    } else {
    }
    %c0_i32_2 = arith.constant 0 : i32
    %5 = arith.cmpi eq, %arg0, %c0_i32_2 : i32
    %6 = arith.extui %5 : i1 to i32
    %c0_i32_3 = arith.constant 0 : i32
    %7 = arith.cmpi ne, %6, %c0_i32_3 : i32
    scf.if %7 {
      %c0 = arith.constant 0 : index
      %c0_5 = arith.constant 0 : index
      %11 = vector.load %arg2[%c0, %c0_5] : memref<32x512xbf16, #tpu.memory_space<vmem>>, vector<32x512xbf16>
      %c0_6 = arith.constant 0 : index
      %c0_7 = arith.constant 0 : index
      %12 = vector.load %arg3[%c0_6, %c0_7] : memref<512x128xbf16, #tpu.memory_space<vmem>>, vector<512x128xbf16>
      %cst = arith.constant dense<0.000000e+00> : vector<32x128xf32>
      %13 = tpu.matmul %11, %12, %cst {dimension_numbers = #tpu.dot_dimension_numbers<[1], [0], [0], [1], [0, 0, 1, 1], [], []>} : vector<32x512xbf16>, vector<512x128xbf16>, vector<32x128xf32> -> vector<32x128xf32>
      %c0_8 = arith.constant 0 : index
      %c0_9 = arith.constant 0 : index
      %14 = vector.load %arg8[%c0_8, %c0_9] : memref<1x128xf32, #tpu.memory_space<vmem>>, vector<1x128xf32>
      %cst_10 = arith.constant dense<0.000000e+00> : vector<128xf32>
      %15 = vector.multi_reduction <add>, %13, %cst_10 [0] : vector<32x128xf32> to vector<128xf32>
      %16 = vector.shape_cast %15 : vector<128xf32> to vector<1x128xf32>
      %17 = arith.addf %14, %16 : vector<1x128xf32>
      %c0_11 = arith.constant 0 : index
      %c0_12 = arith.constant 0 : index
      %18 = vector.load %arg8[%c0_11, %c0_12] : memref<1x128xf32, #tpu.memory_space<vmem>>, vector<1x128xf32>
      tpu.vector_store %arg8[%c0_11, %c0_12], %17 {strides = array<i32>} : memref<1x128xf32, #tpu.memory_space<vmem>>, vector<1x128xf32>,
      %c0_13 = arith.constant 0 : index
      %c0_14 = arith.constant 0 : index
      %19 = vector.load %arg9[%c0_13, %c0_14] : memref<1x128xf32, #tpu.memory_space<vmem>>, vector<1x128xf32>
      %20 = arith.mulf %13, %13 : vector<32x128xf32>
      %cst_15 = arith.constant dense<0.000000e+00> : vector<128xf32>
      %21 = vector.multi_reduction <add>, %20, %cst_15 [0] : vector<32x128xf32> to vector<128xf32>
      %22 = vector.shape_cast %21 : vector<128xf32> to vector<1x128xf32>
      %23 = arith.addf %19, %22 : vector<1x128xf32>
      %c0_16 = arith.constant 0 : index
      %c0_17 = arith.constant 0 : index
      %24 = vector.load %arg9[%c0_16, %c0_17] : memref<1x128xf32, #tpu.memory_space<vmem>>, vector<1x128xf32>
      tpu.vector_store %arg9[%c0_16, %c0_17], %23 {strides = array<i32>} : memref<1x128xf32, #tpu.memory_space<vmem>>, vector<1x128xf32>,
      %25 = arith.index_cast %arg1 : i32 to index
      %c0_18 = arith.constant 0 : index
      %c0_19 = arith.constant 0 : index
      %26 = vector.load %arg7[%25, %c0_18, %c0_19] : memref<1x32x128xf32, #tpu.memory_space<vmem>>, vector<1x32x128xf32>
      %27 = vector.shape_cast %26 : vector<1x32x128xf32> to vector<32x128xf32>
      %28 = vector.shape_cast %13 : vector<32x128xf32> to vector<1x32x128xf32>
      tpu.vector_store %arg7[%25, %c0_18, %c0_19], %28 {strides = array<i32>} : memref<1x32x128xf32, #tpu.memory_space<vmem>>, vector<1x32x128xf32>,
    } else {
    }
    %c1_i32 = arith.constant 1 : i32
    %8 = arith.cmpi eq, %arg0, %c1_i32 : i32
    %9 = arith.extui %8 : i1 to i32
    %c0_i32_4 = arith.constant 0 : i32
    %10 = arith.cmpi ne, %9, %c0_i32_4 : i32
    scf.if %10 {
      %c0 = arith.constant 0 : index
      %c0_5 = arith.constant 0 : index
      %11 = vector.load %arg8[%c0, %c0_5] : memref<1x128xf32, #tpu.memory_space<vmem>>, vector<1x128xf32>
      %cst = arith.constant 3.125000e-02 : f32
      %12 = vector.broadcast %cst : f32 to vector<1x128xf32>
      %13 = arith.mulf %11, %12 : vector<1x128xf32>
      %c0_6 = arith.constant 0 : index
      %c0_7 = arith.constant 0 : index
      %14 = vector.load %arg9[%c0_6, %c0_7] : memref<1x128xf32, #tpu.memory_space<vmem>>, vector<1x128xf32>
      %cst_8 = arith.constant 3.125000e-02 : f32
      %15 = vector.broadcast %cst_8 : f32 to vector<1x128xf32>
      %16 = arith.mulf %14, %15 : vector<1x128xf32>
      %17 = arith.mulf %13, %13 : vector<1x128xf32>
      %18 = arith.subf %16, %17 : vector<1x128xf32>
      %cst_9 = arith.constant 0.000000e+00 : f32
      %19 = vector.broadcast %cst_9 : f32 to vector<1x128xf32>
      %20 = arith.maximumf %18, %19 : vector<1x128xf32>
      %21 = arith.index_cast %arg1 : i32 to index
      %c0_10 = arith.constant 0 : index
      %c0_11 = arith.constant 0 : index
      %22 = vector.load %arg7[%21, %c0_10, %c0_11] : memref<1x32x128xf32, #tpu.memory_space<vmem>>, vector<1x32x128xf32>
      %23 = vector.shape_cast %22 : vector<1x32x128xf32> to vector<32x128xf32>
      %24 = vector.broadcast %13 : vector<1x128xf32> to vector<32x128xf32>
      %25 = arith.subf %23, %24 : vector<32x128xf32>
      %cst_12 = arith.constant 9.99999974E-6 : f32
      %26 = vector.broadcast %cst_12 : f32 to vector<1x128xf32>
      %27 = arith.addf %20, %26 : vector<1x128xf32>
      %28 = math.rsqrt %27 : vector<1x128xf32>
      %29 = vector.broadcast %28 : vector<1x128xf32> to vector<32x128xf32>
      %30 = arith.mulf %25, %29 : vector<32x128xf32>
      %c0_13 = arith.constant 0 : index
      %c0_14 = arith.constant 0 : index
      %31 = vector.load %arg4[%c0_13, %c0_14] : memref<1x128xf32, #tpu.memory_space<vmem>>, vector<1x128xf32>
      %32 = vector.broadcast %31 : vector<1x128xf32> to vector<32x128xf32>
      %33 = arith.mulf %30, %32 : vector<32x128xf32>
      %c0_15 = arith.constant 0 : index
      %c0_16 = arith.constant 0 : index
      %34 = vector.load %arg5[%c0_15, %c0_16] : memref<1x128xf32, #tpu.memory_space<vmem>>, vector<1x128xf32>
      %35 = vector.broadcast %34 : vector<1x128xf32> to vector<32x128xf32>
      %36 = arith.addf %33, %35 : vector<32x128xf32>
      %cst_17 = arith.constant 0.000000e+00 : f32
      %37 = vector.broadcast %cst_17 : f32 to vector<32x128xf32>
      %38 = arith.cmpf ogt, %36, %37 : vector<32x128xf32>
      %cst_18 = arith.constant 2.000000e-01 : f32
      %39 = vector.broadcast %cst_18 : f32 to vector<32x128xf32>
      %40 = arith.mulf %39, %36 : vector<32x128xf32>
      %41 = arith.select %38, %36, %40 : vector<32x128xi1>, vector<32x128xf32>
      %c0_19 = arith.constant 0 : index
      %c0_20 = arith.constant 0 : index
      %42 = vector.load %arg6[%c0_19, %c0_20] : memref<32x128xf32, #tpu.memory_space<vmem>>, vector<32x128xf32>
      tpu.vector_store %arg6[%c0_19, %c0_20], %41 {strides = array<i32>} : memref<32x128xf32, #tpu.memory_space<vmem>>, vector<32x128xf32>,
    } else {
    }
    return
  }
  func.func @transform_0(%arg0: i32, %arg1: i32) -> (i32, i32) {
    %c1_i32 = arith.constant 1 : i32
    %0 = arith.subi %c1_i32, %arg0 : i32
    %1 = arith.muli %0, %arg1 : i32
    %c0_i32 = arith.constant 0 : i32
    %c0_i32_0 = arith.constant 0 : i32
    return %1, %c0_i32 : i32, i32
  }
  func.func @transform_1(%arg0: i32, %arg1: i32) -> (i32, i32) {
    %c0_i32 = arith.constant 0 : i32
    %c0_i32_0 = arith.constant 0 : i32
    %c0_i32_1 = arith.constant 0 : i32
    return %c0_i32, %c0_i32_0 : i32, i32
  }
  func.func @transform_2(%arg0: i32, %arg1: i32) -> (i32, i32) {
    %c0_i32 = arith.constant 0 : i32
    %c0_i32_0 = arith.constant 0 : i32
    %c0_i32_1 = arith.constant 0 : i32
    return %c0_i32, %c0_i32_0 : i32, i32
  }
  func.func @transform_3(%arg0: i32, %arg1: i32) -> (i32, i32) {
    %c0_i32 = arith.constant 0 : i32
    %c0_i32_0 = arith.constant 0 : i32
    %c0_i32_1 = arith.constant 0 : i32
    return %c0_i32, %c0_i32_0 : i32, i32
  }
  func.func @transform_4(%arg0: i32, %arg1: i32) -> (i32, i32) {
    %0 = arith.muli %arg0, %arg1 : i32
    %c0_i32 = arith.constant 0 : i32
    %c0_i32_0 = arith.constant 0 : i32
    return %0, %c0_i32 : i32, i32
  }
}

module attributes {stable_mosaic.version = 11 : i64} {
  func.func @_conv_act_kernel(%arg0: i32, %arg1: memref<8x1024xbf16, #tpu.memory_space<vmem>>, %arg2: memref<1024x128xbf16, #tpu.memory_space<vmem>>, %arg3: memref<8x128xf32, #tpu.memory_space<vmem>>) attributes {dimension_semantics = [#tpu.dimension_semantics<parallel>], iteration_bounds = array<i64: 1>, scalar_prefetch = 0 : i64, scratch_operands = 0 : i64, tpu.core_type = #tpu.core_type<tc>, window_params = [{transform_indices = @transform_0, window_bounds = array<i64: 8, 1024>}, {pipeline_mode = #tpu.pipeline_mode<synchronous>, transform_indices = @transform_1, window_bounds = array<i64: 1024, 128>}, {transform_indices = @transform_2, window_bounds = array<i64: 8, 128>}]} {
    %c0 = arith.constant 0 : index
    %c0_0 = arith.constant 0 : index
    %0 = vector.load %arg1[%c0, %c0_0] : memref<8x1024xbf16, #tpu.memory_space<vmem>>, vector<8x1024xbf16>
    %c0_1 = arith.constant 0 : index
    %c0_2 = arith.constant 0 : index
    %1 = vector.load %arg2[%c0_1, %c0_2] : memref<1024x128xbf16, #tpu.memory_space<vmem>>, vector<1024x128xbf16>
    %cst = arith.constant dense<0.000000e+00> : vector<8x128xf32>
    %2 = tpu.matmul %0, %1, %cst {dimension_numbers = #tpu.dot_dimension_numbers<[1], [0], [0], [1], [0, 0, 1, 1], [], []>} : vector<8x1024xbf16>, vector<1024x128xbf16>, vector<8x128xf32> -> vector<8x128xf32>
    %cst_3 = arith.constant 0.000000e+00 : f32
    %3 = vector.broadcast %cst_3 : f32 to vector<8x128xf32>
    %4 = arith.subf %3, %2 : vector<8x128xf32>
    %5 = math.exp %4 : vector<8x128xf32>
    %cst_4 = arith.constant 1.000000e+00 : f32
    %6 = vector.broadcast %cst_4 : f32 to vector<8x128xf32>
    %7 = arith.addf %6, %5 : vector<8x128xf32>
    %cst_5 = arith.constant 1.000000e+00 : f32
    %8 = vector.broadcast %cst_5 : f32 to vector<8x128xf32>
    %9 = arith.divf %8, %7 : vector<8x128xf32>
    %c0_6 = arith.constant 0 : index
    %c0_7 = arith.constant 0 : index
    %10 = vector.load %arg3[%c0_6, %c0_7] : memref<8x128xf32, #tpu.memory_space<vmem>>, vector<8x128xf32>
    tpu.vector_store %arg3[%c0_6, %c0_7], %9 {strides = array<i32>} : memref<8x128xf32, #tpu.memory_space<vmem>>, vector<8x128xf32>,
    return
  }
  func.func @transform_0(%arg0: i32) -> (i32, i32) {
    %c0_i32 = arith.constant 0 : i32
    %c0_i32_0 = arith.constant 0 : i32
    return %arg0, %c0_i32 : i32, i32
  }
  func.func @transform_1(%arg0: i32) -> (i32, i32) {
    %c0_i32 = arith.constant 0 : i32
    %c0_i32_0 = arith.constant 0 : i32
    %c0_i32_1 = arith.constant 0 : i32
    return %c0_i32, %c0_i32_0 : i32, i32
  }
  func.func @transform_2(%arg0: i32) -> (i32, i32) {
    %c0_i32 = arith.constant 0 : i32
    %c0_i32_0 = arith.constant 0 : i32
    return %arg0, %c0_i32 : i32, i32
  }
}

</mosaic_0001>

<bundles_post_ra>
// kernel: discriminator_forward.5
= control target key start
LH: loop header
LB: loop body
LE: loop exit
PB: predicated region body
PF: predicated region fallthrough
CT: control target
= control target key end

     0   :  { %s2343_s9 = smov 0   ;;  %s2627_s0 = inlined_call_operand.vmem [shape: bf16[2048,16], index: 0, kind: input, shape index: {}]   ;;  %s2628_s1 = inlined_call_operand.vmem [shape: bf16[16,128], index: 1, kind: input, shape index: {}]   ;;  %s2629_s2 = inlined_call_operand.vmem [shape: f32[2048,128], index: 2, kind: output, shape index: {}]  }
   0x1 LB: > { %s1910_s10 = sadd.s32 4294967295, %s2326_s9   ;;  %p1914_p0 = scmp.ge.s32.totalorder %s2326_s9, 1  ;;  %s2326_s9 = sphi %s2343_s9, %s12_s9  }
   0x2   : > { %p113_p1 = scmp.lt.s32.totalorder %s2326_s9, 3 }
   0x4   : > { %p114_p2 = pnand %p1914_p0, %p113_p1 }
   0x5   : > { %s1915_s13 = sshll.u32 (!%p114_p2), %s1910_s10, 7 }
   0x6   : > { %117 = sbr.rel (%p114_p2) target bundleno = 340 (0x154), region = 28  ;;  %p136_p3 = scmp.lt.s32.totalorder (!%p114_p2), %s1915_s13, 255 }
   0xb   : > { %v2255_v0 = vld [vmem:[%s2628_s1] sm:$0xff]   ;;  %s2631_s13 = smov (!%p136_p3, %s1915_s13), 255  ;;  %vm604_vm0 = vcmask 130048  }
   0xc   : > { %2115 = vmatprep.subr.bf16.mxu0 %v2255_v0  ;;  %2245 = vmatprep.subr.bf16.mxu1 %v2255_v0  ;;  %s1916_s14 = sshll.u32 %s2631_s13, 2  ;;  %s1918_s18 = sshll.u32 %s2631_s13, 3 }
   0xd   : > { %2116 = vmatpush3.bf16.msra.mxu0 %v2255_v0  ;;  %2246 = vmatpush3.bf16.msra.mxu1 %v2255_v0  ;;  %s2360_s17 = scalar_lea.vmem %s2627_s0, %s1916_s14  ;;  %s2494_s21 = scalar_lea.vmem %s2629_s2, %s1918_s18 }
   0xe   : > { %v2256_v1 = vld [vmem:[%s2360_s17] sm:$0xff]   ;;  %v2258_v3 = vld [vmem:[%s2360_s17 + $0x8] sm:$0xff]   ;;  %v2260_v5 = vld [vmem:[%s2360_s17 + $0x10] sm:$0xff]  }
   0xf   : > { %v2257_v2 = vld [vmem:[%s2360_s17 + $0x100] sm:$0xff]   ;;  %2117 = vmatprep.mubr.msk.bf16.mxu0 %vm604_vm0, %v2256_v1  ;;  %v2259_v4 = vld [vmem:[%s2360_s17 + $0x108] sm:$0xff]   ;;  %v2261_v6 = vld [vmem:[%s2360_s17 + $0x110] sm:$0xff]  }
  0x10   : > { %2181 = vmatprep.mubr.msk.bf16.mxu1 %vm604_vm0, %v2257_v2  ;;  %2118 = vmatmul.mubr.msk.bf16.vlgmr.msra.gmra.mxu0 %vm604_vm0, %v2258_v3  ;;  %v2262_v7 = vld [vmem:[%s2360_s17 + $0x18] sm:$0xff]   ;;  %v2264_v9 = vld [vmem:[%s2360_s17 + $0x20] sm:$0xff]   ;;  %v2266_v11 = vld [vmem:[%s2360_s17 + $0x28] sm:$0xff]  }
  0x11   : > { %2182 = vmatmul.mubr.msk.bf16.vlgmr.msra.gmra.mxu1 %vm604_vm0, %v2259_v4  ;;  %2121 = vmatprep.mubr.msk.bf16.mxu0 %vm604_vm0, %v2260_v5  ;;  %v2263_v8 = vld [vmem:[%s2360_s17 + $0x118] sm:$0xff]   ;;  %v2265_v10 = vld [vmem:[%s2360_s17 + $0x120] sm:$0xff]   ;;  %v2267_v12 = vld [vmem:[%s2360_s17 + $0x128] sm:$0xff]  }
  0x12   : > { %2185 = vmatprep.mubr.msk.bf16.mxu1 %vm604_vm0, %v2261_v6  ;;  %v2268_v13 = vld [vmem:[%s2360_s17 + $0x30] sm:$0xff]   ;;  %v2270_v15 = vld [vmem:[%s2360_s17 + $0x38] sm:$0xff]   ;;  %v2272_v17 = vld [vmem:[%s2360_s17 + $0x40] sm:$0xff]  }
  0x13   : > { %v2269_v14 = vld [vmem:[%s2360_s17 + $0x130] sm:$0xff]   ;;  %v2271_v16 = vld [vmem:[%s2360_s17 + $0x138] sm:$0xff]   ;;  %v2273_v18 = vld [vmem:[%s2360_s17 + $0x140] sm:$0xff]  }
  0x14   : > { %v2274_v19 = vld [vmem:[%s2360_s17 + $0x48] sm:$0xff]   ;;  %v2276_v21 = vld [vmem:[%s2360_s17 + $0x50] sm:$0xff]   ;;  %v2278_v23 = vld [vmem:[%s2360_s17 + $0x58] sm:$0xff]  }
  0x15   : > { %v2275_v20 = vld [vmem:[%s2360_s17 + $0x148] sm:$0xff]   ;;  %v2277_v22 = vld [vmem:[%s2360_s17 + $0x150] sm:$0xff]   ;;  %v2279_v24 = vld [vmem:[%s2360_s17 + $0x158] sm:$0xff]  }
  0x16   : > { %v2280_v25 = vld [vmem:[%s2360_s17 + $0x60] sm:$0xff]   ;;  %v2282_v27 = vld [vmem:[%s2360_s17 + $0x68] sm:$0xff]   ;;  %v2284_v29 = vld [vmem:[%s2360_s17 + $0x70] sm:$0xff]  }
  0x17   : > { %v2281_v26 = vld [vmem:[%s2360_s17 + $0x160] sm:$0xff]   ;;  %v2283_v28 = vld [vmem:[%s2360_s17 + $0x168] sm:$0xff]   ;;  %v2285_v30 = vld [vmem:[%s2360_s17 + $0x170] sm:$0xff]  }
  0x18   : > { %2122 = vmatmul.mubr.msk.bf16.gmra.mxu0 %vm604_vm0, %v2262_v7  ;;  %v2286_v31 = vld [vmem:[%s2360_s17 + $0x78] sm:$0xff]   ;;  %v2288_v33 = vld [vmem:[%s2360_s17 + $0x80] sm:$0xff]   ;;  %v2290_v35 = vld [vmem:[%s2360_s17 + $0x88] sm:$0xff]  }
  0x19   : > { %2186 = vmatmul.mubr.msk.bf16.gmra.mxu1 %vm604_vm0, %v2263_v8  ;;  %2125 = vmatprep.mubr.msk.bf16.mxu0 %vm604_vm0, %v2264_v9  ;;  %v2287_v32 = vld [vmem:[%s2360_s17 + $0x178] sm:$0xff]   ;;  %v2289_v34 = vld [vmem:[%s2360_s17 + $0x180] sm:$0xff]   ;;  %v2291_v36 = vld [vmem:[%s2360_s17 + $0x188] sm:$0xff]  }
  0x1a   : > { %2189 = vmatprep.mubr.msk.bf16.mxu1 %vm604_vm0, %v2265_v10  ;;  %v2292_v37 = vld [vmem:[%s2360_s17 + $0x90] sm:$0xff]   ;;  %v2294_v39 = vld [vmem:[%s2360_s17 + $0x98] sm:$0xff]   ;;  %v2296_v41 = vld [vmem:[%s2360_s17 + $0xa0] sm:$0xff]  }
  0x1b   : > { %v2293_v38 = vld [vmem:[%s2360_s17 + $0x190] sm:$0xff]   ;;  %v2295_v40 = vld [vmem:[%s2360_s17 + $0x198] sm:$0xff]   ;;  %v2297_v42 = vld [vmem:[%s2360_s17 + $0x1a0] sm:$0xff]  }
  0x1c   : > { %v2298_v43 = vld [vmem:[%s2360_s17 + $0xa8] sm:$0xff]   ;;  %v2300_v45 = vld [vmem:[%s2360_s17 + $0xb0] sm:$0xff]   ;;  %v2302_v47 = vld [vmem:[%s2360_s17 + $0xb8] sm:$0xff]  }
  0x1d   : > { %v2299_v44 = vld [vmem:[%s2360_s17 + $0x1a8] sm:$0xff]   ;;  %v2301_v46 = vld [vmem:[%s2360_s17 + $0x1b0] sm:$0xff]   ;;  %v2303_v48 = vld [vmem:[%s2360_s17 + $0x1b8] sm:$0xff]  }
  0x1e   : > { %v2304_v49 = vld [vmem:[%s2360_s17 + $0xc0] sm:$0xff]   ;;  %v2306_v51 = vld [vmem:[%s2360_s17 + $0xc8] sm:$0xff]   ;;  %v2308_v53 = vld [vmem:[%s2360_s17 + $0xd0] sm:$0xff]  }
  0x1f   : > { %v2305_v50 = vld [vmem:[%s2360_s17 + $0x1c0] sm:$0xff]   ;;  %v2307_v52 = vld [vmem:[%s2360_s17 + $0x1c8] sm:$0xff]   ;;  %v2309_v54 = vld [vmem:[%s2360_s17 + $0x1d0] sm:$0xff]  }
  0x20   : > { %2126 = vmatmul.mubr.msk.bf16.gmra.mxu0 %vm604_vm0, %v2266_v11  ;;  %v2310_v55 = vld [vmem:[%s2360_s17 + $0xd8] sm:$0xff]   ;;  %v2312_v57 = vld [vmem:[%s2360_s17 + $0xe0] sm:$0xff]   ;;  %v2314_v59 = vld [vmem:[%s2360_s17 + $0xe8] sm:$0xff]  }
  0x21   : > { %2190 = vmatmul.mubr.msk.bf16.gmra.mxu1 %vm604_vm0, %v2267_v12  ;;  %2129 = vmatprep.mubr.msk.bf16.mxu0 %vm604_vm0, %v2268_v13  ;;  %v2311_v56 = vld [vmem:[%s2360_s17 + $0x1d8] sm:$0xff]   ;;  %v2313_v58 = vld [vmem:[%s2360_s17 + $0x1e0] sm:$0xff]   ;;  %v2315_v60 = vld [vmem:[%s2360_s17 + $0x1e8] sm:$0xff]  }
  0x22   : > { %2193 = vmatprep.mubr.msk.bf16.mxu1 %vm604_vm0, %v2269_v14  ;;  %v2316_v61 = vld [vmem:[%s2360_s17 + $0xf0] sm:$0xff]   ;;  %v2318_v63 = vld [vmem:[%s2360_s17 + $0xf8] sm:$0xff]  }
  0x23   : > { %v2317_v62 = vld [vmem:[%s2360_s17 + $0x1f0] sm:$0xff]   ;;  %v2319_v0 = vld [vmem:[%s2360_s17 + $0x1f8] sm:$0xff]  }
  0x28   : > { %2130 = vmatmul.mubr.msk.bf16.gmra.mxu0 %vm604_vm0, %v2270_v15 }
  0x29   : > { %2194 = vmatmul.mubr.msk.bf16.gmra.mxu1 %vm604_vm0, %v2271_v16  ;;  %2133 = vmatprep.mubr.msk.bf16.mxu0 %vm604_vm0, %v2272_v17 }
  0x2a   : > { %2197 = vmatprep.mubr.msk.bf16.mxu1 %vm604_vm0, %v2273_v18 }
  0x30   : > { %2134 = vmatmul.mubr.msk.bf16.gmra.mxu0 %vm604_vm0, %v2274_v19 }
  0x31   : > { %2198 = vmatmul.mubr.msk.bf16.gmra.mxu1 %vm604_vm0, %v2275_v20  ;;  %2137 = vmatprep.mubr.msk.bf16.mxu0 %vm604_vm0, %v2276_v21 }
  0x32   : > { %2201 = vmatprep.mubr.msk.bf16.mxu1 %vm604_vm0, %v2277_v22 }
  0x38   : > { %2138 = vmatmul.mubr.msk.bf16.gmra.mxu0 %vm604_vm0, %v2278_v23 }
  0x39   : > { %2202 = vmatmul.mubr.msk.bf16.gmra.mxu1 %vm604_vm0, %v2279_v24  ;;  %2141 = vmatprep.mubr.msk.bf16.mxu0 %vm604_vm0, %v2280_v25 }
  0x3a   : > { %2205 = vmatprep.mubr.msk.bf16.mxu1 %vm604_vm0, %v2281_v26 }
  0x40   : > { %2142 = vmatmul.mubr.msk.bf16.gmra.mxu0 %vm604_vm0, %v2282_v27 }
  0x41   : > { %2206 = vmatmul.mubr.msk.bf16.gmra.mxu1 %vm604_vm0, %v2283_v28  ;;  %2145 = vmatprep.mubr.msk.bf16.mxu0 %vm604_vm0, %v2284_v29 }
  0x42   : > { %2209 = vmatprep.mubr.msk.bf16.mxu1 %vm604_vm0, %v2285_v30 }
  0x48   : > { %2146 = vmatmul.mubr.msk.bf16.gmra.mxu0 %vm604_vm0, %v2286_v31 }
  0x49   : > { %2210 = vmatmul.mubr.msk.bf16.gmra.mxu1 %vm604_vm0, %v2287_v32  ;;  %2149 = vmatprep.mubr.msk.bf16.mxu0 %vm604_vm0, %v2288_v33 }
  0x4a   : > { %2213 = vmatprep.mubr.msk.bf16.mxu1 %vm604_vm0, %v2289_v34 }
  0x50   : > { %2150 = vmatmul.mubr.msk.bf16.gmra.mxu0 %vm604_vm0, %v2290_v35 }
  0x51   : > { %2214 = vmatmul.mubr.msk.bf16.gmra.mxu1 %vm604_vm0, %v2291_v36  ;;  %2153 = vmatprep.mubr.msk.bf16.mxu0 %vm604_vm0, %v2292_v37 }
  0x52   : > { %2217 = vmatprep.mubr.msk.bf16.mxu1 %vm604_vm0, %v2293_v38 }
  0x58   : > { %2154 = vmatmul.mubr.msk.bf16.gmra.mxu0 %vm604_vm0, %v2294_v39 }
  0x59   : > { %2218 = vmatmul.mubr.msk.bf16.gmra.mxu1 %vm604_vm0, %v2295_v40  ;;  %2157 = vmatprep.mubr.msk.bf16.mxu0 %vm604_vm0, %v2296_v41 }
  0x5a   : > { %2221 = vmatprep.mubr.msk.bf16.mxu1 %vm604_vm0, %v2297_v42 }
  0x60   : > { %2158 = vmatmul.mubr.msk.bf16.gmra.mxu0 %vm604_vm0, %v2298_v43 }
  0x61   : > { %2222 = vmatmul.mubr.msk.bf16.gmra.mxu1 %vm604_vm0, %v2299_v44  ;;  %2161 = vmatprep.mubr.msk.bf16.mxu0 %vm604_vm0, %v2300_v45 }
  0x62   : > { %2225 = vmatprep.mubr.msk.bf16.mxu1 %vm604_vm0, %v2301_v46 }
  0x68   : > { %2162 = vmatmul.mubr.msk.bf16.gmra.mxu0 %vm604_vm0, %v2302_v47 }
  0x69   : > { %2226 = vmatmul.mubr.msk.bf16.gmra.mxu1 %vm604_vm0, %v2303_v48  ;;  %2165 = vmatprep.mubr.msk.bf16.mxu0 %vm604_vm0, %v2304_v49 }
  0x6a   : > { %2229 = vmatprep.mubr.msk.bf16.mxu1 %vm604_vm0, %v2305_v50 }
  0x70   : > { %2166 = vmatmul.mubr.msk.bf16.gmra.mxu0 %vm604_vm0, %v2306_v51 }
  0x71   : > { %2230 = vmatmul.mubr.msk.bf16.gmra.mxu1 %vm604_vm0, %v2307_v52  ;;  %2169 = vmatprep.mubr.msk.bf16.mxu0 %vm604_vm0, %v2308_v53 }
  0x72   : > { %2233 = vmatprep.mubr.msk.bf16.mxu1 %vm604_vm0, %v2309_v54 }
  0x78   : > { %2170 = vmatmul.mubr.msk.bf16.gmra.mxu0 %vm604_vm0, %v2310_v55 }
  0x79   : > { %2234 = vmatmul.mubr.msk.bf16.gmra.mxu1 %vm604_vm0, %v2311_v56  ;;  %2173 = vmatprep.mubr.msk.bf16.mxu0 %vm604_vm0, %v2312_v57 }
  0x7a   : > { %2237 = vmatprep.mubr.msk.bf16.mxu1 %vm604_vm0, %v2313_v58 }
  0x80   : > { %2174 = vmatmul.mubr.msk.bf16.gmra.mxu0 %vm604_vm0, %v2314_v59 }
  0x81   : > { %2238 = vmatmul.mubr.msk.bf16.gmra.mxu1 %vm604_vm0, %v2315_v60  ;;  %2177 = vmatprep.mubr.msk.bf16.mxu0 %vm604_vm0, %v2316_v61 }
  0x82   : > { %2241 = vmatprep.mubr.msk.bf16.mxu1 %vm604_vm0, %v2317_v62 }
  0x88   : > { %2178 = vmatmul.mubr.msk.bf16.gmra.mxu0 %vm604_vm0, %v2318_v63 }
  0x89   : > { %2242 = vmatmul.mubr.msk.bf16.gmra.mxu1 %vm604_vm0, %v2319_v0 }
  0xd0   : > { %v2119_v1 = vpop.f32.mrf.mxu0 }
  0xd1   : > { %vm1344_vm1 = vcmp.gt.f32.partialorder %v2119_v1, 0.0  ;;  %v1472_v2 = vmul.f32 0.2, %v2119_v1  ;;  %v2183_v3 = vpop.f32.mrf.mxu1 }
  0xd2   : > { %vm1408_vm2 = vcmp.gt.f32.partialorder %v2183_v3, 0.0  ;;  %v1536_v4 = vmul.f32 0.2, %v2183_v3  ;;  %v831_v5 = vpop.f32.mrf.mxu0 }
  0xd3   : > { %v1600_v6 = vsel %vm1344_vm1, %v2119_v1, %v1472_v2  ;;  %vm1342_vm3 = vcmp.gt.f32.partialorder %v831_v5, 0.0  ;;  %v1470_v7 = vmul.f32 0.2, %v831_v5  ;;  %v1087_v8 = vpop.f32.mrf.mxu1 }
  0xd4   : > { %1728 = vst [vmem:[%s2494_s21 + $0x10] sm:$0xff] %v1600_v6  ;;  %v1664_v9 = vsel %vm1408_vm2, %v2183_v3, %v1536_v4  ;;  %vm1406_vm4 = vcmp.gt.f32.partialorder %v1087_v8, 0.0  ;;  %v1534_v10 = vmul.f32 0.2, %v1087_v8  ;;  %v2120_v11 = vpop.f32.mrf.mxu0 }
  0xd5   : > { %1792 = vst [vmem:[%s2494_s21 + $0x210] sm:$0xff] %v1664_v9  ;;  %v1598_v12 = vsel %vm1342_vm3, %v831_v5, %v1470_v7  ;;  %vm1345_vm5 = vcmp.gt.f32.partialorder %v2120_v11, 0.0  ;;  %v1473_v13 = vmul.f32 0.2, %v2120_v11  ;;  %v2184_v14 = vpop.f32.mrf.mxu1 }
  0xd6   : > { %1726 = vst [vmem:[%s2494_s21] sm:$0xff] %v1598_v12  ;;  %v1662_v15 = vsel %vm1406_vm4, %v1087_v8, %v1534_v10  ;;  %vm1409_vm6 = vcmp.gt.f32.partialorder %v2184_v14, 0.0  ;;  %v1537_v16 = vmul.f32 0.2, %v2184_v14  ;;  %v834_v17 = vpop.f32.mrf.mxu0 }
  0xd7   : > { %1790 = vst [vmem:[%s2494_s21 + $0x200] sm:$0xff] %v1662_v15  ;;  %v1601_v18 = vsel %vm1345_vm5, %v2120_v11, %v1473_v13  ;;  %vm1343_vm7 = vcmp.gt.f32.partialorder %v834_v17, 0.0  ;;  %v1471_v19 = vmul.f32 0.2, %v834_v17  ;;  %v1090_v20 = vpop.f32.mrf.mxu1 }
  0xd8   : > { %1729 = vst [vmem:[%s2494_s21 + $0x18] sm:$0xff] %v1601_v18  ;;  %v1665_v21 = vsel %vm1409_vm6, %v2184_v14, %v1537_v16  ;;  %vm1407_vm8 = vcmp.gt.f32.partialorder %v1090_v20, 0.0  ;;  %v1535_v22 = vmul.f32 0.2, %v1090_v20  ;;  %v2123_v23 = vpop.f32.mrf.mxu0 }
  0xd9   : > { %1793 = vst [vmem:[%s2494_s21 + $0x218] sm:$0xff] %v1665_v21  ;;  %v1599_v24 = vsel %vm1343_vm7, %v834_v17, %v1471_v19  ;;  %vm1348_vm9 = vcmp.gt.f32.partialorder %v2123_v23, 0.0  ;;  %v1476_v25 = vmul.f32 0.2, %v2123_v23  ;;  %v2187_v26 = vpop.f32.mrf.mxu1 }
  0xda   : > { %1727 = vst [vmem:[%s2494_s21 + $0x8] sm:$0xff] %v1599_v24  ;;  %v1663_v27 = vsel %vm1407_vm8, %v1090_v20, %v1535_v22  ;;  %vm1412_vm10 = vcmp.gt.f32.partialorder %v2187_v26, 0.0  ;;  %v1540_v28 = vmul.f32 0.2, %v2187_v26  ;;  %v847_v29 = vpop.f32.mrf.mxu0 }
  0xdb   : > { %1791 = vst [vmem:[%s2494_s21 + $0x208] sm:$0xff] %v1663_v27  ;;  %v1604_v30 = vsel %vm1348_vm9, %v2123_v23, %v1476_v25  ;;  %vm1346_vm11 = vcmp.gt.f32.partialorder %v847_v29, 0.0  ;;  %v1474_v31 = vmul.f32 0.2, %v847_v29  ;;  %v1103_v32 = vpop.f32.mrf.mxu1 }
  0xdc   : > { %1732 = vst [vmem:[%s2494_s21 + $0x30] sm:$0xff] %v1604_v30  ;;  %v1668_v33 = vsel %vm1412_vm10, %v2187_v26, %v1540_v28  ;;  %vm1410_vm12 = vcmp.gt.f32.partialorder %v1103_v32, 0.0  ;;  %v1538_v34 = vmul.f32 0.2, %v1103_v32  ;;  %v2124_v35 = vpop.f32.mrf.mxu0 }
  0xdd   : > { %1796 = vst [vmem:[%s2494_s21 + $0x230] sm:$0xff] %v1668_v33  ;;  %v1602_v36 = vsel %vm1346_vm11, %v847_v29, %v1474_v31  ;;  %vm1349_vm13 = vcmp.gt.f32.partialorder %v2124_v35, 0.0  ;;  %v1477_v37 = vmul.f32 0.2, %v2124_v35  ;;  %v2188_v38 = vpop.f32.mrf.mxu1 }
  0xde   : > { %1730 = vst [vmem:[%s2494_s21 + $0x20] sm:$0xff] %v1602_v36  ;;  %v1666_v39 = vsel %vm1410_vm12, %v1103_v32, %v1538_v34  ;;  %vm1413_vm14 = vcmp.gt.f32.partialorder %v2188_v38, 0.0  ;;  %v1541_v40 = vmul.f32 0.2, %v2188_v38  ;;  %v850_v41 = vpop.f32.mrf.mxu0 }
  0xdf   : > { %1794 = vst [vmem:[%s2494_s21 + $0x220] sm:$0xff] %v1666_v39  ;;  %v1605_v42 = vsel %vm1349_vm13, %v2124_v35, %v1477_v37  ;;  %vm1347_vm15 = vcmp.gt.f32.partialorder %v850_v41, 0.0  ;;  %v1475_v43 = vmul.f32 0.2, %v850_v41  ;;  %v1106_v44 = vpop.f32.mrf.mxu1 }
  0xe0   : > { %1733 = vst [vmem:[%s2494_s21 + $0x38] sm:$0xff] %v1605_v42  ;;  %v1669_v45 = vsel %vm1413_vm14, %v2188_v38, %v1541_v40  ;;  %vm1411_vm0 = vcmp.gt.f32.partialorder %v1106_v44, 0.0  ;;  %v1539_v46 = vmul.f32 0.2, %v1106_v44  ;;  %v2127_v47 = vpop.f32.mrf.mxu0 }
  0xe1   : > { %1797 = vst [vmem:[%s2494_s21 + $0x238] sm:$0xff] %v1669_v45  ;;  %v1603_v48 = vsel %vm1347_vm15, %v850_v41, %v1475_v43  ;;  %vm1352_vm1 = vcmp.gt.f32.partialorder %v2127_v47, 0.0  ;;  %v1480_v49 = vmul.f32 0.2, %v2127_v47  ;;  %v2191_v50 = vpop.f32.mrf.mxu1 }
  0xe2   : > { %1731 = vst [vmem:[%s2494_s21 + $0x28] sm:$0xff] %v1603_v48  ;;  %v1667_v51 = vsel %vm1411_vm0, %v1106_v44, %v1539_v46  ;;  %vm1416_vm2 = vcmp.gt.f32.partialorder %v2191_v50, 0.0  ;;  %v1544_v52 = vmul.f32 0.2, %v2191_v50  ;;  %v863_v53 = vpop.f32.mrf.mxu0 }
  0xe3   : > { %1795 = vst [vmem:[%s2494_s21 + $0x228] sm:$0xff] %v1667_v51  ;;  %v1608_v54 = vsel %vm1352_vm1, %v2127_v47, %v1480_v49  ;;  %vm1350_vm3 = vcmp.gt.f32.partialorder %v863_v53, 0.0  ;;  %v1478_v55 = vmul.f32 0.2, %v863_v53  ;;  %v1119_v56 = vpop.f32.mrf.mxu1 }
  0xe4   : > { %1736 = vst [vmem:[%s2494_s21 + $0x50] sm:$0xff] %v1608_v54  ;;  %v1672_v57 = vsel %vm1416_vm2, %v2191_v50, %v1544_v52  ;;  %vm1414_vm4 = vcmp.gt.f32.partialorder %v1119_v56, 0.0  ;;  %v1542_v58 = vmul.f32 0.2, %v1119_v56  ;;  %v2128_v59 = vpop.f32.mrf.mxu0 }
  0xe5   : > { %1800 = vst [vmem:[%s2494_s21 + $0x250] sm:$0xff] %v1672_v57  ;;  %v1606_v60 = vsel %vm1350_vm3, %v863_v53, %v1478_v55  ;;  %vm1353_vm5 = vcmp.gt.f32.partialorder %v2128_v59, 0.0  ;;  %v1481_v61 = vmul.f32 0.2, %v2128_v59  ;;  %v2192_v62 = vpop.f32.mrf.mxu1 }
  0xe6   : > { %1734 = vst [vmem:[%s2494_s21 + $0x40] sm:$0xff] %v1606_v60  ;;  %v1670_v63 = vsel %vm1414_vm4, %v1119_v56, %v1542_v58  ;;  %vm1417_vm6 = vcmp.gt.f32.partialorder %v2192_v62, 0.0  ;;  %v1545_v0 = vmul.f32 0.2, %v2192_v62  ;;  %v866_v1 = vpop.f32.mrf.mxu0 }
  0xe7   : > { %1798 = vst [vmem:[%s2494_s21 + $0x240] sm:$0xff] %v1670_v63  ;;  %v1609_v2 = vsel %vm1353_vm5, %v2128_v59, %v1481_v61  ;;  %vm1351_vm7 = vcmp.gt.f32.partialorder %v866_v1, 0.0  ;;  %v1479_v3 = vmul.f32 0.2, %v866_v1  ;;  %v1122_v4 = vpop.f32.mrf.mxu1 }
  0xe8   : > { %1737 = vst [vmem:[%s2494_s21 + $0x58] sm:$0xff] %v1609_v2  ;;  %v1673_v5 = vsel %vm1417_vm6, %v2192_v62, %v1545_v0  ;;  %vm1415_vm8 = vcmp.gt.f32.partialorder %v1122_v4, 0.0  ;;  %v1543_v6 = vmul.f32 0.2, %v1122_v4  ;;  %v2131_v7 = vpop.f32.mrf.mxu0 }
  0xe9   : > { %1801 = vst [vmem:[%s2494_s21 + $0x258] sm:$0xff] %v1673_v5  ;;  %v1607_v8 = vsel %vm1351_vm7, %v866_v1, %v1479_v3  ;;  %vm1356_vm9 = vcmp.gt.f32.partialorder %v2131_v7, 0.0  ;;  %v1484_v9 = vmul.f32 0.2, %v2131_v7  ;;  %v2195_v10 = vpop.f32.mrf.mxu1 }
  0xea   : > { %1735 = vst [vmem:[%s2494_s21 + $0x48] sm:$0xff] %v1607_v8  ;;  %v1671_v11 = vsel %vm1415_vm8, %v1122_v4, %v1543_v6  ;;  %vm1420_vm10 = vcmp.gt.f32.partialorder %v2195_v10, 0.0  ;;  %v1548_v12 = vmul.f32 0.2, %v2195_v10  ;;  %v879_v13 = vpop.f32.mrf.mxu0 }
  0xeb   : > { %1799 = vst [vmem:[%s2494_s21 + $0x248] sm:$0xff] %v1671_v11  ;;  %v1612_v14 = vsel %vm1356_vm9, %v2131_v7, %v1484_v9  ;;  %vm1354_vm11 = vcmp.gt.f32.partialorder %v879_v13, 0.0  ;;  %v1482_v15 = vmul.f32 0.2, %v879_v13  ;;  %v1135_v16 = vpop.f32.mrf.mxu1 }
  0xec   : > { %1740 = vst [vmem:[%s2494_s21 + $0x70] sm:$0xff] %v1612_v14  ;;  %v1676_v17 = vsel %vm1420_vm10, %v2195_v10, %v1548_v12  ;;  %vm1418_vm12 = vcmp.gt.f32.partialorder %v1135_v16, 0.0  ;;  %v1546_v18 = vmul.f32 0.2, %v1135_v16  ;;  %v2132_v19 = vpop.f32.mrf.mxu0 }
  0xed   : > { %1804 = vst [vmem:[%s2494_s21 + $0x270] sm:$0xff] %v1676_v17  ;;  %v1610_v20 = vsel %vm1354_vm11, %v879_v13, %v1482_v15  ;;  %vm1357_vm13 = vcmp.gt.f32.partialorder %v2132_v19, 0.0  ;;  %v1485_v21 = vmul.f32 0.2, %v2132_v19  ;;  %v2196_v22 = vpop.f32.mrf.mxu1 }
  0xee   : > { %1738 = vst [vmem:[%s2494_s21 + $0x60] sm:$0xff] %v1610_v20  ;;  %v1674_v23 = vsel %vm1418_vm12, %v1135_v16, %v1546_v18  ;;  %vm1421_vm14 = vcmp.gt.f32.partialorder %v2196_v22, 0.0  ;;  %v1549_v24 = vmul.f32 0.2, %v2196_v22  ;;  %v882_v25 = vpop.f32.mrf.mxu0 }
  0xef   : > { %1802 = vst [vmem:[%s2494_s21 + $0x260] sm:$0xff] %v1674_v23  ;;  %v1613_v26 = vsel %vm1357_vm13, %v2132_v19, %v1485_v21  ;;  %vm1355_vm15 = vcmp.gt.f32.partialorder %v882_v25, 0.0  ;;  %v1483_v27 = vmul.f32 0.2, %v882_v25  ;;  %v1138_v28 = vpop.f32.mrf.mxu1 }
  0xf0   : > { %1741 = vst [vmem:[%s2494_s21 + $0x78] sm:$0xff] %v1613_v26  ;;  %v1677_v29 = vsel %vm1421_vm14, %v2196_v22, %v1549_v24  ;;  %vm1419_vm0 = vcmp.gt.f32.partialorder %v1138_v28, 0.0  ;;  %v1547_v30 = vmul.f32 0.2, %v1138_v28  ;;  %v2135_v31 = vpop.f32.mrf.mxu0 }
  0xf1   : > { %1805 = vst [vmem:[%s2494_s21 + $0x278] sm:$0xff] %v1677_v29  ;;  %v1611_v32 = vsel %vm1355_vm15, %v882_v25, %v1483_v27  ;;  %vm1360_vm1 = vcmp.gt.f32.partialorder %v2135_v31, 0.0  ;;  %v1488_v33 = vmul.f32 0.2, %v2135_v31  ;;  %v2199_v34 = vpop.f32.mrf.mxu1 }
  0xf2   : > { %1739 = vst [vmem:[%s2494_s21 + $0x68] sm:$0xff] %v1611_v32  ;;  %v1675_v35 = vsel %vm1419_vm0, %v1138_v28, %v1547_v30  ;;  %vm1424_vm2 = vcmp.gt.f32.partialorder %v2199_v34, 0.0  ;;  %v1552_v36 = vmul.f32 0.2, %v2199_v34  ;;  %v895_v37 = vpop.f32.mrf.mxu0 }
  0xf3   : > { %1803 = vst [vmem:[%s2494_s21 + $0x268] sm:$0xff] %v1675_v35  ;;  %v1616_v38 = vsel %vm1360_vm1, %v2135_v31, %v1488_v33  ;;  %vm1358_vm3 = vcmp.gt.f32.partialorder %v895_v37, 0.0  ;;  %v1486_v39 = vmul.f32 0.2, %v895_v37  ;;  %v1151_v40 = vpop.f32.mrf.mxu1 }
  0xf4   : > { %1744 = vst [vmem:[%s2494_s21 + $0x90] sm:$0xff] %v1616_v38  ;;  %v1680_v41 = vsel %vm1424_vm2, %v2199_v34, %v1552_v36  ;;  %vm1422_vm4 = vcmp.gt.f32.partialorder %v1151_v40, 0.0  ;;  %v1550_v42 = vmul.f32 0.2, %v1151_v40  ;;  %v2136_v43 = vpop.f32.mrf.mxu0 }
  0xf5   : > { %1808 = vst [vmem:[%s2494_s21 + $0x290] sm:$0xff] %v1680_v41  ;;  %v1614_v44 = vsel %vm1358_vm3, %v895_v37, %v1486_v39  ;;  %vm1361_vm5 = vcmp.gt.f32.partialorder %v2136_v43, 0.0  ;;  %v1489_v45 = vmul.f32 0.2, %v2136_v43  ;;  %v2200_v46 = vpop.f32.mrf.mxu1 }
  0xf6   : > { %1742 = vst [vmem:[%s2494_s21 + $0x80] sm:$0xff] %v1614_v44  ;;  %v1678_v47 = vsel %vm1422_vm4, %v1151_v40, %v1550_v42  ;;  %vm1425_vm6 = vcmp.gt.f32.partialorder %v2200_v46, 0.0  ;;  %v1553_v48 = vmul.f32 0.2, %v2200_v46  ;;  %v898_v49 = vpop.f32.mrf.mxu0 }
  0xf7   : > { %1806 = vst [vmem:[%s2494_s21 + $0x280] sm:$0xff] %v1678_v47  ;;  %v1617_v50 = vsel %vm1361_vm5, %v2136_v43, %v1489_v45  ;;  %vm1359_vm7 = vcmp.gt.f32.partialorder %v898_v49, 0.0  ;;  %v1487_v51 = vmul.f32 0.2, %v898_v49  ;;  %v1154_v52 = vpop.f32.mrf.mxu1 }
  0xf8   : > { %1745 = vst [vmem:[%s2494_s21 + $0x98] sm:$0xff] %v1617_v50  ;;  %v1681_v53 = vsel %vm1425_vm6, %v2200_v46, %v1553_v48  ;;  %vm1423_vm8 = vcmp.gt.f32.partialorder %v1154_v52, 0.0  ;;  %v1551_v54 = vmul.f32 0.2, %v1154_v52  ;;  %v2139_v55 = vpop.f32.mrf.mxu0 }
  0xf9   : > { %1809 = vst [vmem:[%s2494_s21 + $0x298] sm:$0xff] %v1681_v53  ;;  %v1615_v56 = vsel %vm1359_vm7, %v898_v49, %v1487_v51  ;;  %vm1364_vm9 = vcmp.gt.f32.partialorder %v2139_v55, 0.0  ;;  %v1492_v57 = vmul.f32 0.2, %v2139_v55  ;;  %v2203_v58 = vpop.f32.mrf.mxu1 }
  0xfa   : > { %1743 = vst [vmem:[%s2494_s21 + $0x88] sm:$0xff] %v1615_v56  ;;  %v1679_v59 = vsel %vm1423_vm8, %v1154_v52, %v1551_v54  ;;  %vm1428_vm10 = vcmp.gt.f32.partialorder %v2203_v58, 0.0  ;;  %v1556_v60 = vmul.f32 0.2, %v2203_v58  ;;  %v911_v61 = vpop.f32.mrf.mxu0 }
  0xfb   : > { %1807 = vst [vmem:[%s2494_s21 + $0x288] sm:$0xff] %v1679_v59  ;;  %v1620_v62 = vsel %vm1364_vm9, %v2139_v55, %v1492_v57  ;;  %vm1362_vm11 = vcmp.gt.f32.partialorder %v911_v61, 0.0  ;;  %v1490_v63 = vmul.f32 0.2, %v911_v61  ;;  %v1167_v0 = vpop.f32.mrf.mxu1 }
  0xfc   : > { %1748 = vst [vmem:[%s2494_s21 + $0xb0] sm:$0xff] %v1620_v62  ;;  %v1684_v1 = vsel %vm1428_vm10, %v2203_v58, %v1556_v60  ;;  %vm1426_vm12 = vcmp.gt.f32.partialorder %v1167_v0, 0.0  ;;  %v1554_v2 = vmul.f32 0.2, %v1167_v0  ;;  %v2140_v3 = vpop.f32.mrf.mxu0 }
  0xfd   : > { %1812 = vst [vmem:[%s2494_s21 + $0x2b0] sm:$0xff] %v1684_v1  ;;  %v1618_v4 = vsel %vm1362_vm11, %v911_v61, %v1490_v63  ;;  %vm1365_vm13 = vcmp.gt.f32.partialorder %v2140_v3, 0.0  ;;  %v1493_v5 = vmul.f32 0.2, %v2140_v3  ;;  %v2204_v6 = vpop.f32.mrf.mxu1 }
  0xfe   : > { %1746 = vst [vmem:[%s2494_s21 + $0xa0] sm:$0xff] %v1618_v4  ;;  %v1682_v7 = vsel %vm1426_vm12, %v1167_v0, %v1554_v2  ;;  %vm1429_vm14 = vcmp.gt.f32.partialorder %v2204_v6, 0.0  ;;  %v1557_v8 = vmul.f32 0.2, %v2204_v6  ;;  %v914_v9 = vpop.f32.mrf.mxu0 }
  0xff   : > { %1810 = vst [vmem:[%s2494_s21 + $0x2a0] sm:$0xff] %v1682_v7  ;;  %v1621_v10 = vsel %vm1365_vm13, %v2140_v3, %v1493_v5  ;;  %vm1363_vm15 = vcmp.gt.f32.partialorder %v914_v9, 0.0  ;;  %v1491_v11 = vmul.f32 0.2, %v914_v9  ;;  %v1170_v12 = vpop.f32.mrf.mxu1 }
 0x100   : > { %1749 = vst [vmem:[%s2494_s21 + $0xb8] sm:$0xff] %v1621_v10  ;;  %v1685_v13 = vsel %vm1429_vm14, %v2204_v6, %v1557_v8  ;;  %vm1427_vm0 = vcmp.gt.f32.partialorder %v1170_v12, 0.0  ;;  %v1555_v14 = vmul.f32 0.2, %v1170_v12  ;;  %v2143_v15 = vpop.f32.mrf.mxu0 }
 0x101   : > { %1813 = vst [vmem:[%s2494_s21 + $0x2b8] sm:$0xff] %v1685_v13  ;;  %v1619_v16 = vsel %vm1363_vm15, %v914_v9, %v1491_v11  ;;  %vm1368_vm1 = vcmp.gt.f32.partialorder %v2143_v15, 0.0  ;;  %v1496_v17 = vmul.f32 0.2, %v2143_v15  ;;  %v2207_v18 = vpop.f32.mrf.mxu1 }
 0x102   : > { %1747 = vst [vmem:[%s2494_s21 + $0xa8] sm:$0xff] %v1619_v16  ;;  %v1683_v19 = vsel %vm1427_vm0, %v1170_v12, %v1555_v14  ;;  %vm1432_vm2 = vcmp.gt.f32.partialorder %v2207_v18, 0.0  ;;  %v1560_v20 = vmul.f32 0.2, %v2207_v18  ;;  %v927_v21 = vpop.f32.mrf.mxu0 }
 0x103   : > { %1811 = vst [vmem:[%s2494_s21 + $0x2a8] sm:$0xff] %v1683_v19  ;;  %v1624_v22 = vsel %vm1368_vm1, %v2143_v15, %v1496_v17  ;;  %vm1366_vm3 = vcmp.gt.f32.partialorder %v927_v21, 0.0  ;;  %v1494_v23 = vmul.f32 0.2, %v927_v21  ;;  %v1183_v24 = vpop.f32.mrf.mxu1 }
 0x104   : > { %1752 = vst [vmem:[%s2494_s21 + $0xd0] sm:$0xff] %v1624_v22  ;;  %v1688_v25 = vsel %vm1432_vm2, %v2207_v18, %v1560_v20  ;;  %vm1430_vm4 = vcmp.gt.f32.partialorder %v1183_v24, 0.0  ;;  %v1558_v26 = vmul.f32 0.2, %v1183_v24  ;;  %v2144_v27 = vpop.f32.mrf.mxu0 }
 0x105   : > { %1816 = vst [vmem:[%s2494_s21 + $0x2d0] sm:$0xff] %v1688_v25  ;;  %v1622_v28 = vsel %vm1366_vm3, %v927_v21, %v1494_v23  ;;  %vm1369_vm5 = vcmp.gt.f32.partialorder %v2144_v27, 0.0  ;;  %v1497_v29 = vmul.f32 0.2, %v2144_v27  ;;  %v2208_v30 = vpop.f32.mrf.mxu1 }
 0x106   : > { %1750 = vst [vmem:[%s2494_s21 + $0xc0] sm:$0xff] %v1622_v28  ;;  %v1686_v31 = vsel %vm1430_vm4, %v1183_v24, %v1558_v26  ;;  %vm1433_vm6 = vcmp.gt.f32.partialorder %v2208_v30, 0.0  ;;  %v1561_v32 = vmul.f32 0.2, %v2208_v30  ;;  %v930_v33 = vpop.f32.mrf.mxu0 }
 0x107   : > { %1814 = vst [vmem:[%s2494_s21 + $0x2c0] sm:$0xff] %v1686_v31  ;;  %v1625_v34 = vsel %vm1369_vm5, %v2144_v27, %v1497_v29  ;;  %vm1367_vm7 = vcmp.gt.f32.partialorder %v930_v33, 0.0  ;;  %v1495_v35 = vmul.f32 0.2, %v930_v33  ;;  %v1186_v36 = vpop.f32.mrf.mxu1 }
 0x108   : > { %1753 = vst [vmem:[%s2494_s21 + $0xd8] sm:$0xff] %v1625_v34  ;;  %v1689_v37 = vsel %vm1433_vm6, %v2208_v30, %v1561_v32  ;;  %vm1431_vm8 = vcmp.gt.f32.partialorder %v1186_v36, 0.0  ;;  %v1559_v38 = vmul.f32 0.2, %v1186_v36  ;;  %v2147_v39 = vpop.f32.mrf.mxu0 }
 0x109   : > { %1817 = vst [vmem:[%s2494_s21 + $0x2d8] sm:$0xff] %v1689_v37  ;;  %v1623_v40 = vsel %vm1367_vm7, %v930_v33, %v1495_v35  ;;  %vm1372_vm9 = vcmp.gt.f32.partialorder %v2147_v39, 0.0  ;;  %v1500_v41 = vmul.f32 0.2, %v2147_v39  ;;  %v2211_v42 = vpop.f32.mrf.mxu1 }
 0x10a   : > { %1751 = vst [vmem:[%s2494_s21 + $0xc8] sm:$0xff] %v1623_v40  ;;  %v1687_v43 = vsel %vm1431_vm8, %v1186_v36, %v1559_v38  ;;  %vm1436_vm10 = vcmp.gt.f32.partialorder %v2211_v42, 0.0  ;;  %v1564_v44 = vmul.f32 0.2, %v2211_v42  ;;  %v943_v45 = vpop.f32.mrf.mxu0 }
 0x10b   : > { %1815 = vst [vmem:[%s2494_s21 + $0x2c8] sm:$0xff] %v1687_v43  ;;  %v1628_v46 = vsel %vm1372_vm9, %v2147_v39, %v1500_v41  ;;  %vm1370_vm11 = vcmp.gt.f32.partialorder %v943_v45, 0.0  ;;  %v1498_v47 = vmul.f32 0.2, %v943_v45  ;;  %v1199_v48 = vpop.f32.mrf.mxu1 }
 0x10c   : > { %1756 = vst [vmem:[%s2494_s21 + $0xf0] sm:$0xff] %v1628_v46  ;;  %v1692_v49 = vsel %vm1436_vm10, %v2211_v42, %v1564_v44  ;;  %vm1434_vm12 = vcmp.gt.f32.partialorder %v1199_v48, 0.0  ;;  %v1562_v50 = vmul.f32 0.2, %v1199_v48  ;;  %v2148_v51 = vpop.f32.mrf.mxu0 }
 0x10d   : > { %1820 = vst [vmem:[%s2494_s21 + $0x2f0] sm:$0xff] %v1692_v49  ;;  %v1626_v52 = vsel %vm1370_vm11, %v943_v45, %v1498_v47  ;;  %vm1373_vm13 = vcmp.gt.f32.partialorder %v2148_v51, 0.0  ;;  %v1501_v53 = vmul.f32 0.2, %v2148_v51  ;;  %v2212_v54 = vpop.f32.mrf.mxu1 }
 0x10e   : > { %1754 = vst [vmem:[%s2494_s21 + $0xe0] sm:$0xff] %v1626_v52  ;;  %v1690_v55 = vsel %vm1434_vm12, %v1199_v48, %v1562_v50  ;;  %vm1437_vm14 = vcmp.gt.f32.partialorder %v2212_v54, 0.0  ;;  %v1565_v56 = vmul.f32 0.2, %v2212_v54  ;;  %v946_v57 = vpop.f32.mrf.mxu0 }
 0x10f   : > { %1818 = vst [vmem:[%s2494_s21 + $0x2e0] sm:$0xff] %v1690_v55  ;;  %v1629_v58 = vsel %vm1373_vm13, %v2148_v51, %v1501_v53  ;;  %vm1371_vm15 = vcmp.gt.f32.partialorder %v946_v57, 0.0  ;;  %v1499_v59 = vmul.f32 0.2, %v946_v57  ;;  %v1202_v60 = vpop.f32.mrf.mxu1 }
 0x110   : > { %1757 = vst [vmem:[%s2494_s21 + $0xf8] sm:$0xff] %v1629_v58  ;;  %v1693_v61 = vsel %vm1437_vm14, %v2212_v54, %v1565_v56  ;;  %vm1435_vm0 = vcmp.gt.f32.partialorder %v1202_v60, 0.0  ;;  %v1563_v62 = vmul.f32 0.2, %v1202_v60  ;;  %v2151_v63 = vpop.f32.mrf.mxu0 }
 0x111   : > { %1821 = vst [vmem:[%s2494_s21 + $0x2f8] sm:$0xff] %v1693_v61  ;;  %v1627_v0 = vsel %vm1371_vm15, %v946_v57, %v1499_v59  ;;  %vm1376_vm1 = vcmp.gt.f32.partialorder %v2151_v63, 0.0  ;;  %v1504_v1 = vmul.f32 0.2, %v2151_v63  ;;  %v2215_v2 = vpop.f32.mrf.mxu1 }
 0x112   : > { %1755 = vst [vmem:[%s2494_s21 + $0xe8] sm:$0xff] %v1627_v0  ;;  %v1691_v3 = vsel %vm1435_vm0, %v1202_v60, %v1563_v62  ;;  %vm1440_vm2 = vcmp.gt.f32.partialorder %v2215_v2, 0.0  ;;  %v1568_v4 = vmul.f32 0.2, %v2215_v2  ;;  %v959_v5 = vpop.f32.mrf.mxu0 }
 0x113   : > { %1819 = vst [vmem:[%s2494_s21 + $0x2e8] sm:$0xff] %v1691_v3  ;;  %v1632_v6 = vsel %vm1376_vm1, %v2151_v63, %v1504_v1  ;;  %vm1374_vm3 = vcmp.gt.f32.partialorder %v959_v5, 0.0  ;;  %v1502_v7 = vmul.f32 0.2, %v959_v5  ;;  %v1215_v8 = vpop.f32.mrf.mxu1 }
 0x114   : > { %1760 = vst [vmem:[%s2494_s21 + $0x110] sm:$0xff] %v1632_v6  ;;  %v1696_v9 = vsel %vm1440_vm2, %v2215_v2, %v1568_v4  ;;  %vm1438_vm4 = vcmp.gt.f32.partialorder %v1215_v8, 0.0  ;;  %v1566_v10 = vmul.f32 0.2, %v1215_v8  ;;  %v2152_v11 = vpop.f32.mrf.mxu0 }
 0x115   : > { %1824 = vst [vmem:[%s2494_s21 + $0x310] sm:$0xff] %v1696_v9  ;;  %v1630_v12 = vsel %vm1374_vm3, %v959_v5, %v1502_v7  ;;  %vm1377_vm5 = vcmp.gt.f32.partialorder %v2152_v11, 0.0  ;;  %v1505_v13 = vmul.f32 0.2, %v2152_v11  ;;  %v2216_v14 = vpop.f32.mrf.mxu1 }
 0x116   : > { %1758 = vst [vmem:[%s2494_s21 + $0x100] sm:$0xff] %v1630_v12  ;;  %v1694_v15 = vsel %vm1438_vm4, %v1215_v8, %v1566_v10  ;;  %vm1441_vm6 = vcmp.gt.f32.partialorder %v2216_v14, 0.0  ;;  %v1569_v16 = vmul.f32 0.2, %v2216_v14  ;;  %v962_v17 = vpop.f32.mrf.mxu0 }
 0x117   : > { %1822 = vst [vmem:[%s2494_s21 + $0x300] sm:$0xff] %v1694_v15  ;;  %v1633_v18 = vsel %vm1377_vm5, %v2152_v11, %v1505_v13  ;;  %vm1375_vm7 = vcmp.gt.f32.partialorder %v962_v17, 0.0  ;;  %v1503_v19 = vmul.f32 0.2, %v962_v17  ;;  %v1218_v20 = vpop.f32.mrf.mxu1 }
 0x118   : > { %1761 = vst [vmem:[%s2494_s21 + $0x118] sm:$0xff] %v1633_v18  ;;  %v1697_v21 = vsel %vm1441_vm6, %v2216_v14, %v1569_v16  ;;  %vm1439_vm8 = vcmp.gt.f32.partialorder %v1218_v20, 0.0  ;;  %v1567_v22 = vmul.f32 0.2, %v1218_v20  ;;  %v2155_v23 = vpop.f32.mrf.mxu0 }
 0x119   : > { %1825 = vst [vmem:[%s2494_s21 + $0x318] sm:$0xff] %v1697_v21  ;;  %v1631_v24 = vsel %vm1375_vm7, %v962_v17, %v1503_v19  ;;  %vm1380_vm9 = vcmp.gt.f32.partialorder %v2155_v23, 0.0  ;;  %v1508_v25 = vmul.f32 0.2, %v2155_v23  ;;  %v2219_v26 = vpop.f32.mrf.mxu1 }
 0x11a   : > { %1759 = vst [vmem:[%s2494_s21 + $0x108] sm:$0xff] %v1631_v24  ;;  %v1695_v27 = vsel %vm1439_vm8, %v1218_v20, %v1567_v22  ;;  %vm1444_vm10 = vcmp.gt.f32.partialorder %v2219_v26, 0.0  ;;  %v1572_v28 = vmul.f32 0.2, %v2219_v26  ;;  %v975_v29 = vpop.f32.mrf.mxu0 }
 0x11b   : > { %1823 = vst [vmem:[%s2494_s21 + $0x308] sm:$0xff] %v1695_v27  ;;  %v1636_v30 = vsel %vm1380_vm9, %v2155_v23, %v1508_v25  ;;  %vm1378_vm11 = vcmp.gt.f32.partialorder %v975_v29, 0.0  ;;  %v1506_v31 = vmul.f32 0.2, %v975_v29  ;;  %v1231_v32 = vpop.f32.mrf.mxu1 }
 0x11c   : > { %1764 = vst [vmem:[%s2494_s21 + $0x130] sm:$0xff] %v1636_v30  ;;  %v1700_v33 = vsel %vm1444_vm10, %v2219_v26, %v1572_v28  ;;  %vm1442_vm12 = vcmp.gt.f32.partialorder %v1231_v32, 0.0  ;;  %v1570_v34 = vmul.f32 0.2, %v1231_v32  ;;  %v2156_v35 = vpop.f32.mrf.mxu0 }
 0x11d   : > { %1828 = vst [vmem:[%s2494_s21 + $0x330] sm:$0xff] %v1700_v33  ;;  %v1634_v36 = vsel %vm1378_vm11, %v975_v29, %v1506_v31  ;;  %vm1381_vm13 = vcmp.gt.f32.partialorder %v2156_v35, 0.0  ;;  %v1509_v37 = vmul.f32 0.2, %v2156_v35  ;;  %v2220_v38 = vpop.f32.mrf.mxu1 }
 0x11e   : > { %1762 = vst [vmem:[%s2494_s21 + $0x120] sm:$0xff] %v1634_v36  ;;  %v1698_v39 = vsel %vm1442_vm12, %v1231_v32, %v1570_v34  ;;  %vm1445_vm14 = vcmp.gt.f32.partialorder %v2220_v38, 0.0  ;;  %v1573_v40 = vmul.f32 0.2, %v2220_v38  ;;  %v978_v41 = vpop.f32.mrf.mxu0 }
 0x11f   : > { %1826 = vst [vmem:[%s2494_s21 + $0x320] sm:$0xff] %v1698_v39  ;;  %v1637_v42 = vsel %vm1381_vm13, %v2156_v35, %v1509_v37  ;;  %vm1379_vm15 = vcmp.gt.f32.partialorder %v978_v41, 0.0  ;;  %v1507_v43 = vmul.f32 0.2, %v978_v41  ;;  %v1234_v44 = vpop.f32.mrf.mxu1 }
 0x120   : > { %1765 = vst [vmem:[%s2494_s21 + $0x138] sm:$0xff] %v1637_v42  ;;  %v1701_v45 = vsel %vm1445_vm14, %v2220_v38, %v1573_v40  ;;  %vm1443_vm0 = vcmp.gt.f32.partialorder %v1234_v44, 0.0  ;;  %v1571_v46 = vmul.f32 0.2, %v1234_v44  ;;  %v2159_v47 = vpop.f32.mrf.mxu0 }
 0x121   : > { %1829 = vst [vmem:[%s2494_s21 + $0x338] sm:$0xff] %v1701_v45  ;;  %v1635_v48 = vsel %vm1379_vm15, %v978_v41, %v1507_v43  ;;  %vm1384_vm1 = vcmp.gt.f32.partialorder %v2159_v47, 0.0  ;;  %v1512_v49 = vmul.f32 0.2, %v2159_v47  ;;  %v2223_v50 = vpop.f32.mrf.mxu1 }
 0x122   : > { %1763 = vst [vmem:[%s2494_s21 + $0x128] sm:$0xff] %v1635_v48  ;;  %v1699_v51 = vsel %vm1443_vm0, %v1234_v44, %v1571_v46  ;;  %vm1448_vm2 = vcmp.gt.f32.partialorder %v2223_v50, 0.0  ;;  %v1576_v52 = vmul.f32 0.2, %v2223_v50  ;;  %v991_v53 = vpop.f32.mrf.mxu0 }
 0x123   : > { %1827 = vst [vmem:[%s2494_s21 + $0x328] sm:$0xff] %v1699_v51  ;;  %v1640_v54 = vsel %vm1384_vm1, %v2159_v47, %v1512_v49  ;;  %vm1382_vm3 = vcmp.gt.f32.partialorder %v991_v53, 0.0  ;;  %v1510_v55 = vmul.f32 0.2, %v991_v53  ;;  %v1247_v56 = vpop.f32.mrf.mxu1 }
 0x124   : > { %1768 = vst [vmem:[%s2494_s21 + $0x150] sm:$0xff] %v1640_v54  ;;  %v1704_v57 = vsel %vm1448_vm2, %v2223_v50, %v1576_v52  ;;  %vm1446_vm4 = vcmp.gt.f32.partialorder %v1247_v56, 0.0  ;;  %v1574_v58 = vmul.f32 0.2, %v1247_v56  ;;  %v2160_v59 = vpop.f32.mrf.mxu0 }
 0x125   : > { %1832 = vst [vmem:[%s2494_s21 + $0x350] sm:$0xff] %v1704_v57  ;;  %v1638_v60 = vsel %vm1382_vm3, %v991_v53, %v1510_v55  ;;  %vm1385_vm5 = vcmp.gt.f32.partialorder %v2160_v59, 0.0  ;;  %v1513_v61 = vmul.f32 0.2, %v2160_v59  ;;  %v2224_v62 = vpop.f32.mrf.mxu1 }
 0x126   : > { %1766 = vst [vmem:[%s2494_s21 + $0x140] sm:$0xff] %v1638_v60  ;;  %v1702_v63 = vsel %vm1446_vm4, %v1247_v56, %v1574_v58  ;;  %vm1449_vm6 = vcmp.gt.f32.partialorder %v2224_v62, 0.0  ;;  %v1577_v0 = vmul.f32 0.2, %v2224_v62  ;;  %v994_v1 = vpop.f32.mrf.mxu0 }
 0x127   : > { %1830 = vst [vmem:[%s2494_s21 + $0x340] sm:$0xff] %v1702_v63  ;;  %v1641_v2 = vsel %vm1385_vm5, %v2160_v59, %v1513_v61  ;;  %vm1383_vm7 = vcmp.gt.f32.partialorder %v994_v1, 0.0  ;;  %v1511_v3 = vmul.f32 0.2, %v994_v1  ;;  %v1250_v4 = vpop.f32.mrf.mxu1 }
 0x128   : > { %1769 = vst [vmem:[%s2494_s21 + $0x158] sm:$0xff] %v1641_v2  ;;  %v1705_v5 = vsel %vm1449_vm6, %v2224_v62, %v1577_v0  ;;  %vm1447_vm8 = vcmp.gt.f32.partialorder %v1250_v4, 0.0  ;;  %v1575_v6 = vmul.f32 0.2, %v1250_v4  ;;  %v2163_v7 = vpop.f32.mrf.mxu0 }
 0x129   : > { %1833 = vst [vmem:[%s2494_s21 + $0x358] sm:$0xff] %v1705_v5  ;;  %v1639_v8 = vsel %vm1383_vm7, %v994_v1, %v1511_v3  ;;  %vm1388_vm9 = vcmp.gt.f32.partialorder %v2163_v7, 0.0  ;;  %v1516_v9 = vmul.f32 0.2, %v2163_v7  ;;  %v2227_v10 = vpop.f32.mrf.mxu1 }
 0x12a   : > { %1767 = vst [vmem:[%s2494_s21 + $0x148] sm:$0xff] %v1639_v8  ;;  %v1703_v11 = vsel %vm1447_vm8, %v1250_v4, %v1575_v6  ;;  %vm1452_vm10 = vcmp.gt.f32.partialorder %v2227_v10, 0.0  ;;  %v1580_v12 = vmul.f32 0.2, %v2227_v10  ;;  %v1007_v13 = vpop.f32.mrf.mxu0 }
 0x12b   : > { %1831 = vst [vmem:[%s2494_s21 + $0x348] sm:$0xff] %v1703_v11  ;;  %v1644_v14 = vsel %vm1388_vm9, %v2163_v7, %v1516_v9  ;;  %vm1386_vm11 = vcmp.gt.f32.partialorder %v1007_v13, 0.0  ;;  %v1514_v15 = vmul.f32 0.2, %v1007_v13  ;;  %v1263_v16 = vpop.f32.mrf.mxu1 }
 0x12c   : > { %1772 = vst [vmem:[%s2494_s21 + $0x170] sm:$0xff] %v1644_v14  ;;  %v1708_v17 = vsel %vm1452_vm10, %v2227_v10, %v1580_v12  ;;  %vm1450_vm12 = vcmp.gt.f32.partialorder %v1263_v16, 0.0  ;;  %v1578_v18 = vmul.f32 0.2, %v1263_v16  ;;  %v2164_v19 = vpop.f32.mrf.mxu0 }
 0x12d   : > { %1836 = vst [vmem:[%s2494_s21 + $0x370] sm:$0xff] %v1708_v17  ;;  %v1642_v20 = vsel %vm1386_vm11, %v1007_v13, %v1514_v15  ;;  %vm1389_vm13 = vcmp.gt.f32.partialorder %v2164_v19, 0.0  ;;  %v1517_v21 = vmul.f32 0.2, %v2164_v19  ;;  %v2228_v22 = vpop.f32.mrf.mxu1 }
 0x12e   : > { %1770 = vst [vmem:[%s2494_s21 + $0x160] sm:$0xff] %v1642_v20  ;;  %v1706_v23 = vsel %vm1450_vm12, %v1263_v16, %v1578_v18  ;;  %vm1453_vm14 = vcmp.gt.f32.partialorder %v2228_v22, 0.0  ;;  %v1581_v24 = vmul.f32 0.2, %v2228_v22  ;;  %v1010_v25 = vpop.f32.mrf.mxu0 }
 0x12f   : > { %1834 = vst [vmem:[%s2494_s21 + $0x360] sm:$0xff] %v1706_v23  ;;  %v1645_v26 = vsel %vm1389_vm13, %v2164_v19, %v1517_v21  ;;  %vm1387_vm15 = vcmp.gt.f32.partialorder %v1010_v25, 0.0  ;;  %v1515_v27 = vmul.f32 0.2, %v1010_v25  ;;  %v1266_v28 = vpop.f32.mrf.mxu1 }
 0x130   : > { %1773 = vst [vmem:[%s2494_s21 + $0x178] sm:$0xff] %v1645_v26  ;;  %v1709_v29 = vsel %vm1453_vm14, %v2228_v22, %v1581_v24  ;;  %vm1451_vm0 = vcmp.gt.f32.partialorder %v1266_v28, 0.0  ;;  %v1579_v30 = vmul.f32 0.2, %v1266_v28  ;;  %v2167_v31 = vpop.f32.mrf.mxu0 }
 0x131   : > { %1837 = vst [vmem:[%s2494_s21 + $0x378] sm:$0xff] %v1709_v29  ;;  %v1643_v32 = vsel %vm1387_vm15, %v1010_v25, %v1515_v27  ;;  %vm1392_vm1 = vcmp.gt.f32.partialorder %v2167_v31, 0.0  ;;  %v1520_v33 = vmul.f32 0.2, %v2167_v31  ;;  %v2231_v34 = vpop.f32.mrf.mxu1 }
 0x132   : > { %1771 = vst [vmem:[%s2494_s21 + $0x168] sm:$0xff] %v1643_v32  ;;  %v1707_v35 = vsel %vm1451_vm0, %v1266_v28, %v1579_v30  ;;  %vm1456_vm2 = vcmp.gt.f32.partialorder %v2231_v34, 0.0  ;;  %v1584_v36 = vmul.f32 0.2, %v2231_v34  ;;  %v1023_v37 = vpop.f32.mrf.mxu0 }
 0x133   : > { %1835 = vst [vmem:[%s2494_s21 + $0x368] sm:$0xff] %v1707_v35  ;;  %v1648_v38 = vsel %vm1392_vm1, %v2167_v31, %v1520_v33  ;;  %vm1390_vm3 = vcmp.gt.f32.partialorder %v1023_v37, 0.0  ;;  %v1518_v39 = vmul.f32 0.2, %v1023_v37  ;;  %v1279_v40 = vpop.f32.mrf.mxu1 }
 0x134   : > { %1776 = vst [vmem:[%s2494_s21 + $0x190] sm:$0xff] %v1648_v38  ;;  %v1712_v41 = vsel %vm1456_vm2, %v2231_v34, %v1584_v36  ;;  %vm1454_vm4 = vcmp.gt.f32.partialorder %v1279_v40, 0.0  ;;  %v1582_v42 = vmul.f32 0.2, %v1279_v40  ;;  %v2168_v43 = vpop.f32.mrf.mxu0 }
 0x135   : > { %1840 = vst [vmem:[%s2494_s21 + $0x390] sm:$0xff] %v1712_v41  ;;  %v1646_v44 = vsel %vm1390_vm3, %v1023_v37, %v1518_v39  ;;  %vm1393_vm5 = vcmp.gt.f32.partialorder %v2168_v43, 0.0  ;;  %v1521_v45 = vmul.f32 0.2, %v2168_v43  ;;  %v2232_v46 = vpop.f32.mrf.mxu1 }
 0x136   : > { %1774 = vst [vmem:[%s2494_s21 + $0x180] sm:$0xff] %v1646_v44  ;;  %v1710_v47 = vsel %vm1454_vm4, %v1279_v40, %v1582_v42  ;;  %vm1457_vm6 = vcmp.gt.f32.partialorder %v2232_v46, 0.0  ;;  %v1585_v48 = vmul.f32 0.2, %v2232_v46  ;;  %v1026_v49 = vpop.f32.mrf.mxu0 }
 0x137   : > { %1838 = vst [vmem:[%s2494_s21 + $0x380] sm:$0xff] %v1710_v47  ;;  %v1649_v50 = vsel %vm1393_vm5, %v2168_v43, %v1521_v45  ;;  %vm1391_vm7 = vcmp.gt.f32.partialorder %v1026_v49, 0.0  ;;  %v1519_v51 = vmul.f32 0.2, %v1026_v49  ;;  %v1282_v52 = vpop.f32.mrf.mxu1 }
 0x138   : > { %1777 = vst [vmem:[%s2494_s21 + $0x198] sm:$0xff] %v1649_v50  ;;  %v1713_v53 = vsel %vm1457_vm6, %v2232_v46, %v1585_v48  ;;  %vm1455_vm8 = vcmp.gt.f32.partialorder %v1282_v52, 0.0  ;;  %v1583_v54 = vmul.f32 0.2, %v1282_v52  ;;  %v2171_v55 = vpop.f32.mrf.mxu0 }
 0x139   : > { %1841 = vst [vmem:[%s2494_s21 + $0x398] sm:$0xff] %v1713_v53  ;;  %v1647_v56 = vsel %vm1391_vm7, %v1026_v49, %v1519_v51  ;;  %vm1396_vm9 = vcmp.gt.f32.partialorder %v2171_v55, 0.0  ;;  %v1524_v57 = vmul.f32 0.2, %v2171_v55  ;;  %v2235_v58 = vpop.f32.mrf.mxu1 }
 0x13a   : > { %1775 = vst [vmem:[%s2494_s21 + $0x188] sm:$0xff] %v1647_v56  ;;  %v1711_v59 = vsel %vm1455_vm8, %v1282_v52, %v1583_v54  ;;  %vm1460_vm10 = vcmp.gt.f32.partialorder %v2235_v58, 0.0  ;;  %v1588_v60 = vmul.f32 0.2, %v2235_v58  ;;  %v1039_v61 = vpop.f32.mrf.mxu0 }
 0x13b   : > { %1839 = vst [vmem:[%s2494_s21 + $0x388] sm:$0xff] %v1711_v59  ;;  %v1652_v62 = vsel %vm1396_vm9, %v2171_v55, %v1524_v57  ;;  %vm1394_vm11 = vcmp.gt.f32.partialorder %v1039_v61, 0.0  ;;  %v1522_v63 = vmul.f32 0.2, %v1039_v61  ;;  %v1295_v0 = vpop.f32.mrf.mxu1 }
 0x13c   : > { %1780 = vst [vmem:[%s2494_s21 + $0x1b0] sm:$0xff] %v1652_v62  ;;  %v1716_v1 = vsel %vm1460_vm10, %v2235_v58, %v1588_v60  ;;  %vm1458_vm12 = vcmp.gt.f32.partialorder %v1295_v0, 0.0  ;;  %v1586_v2 = vmul.f32 0.2, %v1295_v0  ;;  %v2172_v3 = vpop.f32.mrf.mxu0 }
 0x13d   : > { %1844 = vst [vmem:[%s2494_s21 + $0x3b0] sm:$0xff] %v1716_v1  ;;  %v1650_v4 = vsel %vm1394_vm11, %v1039_v61, %v1522_v63  ;;  %vm1397_vm13 = vcmp.gt.f32.partialorder %v2172_v3, 0.0  ;;  %v1525_v5 = vmul.f32 0.2, %v2172_v3  ;;  %v2236_v6 = vpop.f32.mrf.mxu1 }
 0x13e   : > { %1778 = vst [vmem:[%s2494_s21 + $0x1a0] sm:$0xff] %v1650_v4  ;;  %v1714_v7 = vsel %vm1458_vm12, %v1295_v0, %v1586_v2  ;;  %vm1461_vm14 = vcmp.gt.f32.partialorder %v2236_v6, 0.0  ;;  %v1589_v8 = vmul.f32 0.2, %v2236_v6  ;;  %v1042_v9 = vpop.f32.mrf.mxu0 }
 0x13f   : > { %1842 = vst [vmem:[%s2494_s21 + $0x3a0] sm:$0xff] %v1714_v7  ;;  %v1653_v10 = vsel %vm1397_vm13, %v2172_v3, %v1525_v5  ;;  %vm1395_vm15 = vcmp.gt.f32.partialorder %v1042_v9, 0.0  ;;  %v1523_v11 = vmul.f32 0.2, %v1042_v9  ;;  %v1298_v12 = vpop.f32.mrf.mxu1 }
 0x140   : > { %1781 = vst [vmem:[%s2494_s21 + $0x1b8] sm:$0xff] %v1653_v10  ;;  %v1717_v13 = vsel %vm1461_vm14, %v2236_v6, %v1589_v8  ;;  %vm1459_vm0 = vcmp.gt.f32.partialorder %v1298_v12, 0.0  ;;  %v1587_v14 = vmul.f32 0.2, %v1298_v12  ;;  %v2175_v15 = vpop.f32.mrf.mxu0 }
 0x141   : > { %1845 = vst [vmem:[%s2494_s21 + $0x3b8] sm:$0xff] %v1717_v13  ;;  %v1651_v16 = vsel %vm1395_vm15, %v1042_v9, %v1523_v11  ;;  %vm1400_vm1 = vcmp.gt.f32.partialorder %v2175_v15, 0.0  ;;  %v1528_v17 = vmul.f32 0.2, %v2175_v15  ;;  %v2239_v18 = vpop.f32.mrf.mxu1 }
 0x142   : > { %1779 = vst [vmem:[%s2494_s21 + $0x1a8] sm:$0xff] %v1651_v16  ;;  %v1715_v19 = vsel %vm1459_vm0, %v1298_v12, %v1587_v14  ;;  %vm1464_vm2 = vcmp.gt.f32.partialorder %v2239_v18, 0.0  ;;  %v1592_v20 = vmul.f32 0.2, %v2239_v18  ;;  %v1055_v21 = vpop.f32.mrf.mxu0 }
 0x143   : > { %1843 = vst [vmem:[%s2494_s21 + $0x3a8] sm:$0xff] %v1715_v19  ;;  %v1656_v22 = vsel %vm1400_vm1, %v2175_v15, %v1528_v17  ;;  %vm1398_vm3 = vcmp.gt.f32.partialorder %v1055_v21, 0.0  ;;  %v1526_v23 = vmul.f32 0.2, %v1055_v21  ;;  %v1311_v24 = vpop.f32.mrf.mxu1 }
 0x144   : > { %1784 = vst [vmem:[%s2494_s21 + $0x1d0] sm:$0xff] %v1656_v22  ;;  %v1720_v25 = vsel %vm1464_vm2, %v2239_v18, %v1592_v20  ;;  %vm1462_vm4 = vcmp.gt.f32.partialorder %v1311_v24, 0.0  ;;  %v1590_v26 = vmul.f32 0.2, %v1311_v24  ;;  %v2176_v27 = vpop.f32.mrf.mxu0 }
 0x145   : > { %1848 = vst [vmem:[%s2494_s21 + $0x3d0] sm:$0xff] %v1720_v25  ;;  %v1654_v28 = vsel %vm1398_vm3, %v1055_v21, %v1526_v23  ;;  %vm1401_vm5 = vcmp.gt.f32.partialorder %v2176_v27, 0.0  ;;  %v1529_v29 = vmul.f32 0.2, %v2176_v27  ;;  %v2240_v30 = vpop.f32.mrf.mxu1 }
 0x146   : > { %1782 = vst [vmem:[%s2494_s21 + $0x1c0] sm:$0xff] %v1654_v28  ;;  %v1718_v31 = vsel %vm1462_vm4, %v1311_v24, %v1590_v26  ;;  %vm1465_vm6 = vcmp.gt.f32.partialorder %v2240_v30, 0.0  ;;  %v1593_v32 = vmul.f32 0.2, %v2240_v30  ;;  %v1058_v33 = vpop.f32.mrf.mxu0 }
 0x147   : > { %1846 = vst [vmem:[%s2494_s21 + $0x3c0] sm:$0xff] %v1718_v31  ;;  %v1657_v34 = vsel %vm1401_vm5, %v2176_v27, %v1529_v29  ;;  %vm1399_vm7 = vcmp.gt.f32.partialorder %v1058_v33, 0.0  ;;  %v1527_v35 = vmul.f32 0.2, %v1058_v33  ;;  %v1314_v36 = vpop.f32.mrf.mxu1 }
 0x148   : > { %1785 = vst [vmem:[%s2494_s21 + $0x1d8] sm:$0xff] %v1657_v34  ;;  %v1721_v37 = vsel %vm1465_vm6, %v2240_v30, %v1593_v32  ;;  %vm1463_vm8 = vcmp.gt.f32.partialorder %v1314_v36, 0.0  ;;  %v1591_v38 = vmul.f32 0.2, %v1314_v36  ;;  %v2179_v39 = vpop.f32.mrf.mxu0 }
 0x149   : > { %1849 = vst [vmem:[%s2494_s21 + $0x3d8] sm:$0xff] %v1721_v37  ;;  %v1655_v40 = vsel %vm1399_vm7, %v1058_v33, %v1527_v35  ;;  %vm1404_vm9 = vcmp.gt.f32.partialorder %v2179_v39, 0.0  ;;  %v1532_v41 = vmul.f32 0.2, %v2179_v39  ;;  %v2243_v42 = vpop.f32.mrf.mxu1 }
 0x14a   : > { %1783 = vst [vmem:[%s2494_s21 + $0x1c8] sm:$0xff] %v1655_v40  ;;  %v1719_v43 = vsel %vm1463_vm8, %v1314_v36, %v1591_v38  ;;  %vm1468_vm10 = vcmp.gt.f32.partialorder %v2243_v42, 0.0  ;;  %v1596_v44 = vmul.f32 0.2, %v2243_v42  ;;  %v1071_v45 = vpop.f32.mrf.mxu0 }
 0x14b   : > { %1847 = vst [vmem:[%s2494_s21 + $0x3c8] sm:$0xff] %v1719_v43  ;;  %v1660_v46 = vsel %vm1404_vm9, %v2179_v39, %v1532_v41  ;;  %vm1402_vm11 = vcmp.gt.f32.partialorder %v1071_v45, 0.0  ;;  %v1530_v47 = vmul.f32 0.2, %v1071_v45  ;;  %v1327_v48 = vpop.f32.mrf.mxu1 }
 0x14c   : > { %1788 = vst [vmem:[%s2494_s21 + $0x1f0] sm:$0xff] %v1660_v46  ;;  %v1724_v49 = vsel %vm1468_vm10, %v2243_v42, %v1596_v44  ;;  %vm1466_vm12 = vcmp.gt.f32.partialorder %v1327_v48, 0.0  ;;  %v1594_v50 = vmul.f32 0.2, %v1327_v48  ;;  %v2180_v51 = vpop.f32.mrf.mxu0 }
 0x14d   : > { %1852 = vst [vmem:[%s2494_s21 + $0x3f0] sm:$0xff] %v1724_v49  ;;  %v1658_v52 = vsel %vm1402_vm11, %v1071_v45, %v1530_v47  ;;  %vm1405_vm13 = vcmp.gt.f32.partialorder %v2180_v51, 0.0  ;;  %v1533_v53 = vmul.f32 0.2, %v2180_v51  ;;  %v2244_v54 = vpop.f32.mrf.mxu1 }
 0x14e   : > { %1786 = vst [vmem:[%s2494_s21 + $0x1e0] sm:$0xff] %v1658_v52  ;;  %v1722_v55 = vsel %vm1466_vm12, %v1327_v48, %v1594_v50  ;;  %vm1469_vm14 = vcmp.gt.f32.partialorder %v2244_v54, 0.0  ;;  %v1597_v56 = vmul.f32 0.2, %v2244_v54  ;;  %v1074_v57 = vpop.f32.mrf.mxu0 }
 0x14f   : > { %1850 = vst [vmem:[%s2494_s21 + $0x3e0] sm:$0xff] %v1722_v55  ;;  %v1661_v58 = vsel %vm1405_vm13, %v2180_v51, %v1533_v53  ;;  %vm1403_vm15 = vcmp.gt.f32.partialorder %v1074_v57, 0.0  ;;  %v1531_v59 = vmul.f32 0.2, %v1074_v57  ;;  %v1330_v60 = vpop.f32.mrf.mxu1 }
 0x150   : > { %1789 = vst [vmem:[%s2494_s21 + $0x1f8] sm:$0xff] %v1661_v58  ;;  %v1725_v61 = vsel %vm1469_vm14, %v2244_v54, %v1597_v56  ;;  %vm1467_vm0 = vcmp.gt.f32.partialorder %v1330_v60, 0.0  ;;  %v1595_v62 = vmul.f32 0.2, %v1330_v60 }
 0x151   : > { %1853 = vst [vmem:[%s2494_s21 + $0x3f8] sm:$0xff] %v1725_v61  ;;  %v1659_v63 = vsel %vm1403_vm15, %v1074_v57, %v1531_v59 }
 0x152   : > { %1787 = vst [vmem:[%s2494_s21 + $0x1e8] sm:$0xff] %v1659_v63  ;;  %v1723_v0 = vsel %vm1467_vm0, %v1330_v60, %v1595_v62 }
 0x153   : > { %1851 = vst [vmem:[%s2494_s21 + $0x3e8] sm:$0xff] %v1723_v0 }
 0x154 PF: > { %s12_s9 = sadd.s32 1, %s2326_s9  }
 0x155   : > { %p9_p4 = scmp.ge.s32.totalorder %s12_s9, 4  }
 0x157   :  { %11 = sbr.rel (!%p9_p4) target bundleno = 1 (0x1), region = 58 }

// kernel: discriminator_forward.6
= control target key start
LH: loop header
LB: loop body
LE: loop exit
PB: predicated region body
PF: predicated region fallthrough
CT: control target
= control target key end

     0   :  { %s2125_s15 = smov 0   ;;  %s2127_s16 = smov 0   ;;  %s3322_s0 = inlined_call_operand.vmem [shape: bf16[512,128], index: 0, kind: input, shape index: {}]   ;;  %s3323_s1 = inlined_call_operand.vmem [shape: bf16[128,128], index: 1, kind: input, shape index: {}]   ;;  %s3324_s2 = inlined_call_operand.vmem [shape: f32[1,128], index: 2, kind: input, shape index: {}]   ;;  %s3325_s3 = inlined_call_operand.vmem [shape: f32[1,128], index: 3, kind: input, shape index: {}]   ;;  %s3326_s4 = inlined_call_operand.vmem [shape: f32[512,128], index: 4, kind: output, shape index: {}]  }
   0x1   :  { %s2129_s17 = smov 0  }
   0x2 LB: > { %s26_s18 = sadd.s32 1, %s2093_s16  ;;  %p1821_p0 = scmp.ge.s32.totalorder %s2097_s17, 1  ;;  %s2097_s17 = sphi %s2129_s17, %s14_s17   ;;  %s2093_s16 = sphi %s2127_s16, %s3439_s16   ;;  %s2089_s15 = sphi %s2125_s15, %s3438_s15  }
   0x3   : > { %p28_p1 = scmp.ge.s32.totalorder %s26_s18, 2  ;;  %p185_p2 = scmp.lt.s32.totalorder %s2097_s17, 3 }
   0x5   : > { %s3441_s18 = smov (%p28_p1, %s26_s18), 0  ;;  %p186_p3 = pnand %p1821_p0, %p185_p2 }
   0x6   : > { %p233_p4 = scmp.eq.s32.totalorder (!%p186_p3), %s2089_s15, 0 }
   0x7   : > { %189 = sbr.rel (%p186_p3) target bundleno = 548 (0x224), region = 36 }
   0xc   : > { %238 = sbr.rel (!%p233_p4) target bundleno = 17 (0x11), region = 40  ;;  %v2099_v0 = vmov (%p233_p4), 0.0  }
   0xd   : > { %239 = vst [vmem:[#allocation3] sm:$0x1] (%p233_p4), %v2099_v0  ;;  %240 = vst [vmem:[#allocation4] sm:$0x1] (%p233_p4), %v2099_v0 }
  0x11 PF: > { %p1823_p5 = scmp.ne.s32.totalorder %s2089_s15, 0 }
  0x13   : > { %243 = sbr.rel (%p1823_p5) target bundleno = 399 (0x18f), region = 44 }
  0x18   : > { %v2033_v1 = vld [vmem:[%s3323_s1 + $0x38] sm:$0xff]   ;;  %v2034_v2 = vld [vmem:[%s3323_s1 + $0x30] sm:$0xff]   ;;  %v2035_v3 = vld [vmem:[%s3323_s1 + $0x28] sm:$0xff]  }
  0x19   : > { %1912 = vmatprep.subr.bf16.mxu0 %v2033_v1  ;;  %1992 = vmatprep.subr.bf16.mxu1 %v2033_v1  ;;  %v2036_v4 = vld [vmem:[%s3323_s1 + $0x20] sm:$0xff]   ;;  %v2037_v6 = vld [vmem:[%s3323_s1 + $0x18] sm:$0xff]   ;;  %v2038_v7 = vld [vmem:[%s3323_s1 + $0x10] sm:$0xff]  }
  0x1a   : > { %1913 = vmatpush3.bf16.msra.mxu0 %v2033_v1  ;;  %2000 = vmatpush3.bf16.msra.mxu1 %v2033_v1  ;;  %v2041_v5 = vld [vmem:[%s3322_s0] sm:$0xff]   ;;  %v2039_v8 = vld [vmem:[%s3323_s1 + $0x8] sm:$0xff]   ;;  %v2043_v12 = vld [vmem:[%s3322_s0 + $0x10] sm:$0xff]  }
  0x1b   : > { %1914 = vmatprep.subr.bf16.mxu0 %v2034_v2  ;;  %1993 = vmatprep.subr.bf16.mxu1 %v2034_v2  ;;  %v2040_v9 = vld [vmem:[%s3323_s1] sm:$0xff]   ;;  %v2042_v11 = vld [vmem:[%s3322_s0 + $0x8] sm:$0xff]   ;;  %v2059_v14 = vld [vmem:[%s3322_s0 + $0x90] sm:$0xff]  }
  0x1c   : > { %1928 = vmatprep.mubr.bf16.mxu0 %v2041_v5  ;;  %v2057_v10 = vld [vmem:[%s3322_s0 + $0x80] sm:$0xff]   ;;  %v2058_v13 = vld [vmem:[%s3322_s0 + $0x88] sm:$0xff]   ;;  %v2044_v15 = vld [vmem:[%s3322_s0 + $0x18] sm:$0xff]  }
  0x1d   : > { %1960 = vmatprep.mubr.bf16.mxu1 %v2057_v10  ;;  %v2045_v16 = vld [vmem:[%s3322_s0 + $0x20] sm:$0xff]   ;;  %v2060_v17 = vld [vmem:[%s3322_s0 + $0x98] sm:$0xff]   ;;  %v2046_v19 = vld [vmem:[%s3322_s0 + $0x28] sm:$0xff]  }
  0x1e   : > { %1915 = vmatpush3.bf16.msra.mxu0 %v2034_v2  ;;  %2001 = vmatpush3.bf16.msra.mxu1 %v2034_v2  ;;  %v2061_v18 = vld [vmem:[%s3322_s0 + $0xa0] sm:$0xff]   ;;  %v2062_v20 = vld [vmem:[%s3322_s0 + $0xa8] sm:$0xff]   ;;  %v2047_v21 = vld [vmem:[%s3322_s0 + $0x30] sm:$0xff]  }
  0x1f   : > { %1916 = vmatprep.subr.bf16.mxu0 %v2035_v3  ;;  %1994 = vmatprep.subr.bf16.mxu1 %v2035_v3  ;;  %v2063_v22 = vld [vmem:[%s3322_s0 + $0xb0] sm:$0xff]   ;;  %v2048_v23 = vld [vmem:[%s3322_s0 + $0x38] sm:$0xff]   ;;  %v2049_v25 = vld [vmem:[%s3322_s0 + $0x40] sm:$0xff]  }
  0x20   : > { %v2064_v24 = vld [vmem:[%s3322_s0 + $0xb8] sm:$0xff]   ;;  %v2065_v26 = vld [vmem:[%s3322_s0 + $0xc0] sm:$0xff]   ;;  %v2050_v27 = vld [vmem:[%s3322_s0 + $0x48] sm:$0xff]  }
  0x21   : > { %v2066_v28 = vld [vmem:[%s3322_s0 + $0xc8] sm:$0xff]   ;;  %v2051_v29 = vld [vmem:[%s3322_s0 + $0x50] sm:$0xff]   ;;  %v2052_v31 = vld [vmem:[%s3322_s0 + $0x58] sm:$0xff]  }
  0x22   : > { %1917 = vmatpush3.bf16.msra.mxu0 %v2035_v3  ;;  %2002 = vmatpush3.bf16.msra.mxu1 %v2035_v3  ;;  %v2067_v30 = vld [vmem:[%s3322_s0 + $0xd0] sm:$0xff]   ;;  %v2068_v32 = vld [vmem:[%s3322_s0 + $0xd8] sm:$0xff]   ;;  %v2053_v33 = vld [vmem:[%s3322_s0 + $0x60] sm:$0xff]  }
  0x23   : > { %1918 = vmatprep.subr.bf16.mxu0 %v2036_v4  ;;  %1995 = vmatprep.subr.bf16.mxu1 %v2036_v4  ;;  %v2069_v34 = vld [vmem:[%s3322_s0 + $0xe0] sm:$0xff]   ;;  %v2054_v35 = vld [vmem:[%s3322_s0 + $0x68] sm:$0xff]   ;;  %v2055_v37 = vld [vmem:[%s3322_s0 + $0x70] sm:$0xff]  }
  0x24   : > { %v2070_v36 = vld [vmem:[%s3322_s0 + $0xe8] sm:$0xff]   ;;  %v2071_v38 = vld [vmem:[%s3322_s0 + $0xf0] sm:$0xff]   ;;  %v2056_v39 = vld [vmem:[%s3322_s0 + $0x78] sm:$0xff]  }
  0x25   : > { %v2072_v40 = vld [vmem:[%s3322_s0 + $0xf8] sm:$0xff]  }
  0x26   : > { %1919 = vmatpush3.bf16.msra.mxu0 %v2036_v4  ;;  %2003 = vmatpush3.bf16.msra.mxu1 %v2036_v4 }
  0x27   : > { %1920 = vmatprep.subr.bf16.mxu0 %v2037_v6  ;;  %1996 = vmatprep.subr.bf16.mxu1 %v2037_v6 }
  0x2a   : > { %1921 = vmatpush3.bf16.msra.mxu0 %v2037_v6  ;;  %2004 = vmatpush3.bf16.msra.mxu1 %v2037_v6 }
  0x2b   : > { %1922 = vmatprep.subr.bf16.mxu0 %v2038_v7  ;;  %1997 = vmatprep.subr.bf16.mxu1 %v2038_v7 }
  0x2e   : > { %1923 = vmatpush3.bf16.msra.mxu0 %v2038_v7  ;;  %2005 = vmatpush3.bf16.msra.mxu1 %v2038_v7 }
  0x2f   : > { %1924 = vmatprep.subr.bf16.mxu0 %v2039_v8  ;;  %1998 = vmatprep.subr.bf16.mxu1 %v2039_v8 }
  0x32   : > { %1925 = vmatpush3.bf16.msra.mxu0 %v2039_v8  ;;  %2006 = vmatpush3.bf16.msra.mxu1 %v2039_v8 }
  0x33   : > { %1926 = vmatprep.subr.bf16.mxu0 %v2040_v9  ;;  %1999 = vmatprep.subr.bf16.mxu1 %v2040_v9 }
  0x36   : > { %1927 = vmatpush3.bf16.msra.mxu0 %v2040_v9  ;;  %2007 = vmatpush3.bf16.msra.mxu1 %v2040_v9 }
  0x39   : > { %1929 = vmatmul.mubr.bf16.vlgmr.msra.gmra.mxu0 %v2042_v11  ;;  %1961 = vmatmul.mubr.bf16.vlgmr.msra.gmra.mxu1 %v2058_v13 }
  0x3a   : > { %1932 = vmatprep.mubr.bf16.mxu0 %v2043_v12  ;;  %1964 = vmatprep.mubr.bf16.mxu1 %v2059_v14 }
  0x41   : > { %1933 = vmatmul.mubr.bf16.gmra.mxu0 %v2044_v15  ;;  %1965 = vmatmul.mubr.bf16.gmra.mxu1 %v2060_v17 }
  0x42   : > { %1936 = vmatprep.mubr.bf16.mxu0 %v2045_v16  ;;  %1968 = vmatprep.mubr.bf16.mxu1 %v2061_v18 }
  0x49   : > { %1937 = vmatmul.mubr.bf16.gmra.mxu0 %v2046_v19  ;;  %1969 = vmatmul.mubr.bf16.gmra.mxu1 %v2062_v20 }
  0x4a   : > { %1940 = vmatprep.mubr.bf16.mxu0 %v2047_v21  ;;  %1972 = vmatprep.mubr.bf16.mxu1 %v2063_v22 }
  0x51   : > { %1941 = vmatmul.mubr.bf16.gmra.mxu0 %v2048_v23  ;;  %1973 = vmatmul.mubr.bf16.gmra.mxu1 %v2064_v24 }
  0x52   : > { %1944 = vmatprep.mubr.bf16.mxu0 %v2049_v25  ;;  %1976 = vmatprep.mubr.bf16.mxu1 %v2065_v26 }
  0x59   : > { %1945 = vmatmul.mubr.bf16.gmra.mxu0 %v2050_v27  ;;  %1977 = vmatmul.mubr.bf16.gmra.mxu1 %v2066_v28 }
  0x5a   : > { %1948 = vmatprep.mubr.bf16.mxu0 %v2051_v29  ;;  %1980 = vmatprep.mubr.bf16.mxu1 %v2067_v30 }
  0x61   : > { %1949 = vmatmul.mubr.bf16.gmra.mxu0 %v2052_v31  ;;  %1981 = vmatmul.mubr.bf16.gmra.mxu1 %v2068_v32 }
  0x62   : > { %1952 = vmatprep.mubr.bf16.mxu0 %v2053_v33  ;;  %1984 = vmatprep.mubr.bf16.mxu1 %v2069_v34 }
  0x69   : > { %1953 = vmatmul.mubr.bf16.gmra.mxu0 %v2054_v35  ;;  %1985 = vmatmul.mubr.bf16.gmra.mxu1 %v2070_v36 }
  0x6a   : > { %1956 = vmatprep.mubr.bf16.mxu0 %v2055_v37  ;;  %1988 = vmatprep.mubr.bf16.mxu1 %v2071_v38 }
  0x71   : > { %1957 = vmatmul.mubr.bf16.gmra.mxu0 %v2056_v39  ;;  %1989 = vmatmul.mubr.bf16.gmra.mxu1 %v2072_v40 }
  0xf9   : > { %v1930_v41 = vpop.f32.mrf.mxu0  ;;  %v2267_v42 = vpop.f32.mrf.mxu1 }
  0xfa   : > { %1065 = vst [vmem:[#allocation2 + $0xd8] sm:$0xff] %v1930_v41  ;;  %1097 = vst [vmem:[#allocation2 + $0x100] sm:$0xff] %v2267_v42  ;;  %v928_v54 = vmul.f32 %v1930_v41, %v1930_v41 }
  0xfb   : > { %v598_v43 = vpop.f32.mrf.mxu0  ;;  %v2270_v44 = vpop.f32.mrf.mxu1 }
  0xfc   : > { %1063 = vst [vmem:[#allocation2 + $0xb0] sm:$0xff] %v598_v43  ;;  %1095 = vst [vmem:[#allocation2 + $0x148] sm:$0xff] %v2270_v44  ;;  %v926_v49 = vmul.f32 %v598_v43, %v598_v43 }
  0xfd   : > { %v1931_v45 = vpop.f32.mrf.mxu0  ;;  %v2273_v46 = vpop.f32.mrf.mxu1 }
  0xfe   : > { %1066 = vst [vmem:[#allocation2 + $0x18] sm:$0xff] %v1931_v45  ;;  %1098 = vst [vmem:[#allocation2 + $0xc8] sm:$0xff] %v2273_v46  ;;  %v929_v59 = vmul.f32 %v1931_v45, %v1931_v45 }
  0xff   : > { %v601_v47 = vpop.f32.mrf.mxu0  ;;  %v2276_v48 = vpop.f32.mrf.mxu1 }
 0x100   : > { %v854_v50 = vadd.f32 %v601_v47, %v598_v43  ;;  %v927_v51 = vmul.f32 %v601_v47, %v601_v47  ;;  %1064 = vst [vmem:[#allocation2 + $0x1b0] sm:$0xff] %v601_v47  ;;  %1096 = vst [vmem:[#allocation2 + $0x1d0] sm:$0xff] %v2276_v48 }
 0x101   : > { %v1934_v52 = vpop.f32.mrf.mxu0  ;;  %v2279_v53 = vpop.f32.mrf.mxu1 }
 0x102   : > { %v855_v55 = vadd.f32 %v1930_v41, %v854_v50  ;;  %v990_v56 = vadd.f32 %v927_v51, %v926_v49  ;;  %1069 = vst [vmem:[#allocation2 + $0x130] sm:$0xff] %v1934_v52  ;;  %1101 = vst [vmem:[#allocation2 + $0x20] sm:$0xff] %v2279_v53  ;;  %v932_v10 = vmul.f32 %v1934_v52, %v1934_v52 }
 0x103   : > { %v614_v57 = vpop.f32.mrf.mxu0  ;;  %v2282_v58 = vpop.f32.mrf.mxu1 }
 0x104   : > { %v991_v60 = vadd.f32 %v990_v56, %v928_v54  ;;  %v856_v61 = vadd.f32 %v1931_v45, %v855_v55  ;;  %1067 = vst [vmem:[#allocation2 + $0x50] sm:$0xff] %v614_v57  ;;  %1099 = vst [vmem:[#allocation2 + $0x40] sm:$0xff] %v2282_v58  ;;  %v930_v1 = vmul.f32 %v614_v57, %v614_v57 }
 0x105   : > { %v1935_v62 = vpop.f32.mrf.mxu0  ;;  %v2285_v63 = vpop.f32.mrf.mxu1 }
 0x106   : > { %v857_v0 = vadd.f32 %v856_v61, %v614_v57  ;;  %v992_v2 = vadd.f32 %v991_v60, %v929_v59  ;;  %1070 = vst [vmem:[#allocation2 + $0x48] sm:$0xff] %v1935_v62  ;;  %1102 = vst [vmem:[#allocation2 + $0x128] sm:$0xff] %v2285_v63  ;;  %v933_v15 = vmul.f32 %v1935_v62, %v1935_v62 }
 0x107   : > { %v617_v3 = vpop.f32.mrf.mxu0  ;;  %v2288_v4 = vpop.f32.mrf.mxu1 }
 0x108   : > { %v993_v5 = vadd.f32 %v992_v2, %v930_v1  ;;  %v858_v6 = vadd.f32 %v857_v0, %v617_v3  ;;  %v931_v7 = vmul.f32 %v617_v3, %v617_v3  ;;  %1068 = vst [vmem:[#allocation2 + $0x168] sm:$0xff] %v617_v3  ;;  %1100 = vst [vmem:[#allocation2 + $0x1f8] sm:$0xff] %v2288_v4 }
 0x109   : > { %v1938_v8 = vpop.f32.mrf.mxu0  ;;  %v2291_v9 = vpop.f32.mrf.mxu1 }
 0x10a   : > { %v859_v11 = vadd.f32 %v1934_v52, %v858_v6  ;;  %v994_v12 = vadd.f32 %v993_v5, %v931_v7  ;;  %1073 = vst [vmem:[#allocation2 + $0x118] sm:$0xff] %v1938_v8  ;;  %1105 = vst [vmem:[#allocation2 + $0xe8] sm:$0xff] %v2291_v9  ;;  %v936_v30 = vmul.f32 %v1938_v8, %v1938_v8 }
 0x10b   : > { %v630_v13 = vpop.f32.mrf.mxu0  ;;  %v2294_v14 = vpop.f32.mrf.mxu1 }
 0x10c   : > { %v995_v16 = vadd.f32 %v994_v12, %v932_v10  ;;  %v860_v17 = vadd.f32 %v1935_v62, %v859_v11  ;;  %1071 = vst [vmem:[#allocation2 + $0x180] sm:$0xff] %v630_v13  ;;  %1103 = vst [vmem:[#allocation2 + $0x1a0] sm:$0xff] %v2294_v14  ;;  %v934_v21 = vmul.f32 %v630_v13, %v630_v13 }
 0x10d   : > { %v1939_v18 = vpop.f32.mrf.mxu0  ;;  %v2297_v19 = vpop.f32.mrf.mxu1 }
 0x10e   : > { %v861_v20 = vadd.f32 %v860_v17, %v630_v13  ;;  %v996_v22 = vadd.f32 %v995_v16, %v933_v15  ;;  %1074 = vst [vmem:[#allocation2 + $0x98] sm:$0xff] %v1939_v18  ;;  %1106 = vst [vmem:[#allocation2 + $0x78] sm:$0xff] %v2297_v19  ;;  %v937_v35 = vmul.f32 %v1939_v18, %v1939_v18 }
 0x10f   : > { %v633_v23 = vpop.f32.mrf.mxu0  ;;  %v2300_v24 = vpop.f32.mrf.mxu1 }
 0x110   : > { %v997_v25 = vadd.f32 %v996_v22, %v934_v21  ;;  %v862_v26 = vadd.f32 %v861_v20, %v633_v23  ;;  %v935_v27 = vmul.f32 %v633_v23, %v633_v23  ;;  %1072 = vst [vmem:[#allocation2 + $0x110] sm:$0xff] %v633_v23  ;;  %1104 = vst [vmem:[#allocation2 + $0x1f0] sm:$0xff] %v2300_v24 }
 0x111   : > { %v1942_v28 = vpop.f32.mrf.mxu0  ;;  %v2303_v29 = vpop.f32.mrf.mxu1 }
 0x112   : > { %v863_v31 = vadd.f32 %v1938_v8, %v862_v26  ;;  %v998_v32 = vadd.f32 %v997_v25, %v935_v27  ;;  %1077 = vst [vmem:[#allocation2 + $0x108] sm:$0xff] %v1942_v28  ;;  %1109 = vst [vmem:[#allocation2 + $0x1d8] sm:$0xff] %v2303_v29  ;;  %v940_v55 = vmul.f32 %v1942_v28, %v1942_v28 }
 0x113   : > { %v646_v33 = vpop.f32.mrf.mxu0  ;;  %v2306_v34 = vpop.f32.mrf.mxu1 }
 0x114   : > { %v999_v36 = vadd.f32 %v998_v32, %v936_v30  ;;  %v864_v37 = vadd.f32 %v1939_v18, %v863_v31  ;;  %1075 = vst [vmem:[#allocation2 + $0x120] sm:$0xff] %v646_v33  ;;  %1107 = vst [vmem:[#allocation2 + $0x70] sm:$0xff] %v2306_v34  ;;  %v938_v41 = vmul.f32 %v646_v33, %v646_v33 }
 0x115   : > { %v1943_v38 = vpop.f32.mrf.mxu0  ;;  %v2309_v39 = vpop.f32.mrf.mxu1 }
 0x116   : > { %v865_v40 = vadd.f32 %v864_v37, %v646_v33  ;;  %v1000_v43 = vadd.f32 %v999_v36, %v937_v35  ;;  %1078 = vst [vmem:[#allocation2 + $0x60] sm:$0xff] %v1943_v38  ;;  %1110 = vst [vmem:[#allocation2 + $0xd0] sm:$0xff] %v2309_v39  ;;  %v941_v61 = vmul.f32 %v1943_v38, %v1943_v38 }
 0x117   : > { %v649_v45 = vpop.f32.mrf.mxu0  ;;  %v2312_v47 = vpop.f32.mrf.mxu1 }
 0x118   : > { %v1001_v49 = vadd.f32 %v1000_v43, %v938_v41  ;;  %v866_v50 = vadd.f32 %v865_v40, %v649_v45  ;;  %v939_v51 = vmul.f32 %v649_v45, %v649_v45  ;;  %1076 = vst [vmem:[#allocation2 + $0x150] sm:$0xff] %v649_v45  ;;  %1108 = vst [vmem:[#allocation2 + $0x90] sm:$0xff] %v2312_v47 }
 0x119   : > { %v1946_v52 = vpop.f32.mrf.mxu0  ;;  %v2315_v54 = vpop.f32.mrf.mxu1 }
 0x11a   : > { %v867_v56 = vadd.f32 %v1942_v28, %v866_v50  ;;  %v1002_v57 = vadd.f32 %v1001_v49, %v939_v51  ;;  %1081 = vst [vmem:[#allocation2 + $0x138] sm:$0xff] %v1946_v52  ;;  %1113 = vst [vmem:[#allocation2 + $0xa8] sm:$0xff] %v2315_v54  ;;  %v944_v16 = vmul.f32 %v1946_v52, %v1946_v52 }
 0x11b   : > { %v662_v59 = vpop.f32.mrf.mxu0  ;;  %v2318_v60 = vpop.f32.mrf.mxu1 }
 0x11c   : > { %v1003_v62 = vadd.f32 %v1002_v57, %v940_v55  ;;  %v868_v0 = vadd.f32 %v1943_v38, %v867_v56  ;;  %1079 = vst [vmem:[#allocation2 + $0xe0] sm:$0xff] %v662_v59  ;;  %1111 = vst [vmem:[#allocation2 + $0xb8] sm:$0xff] %v2318_v60  ;;  %v942_v5 = vmul.f32 %v662_v59, %v662_v59 }
 0x11d   : > { %v1947_v1 = vpop.f32.mrf.mxu0  ;;  %v2321_v2 = vpop.f32.mrf.mxu1 }
 0x11e   : > { %v869_v3 = vadd.f32 %v868_v0, %v662_v59  ;;  %v1004_v6 = vadd.f32 %v1003_v62, %v941_v61  ;;  %1082 = vst [vmem:[#allocation2 + $0x140] sm:$0xff] %v1947_v1  ;;  %1114 = vst [vmem:[#allocation2 + $0x1c8] sm:$0xff] %v2321_v2  ;;  %v945_v22 = vmul.f32 %v1947_v1, %v1947_v1 }
 0x11f   : > { %v665_v7 = vpop.f32.mrf.mxu0  ;;  %v2324_v8 = vpop.f32.mrf.mxu1 }
 0x120   : > { %v1005_v10 = vadd.f32 %v1004_v6, %v942_v5  ;;  %v870_v11 = vadd.f32 %v869_v3, %v665_v7  ;;  %v943_v12 = vmul.f32 %v665_v7, %v665_v7  ;;  %1080 = vst [vmem:[#allocation2 + $0x188] sm:$0xff] %v665_v7  ;;  %1112 = vst [vmem:[#allocation2 + $0x88] sm:$0xff] %v2324_v8 }
 0x121   : > { %v1950_v13 = vpop.f32.mrf.mxu0  ;;  %v2327_v15 = vpop.f32.mrf.mxu1 }
 0x122   : > { %v871_v17 = vadd.f32 %v1946_v52, %v870_v11  ;;  %v1006_v18 = vadd.f32 %v1005_v10, %v943_v12  ;;  %1085 = vst [vmem:[#allocation2 + $0x1b8] sm:$0xff] %v1950_v13  ;;  %1117 = vst [vmem:[#allocation2 + $0x68] sm:$0xff] %v2327_v15  ;;  %v948_v41 = vmul.f32 %v1950_v13, %v1950_v13 }
 0x123   : > { %v678_v20 = vpop.f32.mrf.mxu0  ;;  %v2330_v21 = vpop.f32.mrf.mxu1 }
 0x124   : > { %v1007_v23 = vadd.f32 %v1006_v18, %v944_v16  ;;  %v872_v25 = vadd.f32 %v1947_v1, %v871_v17  ;;  %1083 = vst [vmem:[#allocation2 + $0x80] sm:$0xff] %v678_v20  ;;  %1115 = vst [vmem:[#allocation2 + $0x170] sm:$0xff] %v2330_v21  ;;  %v946_v30 = vmul.f32 %v678_v20, %v678_v20 }
 0x125   : > { %v1951_v26 = vpop.f32.mrf.mxu0  ;;  %v2333_v27 = vpop.f32.mrf.mxu1 }
 0x126   : > { %v873_v28 = vadd.f32 %v872_v25, %v678_v20  ;;  %v1008_v31 = vadd.f32 %v1007_v23, %v945_v22  ;;  %1086 = vst [vmem:[#allocation2 + $0x28] sm:$0xff] %v1951_v26  ;;  %1118 = vst [vmem:[#allocation2 + $0x190] sm:$0xff] %v2333_v27  ;;  %v949_v51 = vmul.f32 %v1951_v26, %v1951_v26 }
 0x127   : > { %v681_v32 = vpop.f32.mrf.mxu0  ;;  %v2336_v33 = vpop.f32.mrf.mxu1 }
 0x128   : > { %v1009_v35 = vadd.f32 %v1008_v31, %v946_v30  ;;  %v874_v36 = vadd.f32 %v873_v28, %v681_v32  ;;  %v947_v37 = vmul.f32 %v681_v32, %v681_v32  ;;  %1084 = vst [vmem:[#allocation2 + $0x1a8] sm:$0xff] %v681_v32  ;;  %1116 = vst [vmem:[#allocation2 + $0x178] sm:$0xff] %v2336_v33 }
 0x129   : > { %v1954_v38 = vpop.f32.mrf.mxu0  ;;  %v2339_v40 = vpop.f32.mrf.mxu1 }
 0x12a   : > { %v875_v43 = vadd.f32 %v1950_v13, %v874_v36  ;;  %v1010_v45 = vadd.f32 %v1009_v35, %v947_v37  ;;  %1089 = vst [vmem:[#allocation2 + $0x160] sm:$0xff] %v1954_v38  ;;  %1121 = vst [vmem:[#allocation2 + $0xc0] sm:$0xff] %v2339_v40  ;;  %v952_v11 = vmul.f32 %v1954_v38, %v1954_v38 }
 0x12b   : > { %v694_v49 = vpop.f32.mrf.mxu0  ;;  %v2342_v50 = vpop.f32.mrf.mxu1 }
 0x12c   : > { %v1011_v52 = vadd.f32 %v1010_v45, %v948_v41  ;;  %v876_v55 = vadd.f32 %v1951_v26, %v875_v43  ;;  %1087 = vst [vmem:[#allocation2 + $0x1e8] sm:$0xff] %v694_v49  ;;  %1119 = vst [vmem:[#allocation2 + $0x198] sm:$0xff] %v2342_v50  ;;  %v950_v61 = vmul.f32 %v694_v49, %v694_v49 }
 0x12d   : > { %v1955_v56 = vpop.f32.mrf.mxu0  ;;  %v2345_v57 = vpop.f32.mrf.mxu1 }
 0x12e   : > { %v877_v59 = vadd.f32 %v876_v55, %v694_v49  ;;  %v1012_v62 = vadd.f32 %v1011_v52, %v949_v51  ;;  %1090 = vst [vmem:[#allocation2 + $0x30] sm:$0xff] %v1955_v56  ;;  %1122 = vst [vmem:[#allocation2 + $0x1c0] sm:$0xff] %v2345_v57  ;;  %v953_v18 = vmul.f32 %v1955_v56, %v1955_v56 }
 0x12f   : > { %v697_v0 = vpop.f32.mrf.mxu0  ;;  %v2348_v1 = vpop.f32.mrf.mxu1  ;;  %v958_v52 = vmul.f32 %v2270_v44, %v2270_v44 }
 0x130   : > { %v1013_v3 = vadd.f32 %v1012_v62, %v950_v61  ;;  %v878_v5 = vadd.f32 %v877_v59, %v697_v0  ;;  %v951_v6 = vmul.f32 %v697_v0, %v697_v0  ;;  %1088 = vst [vmem:[#allocation2 + $0xf8] sm:$0xff] %v697_v0  ;;  %1120 = vst [vmem:[#allocation2 + $0x38] sm:$0xff] %v2348_v1 }
 0x131   : > { %v1958_v7 = vpop.f32.mrf.mxu0  ;;  %v2351_v10 = vpop.f32.mrf.mxu1  ;;  %v959_v61 = vmul.f32 %v2276_v48, %v2276_v48  ;;  %v960_v0 = vmul.f32 %v2267_v42, %v2267_v42 }
 0x132   : > { %v879_v12 = vadd.f32 %v1954_v38, %v878_v5  ;;  %v1014_v13 = vadd.f32 %v1013_v3, %v951_v6  ;;  %1093 = vst [vmem:[#allocation2 + $0xf0] sm:$0xff] %v1958_v7  ;;  %1125 = vst [vmem:[#allocation2 + $0x58] sm:$0xff] %v2351_v10  ;;  %v956_v38 = vmul.f32 %v1958_v7, %v1958_v7 }
 0x133   : > { %v710_v16 = vpop.f32.mrf.mxu0  ;;  %v2354_v17 = vpop.f32.mrf.mxu1  ;;  %v961_v6 = vmul.f32 %v2273_v46, %v2273_v46 }
 0x134   : > { %v1015_v20 = vadd.f32 %v1014_v13, %v952_v11  ;;  %v880_v22 = vadd.f32 %v1955_v56, %v879_v12  ;;  %1091 = vst [vmem:[#allocation2 + $0x1e0] sm:$0xff] %v710_v16  ;;  %1123 = vst [vmem:[#allocation2 + $0x158] sm:$0xff] %v2354_v17  ;;  %v954_v28 = vmul.f32 %v710_v16, %v710_v16 }
 0x135   : > { %v1959_v23 = vpop.f32.mrf.mxu0  ;;  %v2357_v25 = vpop.f32.mrf.mxu1  ;;  %v962_v12 = vmul.f32 %v2282_v58, %v2282_v58 }
 0x136   : > { %v881_v26 = vadd.f32 %v880_v22, %v710_v16  ;;  %v1016_v30 = vadd.f32 %v1015_v20, %v953_v18  ;;  %1094 = vst [vmem:[#allocation2 + $0x8] sm:$0xff] %v1959_v23  ;;  %1126 = vst [vmem:[#allocation2 + $0xa0] sm:$0xff] %v2357_v25  ;;  %v957_v45 = vmul.f32 %v1959_v23, %v1959_v23 }
 0x137   : > { %v713_v31 = vpop.f32.mrf.mxu0  ;;  %v2360_v32 = vpop.f32.mrf.mxu1  ;;  %v963_v18 = vmul.f32 %v2288_v4, %v2288_v4 }
 0x138   : > { %v1017_v35 = vadd.f32 %v1016_v30, %v954_v28  ;;  %v882_v36 = vadd.f32 %v881_v26, %v713_v31  ;;  %v955_v37 = vmul.f32 %v713_v31, %v713_v31  ;;  %1092 = vst [vmem:[#allocation2] sm:$0xff] %v713_v31  ;;  %1124 = vst [vmem:[#allocation2 + $0x10] sm:$0xff] %v2360_v32 }
 0x139   : > { %v966_v28 = vmul.f32 %v2294_v14, %v2294_v14 }
 0x13a   : > { %v883_v41 = vadd.f32 %v1958_v7, %v882_v36  ;;  %v1018_v43 = vadd.f32 %v1017_v35, %v955_v37  ;;  %v967_v35 = vmul.f32 %v2300_v24, %v2300_v24 }
 0x13c   : > { %v884_v49 = vadd.f32 %v1959_v23, %v883_v41  ;;  %v1019_v51 = vadd.f32 %v1018_v43, %v956_v38  ;;  %v970_v43 = vmul.f32 %v2306_v34, %v2306_v34 }
 0x13e   : > { %v1020_v55 = vadd.f32 %v1019_v51, %v957_v45  ;;  %v885_v56 = vadd.f32 %v884_v49, %v2270_v44  ;;  %v971_v51 = vmul.f32 %v2312_v47, %v2312_v47 }
 0x140   : > { %v886_v59 = vadd.f32 %v885_v56, %v2276_v48  ;;  %v1021_v62 = vadd.f32 %v1020_v55, %v958_v52 }
 0x142   : > { %v887_v3 = vadd.f32 %v2267_v42, %v886_v59  ;;  %v1022_v5 = vadd.f32 %v1021_v62, %v959_v61  ;;  %v964_v42 = vmul.f32 %v2279_v53, %v2279_v53  ;;  %v974_v61 = vmul.f32 %v2318_v60, %v2318_v60 }
 0x144   : > { %v1023_v7 = vadd.f32 %v1022_v5, %v960_v0  ;;  %v888_v11 = vadd.f32 %v2273_v46, %v887_v3  ;;  %v965_v46 = vmul.f32 %v2285_v63, %v2285_v63  ;;  %v975_v3 = vmul.f32 %v2324_v8, %v2324_v8 }
 0x146   : > { %v889_v44 = vadd.f32 %v888_v11, %v2282_v58  ;;  %v1024_v13 = vadd.f32 %v1023_v7, %v961_v6 }
 0x148   : > { %v1025_v48 = vadd.f32 %v1024_v13, %v962_v12  ;;  %v890_v16 = vadd.f32 %v889_v44, %v2288_v4  ;;  %v978_v44 = vmul.f32 %v2330_v21, %v2330_v21 }
 0x14a   : > { %v891_v20 = vadd.f32 %v2279_v53, %v890_v16  ;;  %v1026_v22 = vadd.f32 %v1025_v48, %v963_v18  ;;  %v968_v53 = vmul.f32 %v2291_v9, %v2291_v9  ;;  %v979_v48 = vmul.f32 %v2336_v33, %v2336_v33 }
 0x14c   : > { %v1027_v23 = vadd.f32 %v1026_v22, %v964_v42  ;;  %v892_v26 = vadd.f32 %v2285_v63, %v891_v20  ;;  %v969_v63 = vmul.f32 %v2297_v19, %v2297_v19  ;;  %v982_v22 = vmul.f32 %v2342_v50, %v2342_v50 }
 0x14e   : > { %v893_v58 = vadd.f32 %v892_v26, %v2294_v14  ;;  %v1028_v30 = vadd.f32 %v1027_v23, %v965_v46  ;;  %v983_v26 = vmul.f32 %v2348_v1, %v2348_v1 }
 0x150   : > { %v1029_v31 = vadd.f32 %v1028_v30, %v966_v28  ;;  %v894_v4 = vadd.f32 %v893_v58, %v2300_v24 }
 0x152   : > { %v895_v36 = vadd.f32 %v2291_v9, %v894_v4  ;;  %v1030_v37 = vadd.f32 %v1029_v31, %v967_v35  ;;  %v972_v9 = vmul.f32 %v2303_v29, %v2303_v29  ;;  %v986_v4 = vmul.f32 %v2354_v17, %v2354_v17 }
 0x154   : > { %v1031_v38 = vadd.f32 %v1030_v37, %v968_v53  ;;  %v896_v41 = vadd.f32 %v2297_v19, %v895_v36  ;;  %v973_v19 = vmul.f32 %v2309_v39, %v2309_v39  ;;  %v987_v36 = vmul.f32 %v2360_v32, %v2360_v32 }
 0x156   : > { %v897_v14 = vadd.f32 %v896_v41, %v2306_v34  ;;  %v1032_v45 = vadd.f32 %v1031_v38, %v969_v63 }
 0x158   : > { %v1033_v49 = vadd.f32 %v1032_v45, %v970_v43  ;;  %v898_v24 = vadd.f32 %v897_v14, %v2312_v47 }
 0x15a   : > { %v899_v52 = vadd.f32 %v2303_v29, %v898_v24  ;;  %v1034_v55 = vadd.f32 %v1033_v49, %v971_v51  ;;  %v976_v29 = vmul.f32 %v2315_v54, %v2315_v54 }
 0x15c   : > { %v1035_v56 = vadd.f32 %v1034_v55, %v972_v9  ;;  %v900_v59 = vadd.f32 %v2309_v39, %v899_v52  ;;  %v977_v39 = vmul.f32 %v2321_v2, %v2321_v2  ;;  %v853_v55 = vld [vmem:[#allocation3] sm:$0x1] }
 0x15e   : > { %v901_v34 = vadd.f32 %v900_v59, %v2318_v60  ;;  %v1036_v62 = vadd.f32 %v1035_v56, %v973_v19  ;;  %v925_v56 = vld [vmem:[#allocation4] sm:$0x1] }
 0x160   : > { %v1037_v0 = vadd.f32 %v1036_v62, %v974_v61  ;;  %v902_v47 = vadd.f32 %v901_v34, %v2324_v8 }
 0x162   : > { %v903_v5 = vadd.f32 %v2315_v54, %v902_v47  ;;  %v1038_v6 = vadd.f32 %v1037_v0, %v975_v3  ;;  %v980_v54 = vmul.f32 %v2327_v15, %v2327_v15 }
 0x164   : > { %v1039_v7 = vadd.f32 %v1038_v6, %v976_v29  ;;  %v904_v11 = vadd.f32 %v2321_v2, %v903_v5  ;;  %v981_v2 = vmul.f32 %v2333_v27, %v2333_v27 }
 0x166   : > { %v905_v60 = vadd.f32 %v904_v11, %v2330_v21  ;;  %v1040_v12 = vadd.f32 %v1039_v7, %v977_v39 }
 0x168   : > { %v1041_v13 = vadd.f32 %v1040_v12, %v978_v44  ;;  %v906_v8 = vadd.f32 %v905_v60, %v2336_v33 }
 0x16a   : > { %v907_v16 = vadd.f32 %v2327_v15, %v906_v8  ;;  %v1042_v18 = vadd.f32 %v1041_v13, %v979_v48  ;;  %v984_v15 = vmul.f32 %v2339_v40, %v2339_v40 }
 0x16c   : > { %v1043_v42 = vadd.f32 %v1042_v18, %v980_v54  ;;  %v908_v20 = vadd.f32 %v2333_v27, %v907_v16  ;;  %v985_v27 = vmul.f32 %v2345_v57, %v2345_v57 }
 0x16e   : > { %v909_v21 = vadd.f32 %v908_v20, %v2342_v50  ;;  %v1044_v46 = vadd.f32 %v1043_v42, %v981_v2 }
 0x170   : > { %v1045_v23 = vadd.f32 %v1044_v46, %v982_v22  ;;  %v910_v33 = vadd.f32 %v909_v21, %v2348_v1 }
 0x172   : > { %v911_v58 = vadd.f32 %v2339_v40, %v910_v33  ;;  %v1046_v28 = vadd.f32 %v1045_v23, %v983_v26  ;;  %v988_v40 = vmul.f32 %v2351_v10, %v2351_v10 }
 0x174   : > { %v1047_v30 = vadd.f32 %v1046_v28, %v984_v15  ;;  %v912_v31 = vadd.f32 %v2345_v57, %v911_v58  ;;  %v989_v57 = vmul.f32 %v2357_v25, %v2357_v25 }
 0x176   : > { %v913_v50 = vadd.f32 %v912_v31, %v2354_v17  ;;  %v1048_v35 = vadd.f32 %v1047_v30, %v985_v27 }
 0x178   : > { %v1049_v53 = vadd.f32 %v1048_v35, %v986_v4  ;;  %v914_v1 = vadd.f32 %v913_v50, %v2360_v32 }
 0x17a   : > { %v915_v37 = vadd.f32 %v2351_v10, %v914_v1  ;;  %v1050_v63 = vadd.f32 %v1049_v53, %v987_v36 }
 0x17c   : > { %v916_v38 = vadd.f32 %v2357_v25, %v915_v37  ;;  %v1051_v41 = vadd.f32 %v1050_v63, %v988_v40 }
 0x17e   : > { %v917_v17 = vrot.slane %v916_v38, 4  ;;  %v1052_v14 = vadd.f32 %v1051_v41, %v989_v57 }
 0x180   : > { %v918_v43 = vadd.f32 %v917_v17, %v916_v38  ;;  %v1053_v45 = vrot.slane %v1052_v14, 4 }
 0x182   : > { %v919_v49 = vrot.slane %v918_v43, 2  ;;  %v1054_v24 = vadd.f32 %v1053_v45, %v1052_v14 }
 0x184   : > { %v920_v51 = vadd.f32 %v919_v49, %v918_v43  ;;  %v1055_v32 = vrot.slane %v1054_v24, 2 }
 0x186   : > { %v921_v9 = vrot.slane %v920_v51, 1  ;;  %v1056_v52 = vadd.f32 %v1055_v32, %v1054_v24 }
 0x188   : > { %v922_v19 = vadd.f32 %v921_v9, %v920_v51  ;;  %v1057_v10 = vrot.slane %v1056_v52, 1 }
 0x18a   : > { %v923_v59 = vadd.f32 %v922_v19, %v853_v55  ;;  %v1058_v34 = vadd.f32 %v1057_v10, %v1056_v52 }
 0x18c   : > { %924 = vst [vmem:[#allocation3] sm:$0x1] %v923_v59  ;;  %v1059_v61 = vadd.f32 %v1058_v34, %v925_v56 }
 0x18e   : > { %1060 = vst [vmem:[#allocation4] sm:$0x1] %v1059_v61 }
 0x18f PF: > { %p1864_p6 = scmp.ne.s32.totalorder %s2089_s15, 1 }
 0x191   : > { %1130 = sbr.rel (%p1864_p6) target bundleno = 548 (0x224), region = 48 }
 0x196   : > { %v1131_v25 = vld [vmem:[#allocation3] sm:$0x1]  ;;  %v1133_v62 = vld [vmem:[#allocation4] sm:$0x1]  ;;  %v1205_v0 = vlaneseq  ;;  %v2463_v7 = vld [vmem:[#allocation2 + $0xb0] sm:$0xff] }
 0x197   : > { %v1132_v47 = vmul.f32 0.001953125, %v1131_v25  ;;  %v1134_v3 = vmul.f32 0.001953125, %v1133_v62  ;;  %v2465_v11 = vld [vmem:[#allocation2 + $0x1b0] sm:$0xff]  ;;  %v2471_v44 = vld [vmem:[#allocation2 + $0xd8] sm:$0xff]  ;;  %v2477_v48 = vld [vmem:[#allocation2 + $0x168] sm:$0xff] }
 0x198   : > { %v2460_v29 = vshrl.u32 %v1205_v0, 7  ;;  %v2473_v12 = vld [vmem:[#allocation2 + $0x18] sm:$0xff]  ;;  %v2475_v13 = vld [vmem:[#allocation2 + $0x50] sm:$0xff]  ;;  %v2481_v16 = vld [vmem:[#allocation2 + $0x48] sm:$0xff] }
 0x199   : > { %v1135_v5 = vmul.f32 %v1132_v47, %v1132_v47  ;;  %v2479_v54 = vld [vmem:[#allocation2 + $0x130] sm:$0xff]  ;;  %v2483_v18 = vld [vmem:[#allocation2 + $0x180] sm:$0xff]  ;;  %v2487_v42 = vld [vmem:[#allocation2 + $0x118] sm:$0xff] }
 0x19a   : > { %v3327_v6 = vsub.s32 0, %v2460_v29  ;;  %v2485_v2 = vld [vmem:[#allocation2 + $0x110] sm:$0xff]  ;;  %v2489_v20 = vld [vmem:[#allocation2 + $0x98] sm:$0xff]  ;;  %v2491_v21 = vld [vmem:[#allocation2 + $0x120] sm:$0xff]  ;;  %v3358_v35 = vsub.s32 0, %v2460_v29 }
 0x19b   : > { %v1136_v39 = vsub.f32 %v1134_v3, %v1135_v5  ;;  %v2493_v46 = vld [vmem:[#allocation2 + $0x150] sm:$0xff]  ;;  %v2495_v23 = vld [vmem:[#allocation2 + $0x108] sm:$0xff]  ;;  %v2497_v33 = vld [vmem:[#allocation2 + $0x60] sm:$0xff] }
 0x19c   : > { %v2469_v60 = vrot.slane %v1132_v47, %v3327_v6  ;;  %v2499_v26 = vld [vmem:[#allocation2 + $0xe0] sm:$0xff]  ;;  %v2505_v28 = vld [vmem:[#allocation2 + $0x188] sm:$0xff]  ;;  %v2507_v27 = vld [vmem:[#allocation2 + $0x138] sm:$0xff] }
 0x19d   : > { %v1137_v8 = vmax.f32 %v1136_v39, 0.0  ;;  %v2509_v30 = vld [vmem:[#allocation2 + $0x140] sm:$0xff]  ;;  %v2519_v53 = vld [vmem:[#allocation2 + $0x1a8] sm:$0xff]  ;;  %v2521_v1 = vld [vmem:[#allocation2 + $0x1b8] sm:$0xff] }
 0x19e   : > { %v2511_v31 = vld [vmem:[#allocation2 + $0x80] sm:$0xff]  ;;  %v2523_v36 = vld [vmem:[#allocation2 + $0x28] sm:$0xff]  ;;  %v2535_v41 = vld [vmem:[#allocation2 + $0xf8] sm:$0xff]  ;;  %v3361_v58 = vsub.f32 %v2471_v44, %v2469_v60  ;;  %v3364_v44 = vsub.f32 %v2477_v48, %v2469_v60 }
 0x19f   : > { %v1274_v22 = vadd.f32 1e-05, %v1137_v8  ;;  %v2525_v40 = vld [vmem:[#allocation2 + $0x1e8] sm:$0xff]  ;;  %v2537_v17 = vld [vmem:[#allocation2 + $0x160] sm:$0xff]  ;;  %v2539_v14 = vld [vmem:[#allocation2 + $0x30] sm:$0xff] }
 0x1a0   : > { %v2541_v43 = vld [vmem:[#allocation2 + $0x1e0] sm:$0xff]  ;;  %v2553_v9 = vld [vmem:[#allocation2 + $0xf0] sm:$0xff]  ;;  %v2555_v52 = vld [vmem:[#allocation2 + $0x8] sm:$0xff] }
 0x1a1   : > { %2073 = vrsqrt.f32 %v1274_v22  ;;  %v2551_v32 = vld [vmem:[#allocation2] sm:$0xff]  ;;  %v2557_v55 = vld [vmem:[#allocation2 + $0x148] sm:$0xff]  ;;  %v2567_v34 = vld [vmem:[#allocation2 + $0x1d0] sm:$0xff] }
 0x1a2   : > { %v2569_v61 = vld [vmem:[#allocation2 + $0x100] sm:$0xff]  ;;  %v2571_v25 = vld [vmem:[#allocation2 + $0xc8] sm:$0xff]  ;;  %v2583_v39 = vld [vmem:[#allocation2 + $0x1f8] sm:$0xff] }
 0x1a3   : > { %v2573_v62 = vld [vmem:[#allocation2 + $0x40] sm:$0xff]  ;;  %v2587_v22 = vld [vmem:[#allocation2 + $0x128] sm:$0xff]  ;;  %v2599_v5 = vld [vmem:[#allocation2 + $0x1f0] sm:$0xff] }
 0x1a4   : > { %v2585_v8 = vld [vmem:[#allocation2 + $0x20] sm:$0xff]  ;;  %v2601_v10 = vld [vmem:[#allocation2 + $0xe8] sm:$0xff]  ;;  %v2611_v51 = vld [vmem:[#allocation2 + $0x78] sm:$0xff] }
 0x1a5   : > { %v2597_v56 = vld [vmem:[#allocation2 + $0x1a0] sm:$0xff]  ;;  %3344 = vst [vmem:[#allocation6_spill] sm:$0xff] %v2601_v10  ;;  %3345 = vst [vmem:[#allocation7_spill] sm:$0xff] %v2611_v51  ;;  %v2613_v3 = vld [vmem:[#allocation2 + $0x70] sm:$0xff] }
 0x1a6   : > { %3343 = vst [vmem:[#allocation5_spill] sm:$0xff] %v2597_v56  ;;  %3346 = vst [vmem:[#allocation8_spill] sm:$0xff] %v2613_v3  ;;  %v2615_v24 = vld [vmem:[#allocation2 + $0x90] sm:$0xff]  ;;  %v2625_v45 = vld [vmem:[#allocation2 + $0x1d8] sm:$0xff] }
 0x1a7   : > { %3347 = vst [vmem:[#allocation9_spill] sm:$0xff] %v2615_v24  ;;  %3348 = vst [vmem:[#allocation10_spill] sm:$0xff] %v2625_v45  ;;  %v2627_v47 = vld [vmem:[#allocation2 + $0xd0] sm:$0xff]  ;;  %v2629_v38 = vld [vmem:[#allocation2 + $0xb8] sm:$0xff]  ;;  %v3359_v24 = vsub.f32 %v2463_v7, %v2469_v60 }
 0x1a8   : > { %3349 = vst [vmem:[#allocation11_spill] sm:$0xff] %v2627_v47  ;;  %3350 = vst [vmem:[#allocation12_spill] sm:$0xff] %v2629_v38  ;;  %v2639_v63 = vld [vmem:[#allocation2 + $0x88] sm:$0xff]  ;;  %v2653_v4 = vld [vmem:[#allocation2 + $0x170] sm:$0xff] }
 0x1a9   : > { %v2641_v0 = vld [vmem:[#allocation2 + $0xa8] sm:$0xff]  ;;  %3353 = vst [vmem:[#allocation15_spill] sm:$0xff] %v2653_v4  ;;  %v2655_v59 = vld [vmem:[#allocation2 + $0x178] sm:$0xff]  ;;  %v2667_v15 = vld [vmem:[#allocation2 + $0x190] sm:$0xff] }
 0x1aa   : > { %3351 = vst [vmem:[#allocation13_spill] sm:$0xff] %v2641_v0  ;;  %v2643_v37 = vld [vmem:[#allocation2 + $0x1c8] sm:$0xff]  ;;  %v2669_v19 = vld [vmem:[#allocation2 + $0x198] sm:$0xff]  ;;  %v2681_v51 = vld [vmem:[#allocation2 + $0xc0] sm:$0xff] }
 0x1ab   : > { %3352 = vst [vmem:[#allocation14_spill] sm:$0xff] %v2643_v37  ;;  %v2657_v50 = vld [vmem:[#allocation2 + $0x68] sm:$0xff]  ;;  %v2671_v6 = vld [vmem:[#allocation2 + $0x38] sm:$0xff]  ;;  %v2683_v49 = vld [vmem:[#allocation2 + $0x1c0] sm:$0xff]  ;;  %v3360_v37 = vsub.f32 %v2465_v11, %v2469_v60  ;;  %v3363_v11 = vsub.f32 %v2475_v13, %v2469_v60 }
 0x1ac   : > { %v2685_v3 = vld [vmem:[#allocation2 + $0x158] sm:$0xff]  ;;  %v2695_v47 = vld [vmem:[#allocation2 + $0x10] sm:$0xff]  ;;  %v2699_v38 = vld [vmem:[#allocation2 + $0xa0] sm:$0xff] }
 0x1ad   : > { %3354 = vst [vmem:[#allocation16_spill] sm:$0xff] %v2685_v3  ;;  %3355 = vst [vmem:[#allocation17_spill] sm:$0xff] %v2695_v47  ;;  %v2697_v57 = vld [vmem:[#allocation2 + $0x58] sm:$0xff]  ;;  %v2722_v56 = vld [vmem:[%s3324_s2] ss:$0 sm:$0xff] }
 0x1ae   : > { %3356 = vst [vmem:[#allocation18_spill] sm:$0xff] %v2697_v57  ;;  %3357 = vst [vmem:[#allocation19_spill] sm:$0xff] %v2699_v38  ;;  %v2074_v45 = vpop.eup %2073  ;;  %v2751_v7 = vld [vmem:[%s3325_s3] ss:$0 sm:$0xff] }
 0x1af   : > { %v2711_v4 = vrot.slane %v2074_v45, %v3358_v35  ;;  %v3362_v35 = vsub.f32 %v2473_v12, %v2469_v60  ;;  %v3365_v12 = vsub.f32 %v2479_v54, %v2469_v60 }
 0x1b1   : > { %v1282_v0 = vmul.f32 %v2711_v4, %v3359_v24  ;;  %v1283_v10 = vmul.f32 %v2711_v4, %v3360_v37  ;;  %v1284_v29 = vmul.f32 %v2711_v4, %v3361_v58  ;;  %v1285_v45 = vmul.f32 %v2711_v4, %v3362_v35 }
 0x1b2   : > { %v1286_v37 = vmul.f32 %v2711_v4, %v3363_v11  ;;  %v1287_v58 = vmul.f32 %v2711_v4, %v3364_v44  ;;  %v1288_v24 = vmul.f32 %v2711_v4, %v3365_v12  ;;  %v3366_v35 = vsub.f32 %v2481_v16, %v2469_v60 }
 0x1b3   : > { %v1353_v57 = vmul.f32 %v2722_v56, %v1282_v0  ;;  %v1354_v13 = vmul.f32 %v2722_v56, %v1283_v10  ;;  %v1355_v11 = vmul.f32 %v2722_v56, %v1284_v29  ;;  %v1356_v48 = vmul.f32 %v2722_v56, %v1285_v45 }
 0x1b4   : > { %v1289_v38 = vmul.f32 %v2711_v4, %v3366_v35  ;;  %v1357_v44 = vmul.f32 %v2722_v56, %v1286_v37  ;;  %v1358_v47 = vmul.f32 %v2722_v56, %v1287_v58  ;;  %v1359_v54 = vmul.f32 %v2722_v56, %v1288_v24 }
 0x1b5   : > { %v1424_v16 = vadd.f32 %v2751_v7, %v1353_v57  ;;  %v1425_v35 = vadd.f32 %v2751_v7, %v1354_v13  ;;  %v1426_v0 = vadd.f32 %v2751_v7, %v1355_v11  ;;  %v1427_v10 = vadd.f32 %v2751_v7, %v1356_v48 }
 0x1b6   : > { %v1360_v12 = vmul.f32 %v2722_v56, %v1289_v38  ;;  %v1428_v29 = vadd.f32 %v2751_v7, %v1357_v44  ;;  %v1429_v45 = vadd.f32 %v2751_v7, %v1358_v47  ;;  %v1430_v37 = vadd.f32 %v2751_v7, %v1359_v54 }
 0x1b7   : > { %vm1488_vm0 = vcmp.gt.f32.partialorder %v1424_v16, 0.0  ;;  %v1552_v24 = vmul.f32 0.2, %v1424_v16  ;;  %vm1489_vm1 = vcmp.gt.f32.partialorder %v1425_v35, 0.0  ;;  %v1553_v38 = vmul.f32 0.2, %v1425_v35 }
 0x1b8   : > { %v1431_v58 = vadd.f32 %v2751_v7, %v1360_v12  ;;  %vm1490_vm2 = vcmp.gt.f32.partialorder %v1426_v0, 0.0  ;;  %v1554_v57 = vmul.f32 0.2, %v1426_v0  ;;  %vm1491_vm3 = vcmp.gt.f32.partialorder %v1427_v10, 0.0 }
 0x1b9   : > { %v1555_v13 = vmul.f32 0.2, %v1427_v10  ;;  %v1616_v3 = vsel %vm1488_vm0, %v1424_v16, %v1552_v24  ;;  %v1617_v11 = vsel %vm1489_vm1, %v1425_v35, %v1553_v38  ;;  %vm1492_vm4 = vcmp.gt.f32.partialorder %v1428_v29, 0.0 }
 0x1ba   : > { %v1556_v48 = vmul.f32 0.2, %v1428_v29  ;;  %1680 = vst [vmem:[%s3326_s4] sm:$0xff] %v1616_v3  ;;  %1681 = vst [vmem:[%s3326_s4 + $0x8] sm:$0xff] %v1617_v11  ;;  %v1618_v47 = vsel %vm1490_vm2, %v1426_v0, %v1554_v57  ;;  %vm1493_vm5 = vcmp.gt.f32.partialorder %v1429_v45, 0.0  ;;  %v1557_v54 = vmul.f32 0.2, %v1429_v45 }
 0x1bb   : > { %v1619_v44 = vsel %vm1491_vm3, %v1427_v10, %v1555_v13  ;;  %1682 = vst [vmem:[%s3326_s4 + $0x10] sm:$0xff] %v1618_v47  ;;  %vm1494_vm6 = vcmp.gt.f32.partialorder %v1430_v37, 0.0  ;;  %v1558_v16 = vmul.f32 0.2, %v1430_v37  ;;  %vm1495_vm7 = vcmp.gt.f32.partialorder %v1431_v58, 0.0 }
 0x1bc   : > { %1683 = vst [vmem:[%s3326_s4 + $0x18] sm:$0xff] %v1619_v44  ;;  %v1620_v12 = vsel %vm1492_vm4, %v1428_v29, %v1556_v48  ;;  %v1621_v3 = vsel %vm1493_vm5, %v1429_v45, %v1557_v54  ;;  %v1559_v35 = vmul.f32 0.2, %v1431_v58  ;;  %v3367_v0 = vsub.f32 %v2483_v18, %v2469_v60 }
 0x1bd   : > { %1684 = vst [vmem:[%s3326_s4 + $0x20] sm:$0xff] %v1620_v12  ;;  %v3368_v24 = vsub.f32 %v2485_v2, %v2469_v60  ;;  %1685 = vst [vmem:[%s3326_s4 + $0x28] sm:$0xff] %v1621_v3  ;;  %v1622_v29 = vsel %vm1494_vm6, %v1430_v37, %v1558_v16  ;;  %v3369_v57 = vsub.f32 %v2487_v42, %v2469_v60 }
 0x1be   : > { %v1290_v10 = vmul.f32 %v2711_v4, %v3367_v0  ;;  %v3370_v18 = vsub.f32 %v2489_v20, %v2469_v60  ;;  %v3371_v2 = vsub.f32 %v2491_v21, %v2469_v60  ;;  %1686 = vst [vmem:[%s3326_s4 + $0x30] sm:$0xff] %v1622_v29  ;;  %v1623_v37 = vsel %vm1495_vm7, %v1431_v58, %v1559_v35 }
 0x1bf   : > { %v1291_v38 = vmul.f32 %v2711_v4, %v3368_v24  ;;  %v1292_v45 = vmul.f32 %v2711_v4, %v3369_v57  ;;  %v3372_v47 = vsub.f32 %v2493_v46, %v2469_v60  ;;  %1687 = vst [vmem:[%s3326_s4 + $0x38] sm:$0xff] %v1623_v37  ;;  %v3373_v58 = vsub.f32 %v2495_v23, %v2469_v60 }
 0x1c0   : > { %v1293_v13 = vmul.f32 %v2711_v4, %v3370_v18  ;;  %v1294_v11 = vmul.f32 %v2711_v4, %v3371_v2  ;;  %v1361_v48 = vmul.f32 %v2722_v56, %v1290_v10  ;;  %v3374_v35 = vsub.f32 %v2497_v33, %v2469_v60 }
 0x1c1   : > { %v1362_v42 = vmul.f32 %v2722_v56, %v1291_v38  ;;  %v1295_v20 = vmul.f32 %v2711_v4, %v3372_v47  ;;  %v1363_v21 = vmul.f32 %v2722_v56, %v1292_v45  ;;  %v1296_v12 = vmul.f32 %v2711_v4, %v3373_v58 }
 0x1c2   : > { %v1364_v44 = vmul.f32 %v2722_v56, %v1293_v13  ;;  %v1365_v54 = vmul.f32 %v2722_v56, %v1294_v11  ;;  %v1432_v16 = vadd.f32 %v2751_v7, %v1361_v48  ;;  %v1297_v0 = vmul.f32 %v2711_v4, %v3374_v35 }
 0x1c3   : > { %v1433_v46 = vadd.f32 %v2751_v7, %v1362_v42  ;;  %v1366_v3 = vmul.f32 %v2722_v56, %v1295_v20  ;;  %v1434_v10 = vadd.f32 %v2751_v7, %v1363_v21  ;;  %v1367_v23 = vmul.f32 %v2722_v56, %v1296_v12 }
 0x1c4   : > { %v1435_v24 = vadd.f32 %v2751_v7, %v1364_v44  ;;  %v1436_v38 = vadd.f32 %v2751_v7, %v1365_v54  ;;  %vm1496_vm8 = vcmp.gt.f32.partialorder %v1432_v16, 0.0  ;;  %v1560_v29 = vmul.f32 0.2, %v1432_v16 }
 0x1c5   : > { %vm1497_vm9 = vcmp.gt.f32.partialorder %v1433_v46, 0.0  ;;  %v1561_v57 = vmul.f32 0.2, %v1433_v46  ;;  %vm1498_vm10 = vcmp.gt.f32.partialorder %v1434_v10, 0.0  ;;  %v1562_v45 = vmul.f32 0.2, %v1434_v10 }
 0x1c6   : > { %vm1499_vm11 = vcmp.gt.f32.partialorder %v1435_v24, 0.0  ;;  %v1563_v18 = vmul.f32 0.2, %v1435_v24  ;;  %v1624_v13 = vsel %vm1496_vm8, %v1432_v16, %v1560_v29  ;;  %vm1500_vm12 = vcmp.gt.f32.partialorder %v1436_v38, 0.0 }
 0x1c7   : > { %v1625_v33 = vsel %vm1497_vm9, %v1433_v46, %v1561_v57  ;;  %v1564_v2 = vmul.f32 0.2, %v1436_v38  ;;  %1688 = vst [vmem:[%s3326_s4 + $0x40] sm:$0xff] %v1624_v13  ;;  %v1626_v11 = vsel %vm1498_vm10, %v1434_v10, %v1562_v45  ;;  %v1437_v48 = vadd.f32 %v2751_v7, %v1366_v3 }
 0x1c8   : > { %1689 = vst [vmem:[%s3326_s4 + $0x48] sm:$0xff] %v1625_v33  ;;  %v1627_v37 = vsel %vm1499_vm11, %v1435_v24, %v1563_v18  ;;  %v1438_v42 = vadd.f32 %v2751_v7, %v1367_v23  ;;  %1690 = vst [vmem:[%s3326_s4 + $0x50] sm:$0xff] %v1626_v11  ;;  %v1368_v20 = vmul.f32 %v2722_v56, %v1297_v0 }
 0x1c9   : > { %1691 = vst [vmem:[%s3326_s4 + $0x58] sm:$0xff] %v1627_v37  ;;  %v1628_v47 = vsel %vm1500_vm12, %v1436_v38, %v1564_v2  ;;  %v3375_v21 = vsub.f32 %v2499_v26, %v2469_v60  ;;  %v3376_v54 = vsub.f32 %v2505_v28, %v2469_v60  ;;  %vm1501_vm13 = vcmp.gt.f32.partialorder %v1437_v48, 0.0 }
 0x1ca   : > { %1692 = vst [vmem:[%s3326_s4 + $0x60] sm:$0xff] %v1628_v47  ;;  %v1565_v12 = vmul.f32 0.2, %v1437_v48  ;;  %vm1502_vm14 = vcmp.gt.f32.partialorder %v1438_v42, 0.0  ;;  %v1566_v16 = vmul.f32 0.2, %v1438_v42  ;;  %v1439_v46 = vadd.f32 %v2751_v7, %v1368_v20 }
 0x1cb   : > { %v1298_v44 = vmul.f32 %v2711_v4, %v3375_v21  ;;  %v1299_v58 = vmul.f32 %v2711_v4, %v3376_v54  ;;  %v3377_v35 = vsub.f32 %v2507_v27, %v2469_v60  ;;  %v3378_v24 = vsub.f32 %v2509_v30, %v2469_v60 }
 0x1cc   : > { %v1629_v0 = vsel %vm1501_vm13, %v1437_v48, %v1565_v12  ;;  %v1630_v10 = vsel %vm1502_vm14, %v1438_v42, %v1566_v16  ;;  %v3379_v23 = vsub.f32 %v2511_v31, %v2469_v60  ;;  %vm1503_vm15 = vcmp.gt.f32.partialorder %v1439_v46, 0.0 }
 0x1cd   : > { %v1369_v3 = vmul.f32 %v2722_v56, %v1298_v44  ;;  %v1370_v26 = vmul.f32 %v2722_v56, %v1299_v58  ;;  %v1300_v28 = vmul.f32 %v2711_v4, %v3377_v35  ;;  %v1301_v38 = vmul.f32 %v2711_v4, %v3378_v24  ;;  %1693 = vst [vmem:[%s3326_s4 + $0x68] sm:$0xff] %v1629_v0 }
 0x1ce   : > { %v1302_v29 = vmul.f32 %v2711_v4, %v3379_v23  ;;  %1694 = vst [vmem:[%s3326_s4 + $0x70] sm:$0xff] %v1630_v10  ;;  %v1567_v27 = vmul.f32 0.2, %v1439_v46  ;;  %v3380_v13 = vsub.f32 %v2519_v53, %v2469_v60  ;;  %v3381_v21 = vsub.f32 %v2521_v1, %v2469_v60 }
 0x1cf   : > { %v1440_v57 = vadd.f32 %v2751_v7, %v1369_v3  ;;  %v1441_v30 = vadd.f32 %v2751_v7, %v1370_v26  ;;  %v1371_v45 = vmul.f32 %v2722_v56, %v1300_v28  ;;  %v1372_v31 = vmul.f32 %v2722_v56, %v1301_v38 }
 0x1d0   : > { %v1373_v18 = vmul.f32 %v2722_v56, %v1302_v29  ;;  %v1303_v33 = vmul.f32 %v2711_v4, %v3380_v13  ;;  %v1631_v2 = vsel %vm1503_vm15, %v1439_v46, %v1567_v27  ;;  %v1304_v44 = vmul.f32 %v2711_v4, %v3381_v21 }
 0x1d1   : > { %vm1504_vm0 = vcmp.gt.f32.partialorder %v1440_v57, 0.0  ;;  %v1568_v11 = vmul.f32 0.2, %v1440_v57  ;;  %vm1505_vm1 = vcmp.gt.f32.partialorder %v1441_v30, 0.0  ;;  %1695 = vst [vmem:[%s3326_s4 + $0x78] sm:$0xff] %v1631_v2  ;;  %v1442_v48 = vadd.f32 %v2751_v7, %v1371_v45 }
 0x1d2   : > { %v1569_v37 = vmul.f32 0.2, %v1441_v30  ;;  %v1443_v42 = vadd.f32 %v2751_v7, %v1372_v31  ;;  %v1444_v47 = vadd.f32 %v2751_v7, %v1373_v18  ;;  %v1374_v53 = vmul.f32 %v2722_v56, %v1303_v33 }
 0x1d3   : > { %v1632_v20 = vsel %vm1504_vm0, %v1440_v57, %v1568_v11  ;;  %v3382_v54 = vsub.f32 %v2523_v36, %v2469_v60  ;;  %vm1506_vm2 = vcmp.gt.f32.partialorder %v1442_v48, 0.0  ;;  %v1570_v16 = vmul.f32 0.2, %v1442_v48 }
 0x1d4   : > { %1696 = vst [vmem:[%s3326_s4 + $0x80] sm:$0xff] %v1632_v20  ;;  %v1633_v12 = vsel %vm1505_vm1, %v1441_v30, %v1569_v37  ;;  %vm1507_vm3 = vcmp.gt.f32.partialorder %v1443_v42, 0.0  ;;  %v1571_v1 = vmul.f32 0.2, %v1443_v42  ;;  %vm1508_vm4 = vcmp.gt.f32.partialorder %v1444_v47, 0.0 }
 0x1d5   : > { %v1305_v58 = vmul.f32 %v2711_v4, %v3382_v54  ;;  %1697 = vst [vmem:[%s3326_s4 + $0x88] sm:$0xff] %v1633_v12  ;;  %v1572_v46 = vmul.f32 0.2, %v1444_v47  ;;  %v1445_v3 = vadd.f32 %v2751_v7, %v1374_v53  ;;  %v1634_v36 = vsel %vm1506_vm2, %v1442_v48, %v1570_v16 }
 0x1d6   : > { %v1375_v26 = vmul.f32 %v2722_v56, %v1304_v44  ;;  %v3383_v28 = vsub.f32 %v2525_v40, %v2469_v60  ;;  %1698 = vst [vmem:[%s3326_s4 + $0x90] sm:$0xff] %v1634_v36  ;;  %v1635_v10 = vsel %vm1507_vm3, %v1443_v42, %v1571_v1  ;;  %v3384_v27 = vsub.f32 %v2535_v41, %v2469_v60 }
 0x1d7   : > { %v1376_v35 = vmul.f32 %v2722_v56, %v1305_v58  ;;  %v1636_v24 = vsel %vm1508_vm4, %v1444_v47, %v1572_v46  ;;  %vm1509_vm5 = vcmp.gt.f32.partialorder %v1445_v3, 0.0  ;;  %v1573_v38 = vmul.f32 0.2, %v1445_v3  ;;  %1699 = vst [vmem:[%s3326_s4 + $0x98] sm:$0xff] %v1635_v10 }
 0x1d8   : > { %v1306_v0 = vmul.f32 %v2711_v4, %v3383_v28  ;;  %1700 = vst [vmem:[%s3326_s4 + $0xa0] sm:$0xff] %v1636_v24  ;;  %v1446_v40 = vadd.f32 %v2751_v7, %v1375_v26  ;;  %v1307_v57 = vmul.f32 %v2711_v4, %v3384_v27  ;;  %v3385_v45 = vsub.f32 %v2537_v17, %v2469_v60 }
 0x1d9   : > { %v1447_v23 = vadd.f32 %v2751_v7, %v1376_v35  ;;  %v1637_v30 = vsel %vm1509_vm5, %v1445_v3, %v1573_v38  ;;  %v3386_v18 = vsub.f32 %v2539_v14, %v2469_v60  ;;  %v3387_v33 = vsub.f32 %v2541_v43, %v2469_v60 }
 0x1da   : > { %v1377_v29 = vmul.f32 %v2722_v56, %v1306_v0  ;;  %v1308_v31 = vmul.f32 %v2711_v4, %v3385_v45  ;;  %1701 = vst [vmem:[%s3326_s4 + $0xa8] sm:$0xff] %v1637_v30  ;;  %vm1510_vm6 = vcmp.gt.f32.partialorder %v1446_v40, 0.0  ;;  %v1574_v41 = vmul.f32 0.2, %v1446_v40 }
 0x1db   : > { %v1309_v13 = vmul.f32 %v2711_v4, %v3386_v18  ;;  %v1310_v2 = vmul.f32 %v2711_v4, %v3387_v33  ;;  %vm1511_vm7 = vcmp.gt.f32.partialorder %v1447_v23, 0.0  ;;  %v1575_v17 = vmul.f32 0.2, %v1447_v23 }
 0x1dc   : > { %v1448_v11 = vadd.f32 %v2751_v7, %v1377_v29  ;;  %v1378_v37 = vmul.f32 %v2722_v56, %v1307_v57  ;;  %v1379_v14 = vmul.f32 %v2722_v56, %v1308_v31  ;;  %v1638_v42 = vsel %vm1510_vm6, %v1446_v40, %v1574_v41 }
 0x1dd   : > { %v1380_v48 = vmul.f32 %v2722_v56, %v1309_v13  ;;  %v1639_v43 = vsel %vm1511_vm7, %v1447_v23, %v1575_v17  ;;  %v1381_v47 = vmul.f32 %v2722_v56, %v1310_v2  ;;  %v3388_v20 = vsub.f32 %v2551_v32, %v2469_v60  ;;  %1702 = vst [vmem:[%s3326_s4 + $0xb0] sm:$0xff] %v1638_v42 }
 0x1de   : > { %1703 = vst [vmem:[%s3326_s4 + $0xb8] sm:$0xff] %v1639_v43  ;;  %vm1512_vm8 = vcmp.gt.f32.partialorder %v1448_v11, 0.0  ;;  %v1576_v21 = vmul.f32 0.2, %v1448_v11  ;;  %v1449_v44 = vadd.f32 %v2751_v7, %v1378_v37  ;;  %v1450_v54 = vadd.f32 %v2751_v7, %v1379_v14 }
 0x1df   : > { %v1311_v53 = vmul.f32 %v2711_v4, %v3388_v20  ;;  %v1451_v58 = vadd.f32 %v2751_v7, %v1380_v48  ;;  %v1452_v32 = vadd.f32 %v2751_v7, %v1381_v47  ;;  %v3389_v16 = vsub.f32 %v2553_v9, %v2469_v60 }
 0x1e0   : > { %v1640_v46 = vsel %vm1512_vm8, %v1448_v11, %v1576_v21  ;;  %vm1513_vm9 = vcmp.gt.f32.partialorder %v1449_v44, 0.0  ;;  %v1577_v3 = vmul.f32 0.2, %v1449_v44  ;;  %vm1514_vm10 = vcmp.gt.f32.partialorder %v1450_v54, 0.0 }
 0x1e1   : > { %v1382_v12 = vmul.f32 %v2722_v56, %v1311_v53  ;;  %v1312_v1 = vmul.f32 %v2711_v4, %v3389_v16  ;;  %1704 = vst [vmem:[%s3326_s4 + $0xc0] sm:$0xff] %v1640_v46  ;;  %v1578_v36 = vmul.f32 0.2, %v1450_v54  ;;  %vm1515_vm11 = vcmp.gt.f32.partialorder %v1451_v58, 0.0 }
 0x1e2   : > { %v1579_v26 = vmul.f32 0.2, %v1451_v58  ;;  %vm1516_vm12 = vcmp.gt.f32.partialorder %v1452_v32, 0.0  ;;  %v1641_v35 = vsel %vm1513_vm9, %v1449_v44, %v1577_v3  ;;  %v1580_v28 = vmul.f32 0.2, %v1452_v32 }
 0x1e3   : > { %v1453_v0 = vadd.f32 %v2751_v7, %v1382_v12  ;;  %v1383_v9 = vmul.f32 %v2722_v56, %v1312_v1  ;;  %1705 = vst [vmem:[%s3326_s4 + $0xc8] sm:$0xff] %v1641_v35  ;;  %v1642_v10 = vsel %vm1514_vm10, %v1450_v54, %v1578_v36  ;;  %v3390_v38 = vsub.f32 %v2555_v52, %v2469_v60 }
 0x1e4   : > { %v1643_v24 = vsel %vm1515_vm11, %v1451_v58, %v1579_v26  ;;  %v3391_v23 = vsub.f32 %v2557_v55, %v2469_v60  ;;  %1706 = vst [vmem:[%s3326_s4 + $0xd0] sm:$0xff] %v1642_v10  ;;  %v1644_v27 = vsel %vm1516_vm12, %v1452_v32, %v1580_v28  ;;  %v3392_v45 = vsub.f32 %v2567_v34, %v2469_v60 }
 0x1e5   : > { %v1313_v40 = vmul.f32 %v2711_v4, %v3390_v38  ;;  %1707 = vst [vmem:[%s3326_s4 + $0xd8] sm:$0xff] %v1643_v24  ;;  %vm1517_vm13 = vcmp.gt.f32.partialorder %v1453_v0, 0.0  ;;  %v1581_v57 = vmul.f32 0.2, %v1453_v0  ;;  %v1454_v52 = vadd.f32 %v2751_v7, %v1383_v9  ;;  %1708 = vst [vmem:[%s3326_s4 + $0xe0] sm:$0xff] %v1644_v27 }
 0x1e6   : > { %v1314_v29 = vmul.f32 %v2711_v4, %v3391_v23  ;;  %v1315_v31 = vmul.f32 %v2711_v4, %v3392_v45  ;;  %v3393_v18 = vsub.f32 %v2569_v61, %v2469_v60  ;;  %v3394_v41 = vsub.f32 %v2571_v25, %v2469_v60  ;;  %v3399_v23 = vld [vmem:[#allocation5_spill] sm:$0xff] }
 0x1e7   : > { %v1384_v55 = vmul.f32 %v2722_v56, %v1313_v40  ;;  %v1645_v33 = vsel %vm1517_vm13, %v1453_v0, %v1581_v57  ;;  %vm1518_vm14 = vcmp.gt.f32.partialorder %v1454_v52, 0.0  ;;  %v1582_v2 = vmul.f32 0.2, %v1454_v52 }
 0x1e8   : > { %v1385_v30 = vmul.f32 %v2722_v56, %v1314_v29  ;;  %v1316_v13 = vmul.f32 %v2711_v4, %v3393_v18  ;;  %v1317_v17 = vmul.f32 %v2711_v4, %v3394_v41  ;;  %1709 = vst [vmem:[%s3326_s4 + $0xe8] sm:$0xff] %v1645_v33  ;;  %v1386_v61 = vmul.f32 %v2722_v56, %v1315_v31  ;;  %v3404_v18 = vld [vmem:[#allocation7_spill] sm:$0xff] }
 0x1e9   : > { %v1455_v34 = vadd.f32 %v2751_v7, %v1384_v55  ;;  %v1646_v14 = vsel %vm1518_vm14, %v1454_v52, %v1582_v2  ;;  %v3395_v25 = vsub.f32 %v2573_v62, %v2469_v60  ;;  %v3396_v43 = vsub.f32 %v2583_v39, %v2469_v60 }
 0x1ea   : > { %v1456_v11 = vadd.f32 %v2751_v7, %v1385_v30  ;;  %v1387_v37 = vmul.f32 %v2722_v56, %v1316_v13  ;;  %v1388_v48 = vmul.f32 %v2722_v56, %v1317_v17  ;;  %1710 = vst [vmem:[%s3326_s4 + $0xf0] sm:$0xff] %v1646_v14  ;;  %v1457_v21 = vadd.f32 %v2751_v7, %v1386_v61  ;;  %v3402_v30 = vld [vmem:[#allocation6_spill] sm:$0xff] }
 0x1eb   : > { %v1318_v42 = vmul.f32 %v2711_v4, %v3395_v25  ;;  %v1319_v47 = vmul.f32 %v2711_v4, %v3396_v43  ;;  %vm1519_vm15 = vcmp.gt.f32.partialorder %v1455_v34, 0.0  ;;  %v1583_v20 = vmul.f32 0.2, %v1455_v34 }
 0x1ec   : > { %vm1520_vm0 = vcmp.gt.f32.partialorder %v1456_v11, 0.0  ;;  %v1584_v53 = vmul.f32 0.2, %v1456_v11  ;;  %v1458_v44 = vadd.f32 %v2751_v7, %v1387_v37  ;;  %v1459_v62 = vadd.f32 %v2751_v7, %v1388_v48  ;;  %v3406_v48 = vld [vmem:[#allocation8_spill] sm:$0xff] }
 0x1ed   : > { %v1389_v54 = vmul.f32 %v2722_v56, %v1318_v42  ;;  %v1647_v58 = vsel %vm1519_vm15, %v1455_v34, %v1583_v20  ;;  %v1390_v32 = vmul.f32 %v2722_v56, %v1319_v47  ;;  %v3397_v12 = vsub.f32 %v2585_v8, %v2469_v60 }
 0x1ee   : > { %v1648_v39 = vsel %vm1520_vm0, %v1456_v11, %v1584_v53  ;;  %1711 = vst [vmem:[%s3326_s4 + $0xf8] sm:$0xff] %v1647_v58  ;;  %vm1521_vm1 = vcmp.gt.f32.partialorder %v1457_v21, 0.0  ;;  %v1585_v1 = vmul.f32 0.2, %v1457_v21  ;;  %vm1522_vm2 = vcmp.gt.f32.partialorder %v1458_v44, 0.0 }
 0x1ef   : > { %v1320_v16 = vmul.f32 %v2711_v4, %v3397_v12  ;;  %1712 = vst [vmem:[%s3326_s4 + $0x100] sm:$0xff] %v1648_v39  ;;  %v1586_v46 = vmul.f32 0.2, %v1458_v44  ;;  %vm1523_vm3 = vcmp.gt.f32.partialorder %v1459_v62, 0.0  ;;  %v1587_v3 = vmul.f32 0.2, %v1459_v62 }
 0x1f0   : > { %v1460_v36 = vadd.f32 %v2751_v7, %v1389_v54  ;;  %v1461_v8 = vadd.f32 %v2751_v7, %v1390_v32  ;;  %v1649_v26 = vsel %vm1521_vm1, %v1457_v21, %v1585_v1  ;;  %v3398_v0 = vsub.f32 %v2587_v22, %v2469_v60  ;;  %v3410_v39 = vld [vmem:[#allocation10_spill] sm:$0xff] }
 0x1f1   : > { %v1650_v35 = vsel %vm1522_vm2, %v1458_v44, %v1586_v46  ;;  %v1391_v28 = vmul.f32 %v2722_v56, %v1320_v16  ;;  %1713 = vst [vmem:[%s3326_s4 + $0x108] sm:$0xff] %v1649_v26  ;;  %v1651_v10 = vsel %vm1523_vm3, %v1459_v62, %v1587_v3  ;;  %v3400_v29 = vsub.f32 %v3399_v23, %v2469_v60  ;;  %v3408_v62 = vld [vmem:[#allocation9_spill] sm:$0xff]  ;;  %v3414_v23 = vld [vmem:[#allocation12_spill] sm:$0xff] }
 0x1f2   : > { %v1321_v9 = vmul.f32 %v2711_v4, %v3398_v0  ;;  %1714 = vst [vmem:[%s3326_s4 + $0x110] sm:$0xff] %v1650_v35  ;;  %vm1524_vm4 = vcmp.gt.f32.partialorder %v1460_v36, 0.0  ;;  %v1588_v24 = vmul.f32 0.2, %v1460_v36  ;;  %vm1525_vm5 = vcmp.gt.f32.partialorder %v1461_v8, 0.0  ;;  %1715 = vst [vmem:[%s3326_s4 + $0x118] sm:$0xff] %v1651_v10 }
 0x1f3   : > { %v1589_v38 = vmul.f32 0.2, %v1461_v8  ;;  %v1462_v22 = vadd.f32 %v2751_v7, %v1391_v28  ;;  %v1322_v27 = vmul.f32 %v2711_v4, %v3400_v29  ;;  %v3401_v52 = vsub.f32 %v2599_v5, %v2469_v60  ;;  %v3412_v10 = vld [vmem:[#allocation11_spill] sm:$0xff] }
 0x1f4   : > { %v1392_v40 = vmul.f32 %v2722_v56, %v1321_v9  ;;  %v1652_v57 = vsel %vm1524_vm4, %v1460_v36, %v1588_v24  ;;  %v3403_v45 = vsub.f32 %v3402_v30, %v2469_v60  ;;  %v3405_v13 = vsub.f32 %v3404_v18, %v2469_v60 }
 0x1f5   : > { %v1323_v55 = vmul.f32 %v2711_v4, %v3401_v52  ;;  %1716 = vst [vmem:[%s3326_s4 + $0x120] sm:$0xff] %v1652_v57  ;;  %v1653_v2 = vsel %vm1525_vm5, %v1461_v8, %v1589_v38  ;;  %vm1526_vm6 = vcmp.gt.f32.partialorder %v1462_v22, 0.0  ;;  %v1590_v41 = vmul.f32 0.2, %v1462_v22 }
 0x1f6   : > { %v1324_v31 = vmul.f32 %v2711_v4, %v3403_v45  ;;  %v1325_v33 = vmul.f32 %v2711_v4, %v3405_v13  ;;  %v1463_v5 = vadd.f32 %v2751_v7, %v1392_v40  ;;  %1717 = vst [vmem:[%s3326_s4 + $0x128] sm:$0xff] %v1653_v2  ;;  %v1393_v17 = vmul.f32 %v2722_v56, %v1322_v27  ;;  %v3417_v45 = vld [vmem:[#allocation13_spill] sm:$0xff] }
 0x1f7   : > { %v1394_v34 = vmul.f32 %v2722_v56, %v1323_v55  ;;  %v1654_v37 = vsel %vm1526_vm6, %v1462_v22, %v1590_v41  ;;  %v3407_v25 = vsub.f32 %v3406_v48, %v2469_v60  ;;  %v3409_v54 = vsub.f32 %v3408_v62, %v2469_v60 }
 0x1f8   : > { %v1395_v11 = vmul.f32 %v2722_v56, %v1324_v31  ;;  %v1396_v61 = vmul.f32 %v2722_v56, %v1325_v33  ;;  %vm1527_vm7 = vcmp.gt.f32.partialorder %v1463_v5, 0.0  ;;  %v1591_v14 = vmul.f32 0.2, %v1463_v5  ;;  %1718 = vst [vmem:[%s3326_s4 + $0x130] sm:$0xff] %v1654_v37 }
 0x1f9   : > { %v1326_v42 = vmul.f32 %v2711_v4, %v3407_v25  ;;  %v1464_v43 = vadd.f32 %v2751_v7, %v1393_v17  ;;  %v1465_v47 = vadd.f32 %v2751_v7, %v1394_v34  ;;  %v1327_v58 = vmul.f32 %v2711_v4, %v3409_v54 }
 0x1fa   : > { %v1466_v20 = vadd.f32 %v2751_v7, %v1395_v11  ;;  %v1467_v53 = vadd.f32 %v2751_v7, %v1396_v61  ;;  %v1655_v21 = vsel %vm1527_vm7, %v1463_v5, %v1591_v14  ;;  %v3411_v32 = vsub.f32 %v3410_v39, %v2469_v60  ;;  %v3419_v61 = vld [vmem:[#allocation14_spill] sm:$0xff] }
 0x1fb   : > { %v1397_v44 = vmul.f32 %v2722_v56, %v1326_v42  ;;  %1719 = vst [vmem:[%s3326_s4 + $0x138] sm:$0xff] %v1655_v21  ;;  %vm1528_vm8 = vcmp.gt.f32.partialorder %v1464_v43, 0.0  ;;  %v1592_v16 = vmul.f32 0.2, %v1464_v43  ;;  %vm1529_vm9 = vcmp.gt.f32.partialorder %v1465_v47, 0.0 }
 0x1fc   : > { %v1328_v12 = vmul.f32 %v2711_v4, %v3411_v32  ;;  %v1593_v1 = vmul.f32 0.2, %v1465_v47  ;;  %vm1530_vm10 = vcmp.gt.f32.partialorder %v1466_v20, 0.0  ;;  %v1594_v46 = vmul.f32 0.2, %v1466_v20 }
 0x1fd   : > { %vm1531_vm11 = vcmp.gt.f32.partialorder %v1467_v53, 0.0  ;;  %v1595_v3 = vmul.f32 0.2, %v1467_v53  ;;  %v1656_v36 = vsel %vm1528_vm8, %v1464_v43, %v1592_v16  ;;  %v1468_v26 = vadd.f32 %v2751_v7, %v1397_v44  ;;  %v3421_v44 = vld [vmem:[#allocation15_spill] sm:$0xff] }
 0x1fe   : > { %v1657_v8 = vsel %vm1529_vm9, %v1465_v47, %v1593_v1  ;;  %v1398_v35 = vmul.f32 %v2722_v56, %v1327_v58  ;;  %1720 = vst [vmem:[%s3326_s4 + $0x140] sm:$0xff] %v1656_v36  ;;  %v1658_v28 = vsel %vm1530_vm10, %v1466_v20, %v1594_v46  ;;  %v1399_v9 = vmul.f32 %v2722_v56, %v1328_v12 }
 0x1ff   : > { %1721 = vst [vmem:[%s3326_s4 + $0x148] sm:$0xff] %v1657_v8  ;;  %v1659_v0 = vsel %vm1531_vm11, %v1467_v53, %v1595_v3  ;;  %v3413_v24 = vsub.f32 %v3412_v10, %v2469_v60  ;;  %1722 = vst [vmem:[%s3326_s4 + $0x150] sm:$0xff] %v1658_v28  ;;  %vm1532_vm12 = vcmp.gt.f32.partialorder %v1468_v26, 0.0  ;;  %v1596_v22 = vmul.f32 0.2, %v1468_v26 }
 0x200   : > { %1723 = vst [vmem:[%s3326_s4 + $0x158] sm:$0xff] %v1659_v0  ;;  %v1469_v40 = vadd.f32 %v2751_v7, %v1398_v35  ;;  %v3415_v29 = vsub.f32 %v3414_v23, %v2469_v60  ;;  %v1470_v57 = vadd.f32 %v2751_v7, %v1399_v9  ;;  %v3416_v55 = vsub.f32 %v2639_v63, %v2469_v60 }
 0x201   : > { %v1329_v38 = vmul.f32 %v2711_v4, %v3413_v24  ;;  %v3418_v31 = vsub.f32 %v3417_v45, %v2469_v60  ;;  %v1660_v13 = vsel %vm1532_vm12, %v1468_v26, %v1596_v22  ;;  %v3420_v37 = vsub.f32 %v3419_v61, %v2469_v60 }
 0x202   : > { %v1330_v27 = vmul.f32 %v2711_v4, %v3415_v29  ;;  %v1331_v30 = vmul.f32 %v2711_v4, %v3416_v55  ;;  %vm1533_vm13 = vcmp.gt.f32.partialorder %v1469_v40, 0.0  ;;  %v1597_v33 = vmul.f32 0.2, %v1469_v40  ;;  %1724 = vst [vmem:[%s3326_s4 + $0x160] sm:$0xff] %v1660_v13 }
 0x203   : > { %v1400_v52 = vmul.f32 %v2722_v56, %v1329_v38  ;;  %v1332_v18 = vmul.f32 %v2711_v4, %v3418_v31  ;;  %vm1534_vm14 = vcmp.gt.f32.partialorder %v1470_v57, 0.0  ;;  %v1598_v41 = vmul.f32 0.2, %v1470_v57 }
 0x204   : > { %v1401_v2 = vmul.f32 %v2722_v56, %v1330_v27  ;;  %v1402_v5 = vmul.f32 %v2722_v56, %v1331_v30  ;;  %v1661_v17 = vsel %vm1533_vm13, %v1469_v40, %v1597_v33  ;;  %v1333_v14 = vmul.f32 %v2711_v4, %v3420_v37 }
 0x205   : > { %v1471_v63 = vadd.f32 %v2751_v7, %v1400_v52  ;;  %v1403_v11 = vmul.f32 %v2722_v56, %v1332_v18  ;;  %1725 = vst [vmem:[%s3326_s4 + $0x168] sm:$0xff] %v1661_v17  ;;  %v1662_v48 = vsel %vm1534_vm14, %v1470_v57, %v1598_v41  ;;  %v3422_v62 = vsub.f32 %v3421_v44, %v2469_v60 }
 0x206   : > { %v1472_v34 = vadd.f32 %v2751_v7, %v1401_v2  ;;  %v1473_v42 = vadd.f32 %v2751_v7, %v1402_v5  ;;  %1726 = vst [vmem:[%s3326_s4 + $0x170] sm:$0xff] %v1662_v48  ;;  %v1404_v20 = vmul.f32 %v2722_v56, %v1333_v14  ;;  %v3423_v1 = vsub.f32 %v2655_v59, %v2469_v60  ;;  %v3430_v14 = vld [vmem:[#allocation16_spill] sm:$0xff] }
 0x207   : > { %vm1535_vm15 = vcmp.gt.f32.partialorder %v1471_v63, 0.0  ;;  %v1599_v25 = vmul.f32 0.2, %v1471_v63  ;;  %v1474_v47 = vadd.f32 %v2751_v7, %v1403_v11  ;;  %v1334_v54 = vmul.f32 %v2711_v4, %v3422_v62 }
 0x208   : > { %vm1536_vm0 = vcmp.gt.f32.partialorder %v1472_v34, 0.0  ;;  %v1600_v43 = vmul.f32 0.2, %v1472_v34  ;;  %vm1537_vm1 = vcmp.gt.f32.partialorder %v1473_v42, 0.0  ;;  %v1601_v21 = vmul.f32 0.2, %v1473_v42 }
 0x209   : > { %v1663_v53 = vsel %vm1535_vm15, %v1471_v63, %v1599_v25  ;;  %vm1538_vm2 = vcmp.gt.f32.partialorder %v1474_v47, 0.0  ;;  %v1602_v39 = vmul.f32 0.2, %v1474_v47  ;;  %v1475_v32 = vadd.f32 %v2751_v7, %v1404_v20 }
 0x20a   : > { %1727 = vst [vmem:[%s3326_s4 + $0x178] sm:$0xff] %v1663_v53  ;;  %v1664_v58 = vsel %vm1536_vm0, %v1472_v34, %v1600_v43  ;;  %v1665_v12 = vsel %vm1537_vm1, %v1473_v42, %v1601_v21  ;;  %v1405_v16 = vmul.f32 %v2722_v56, %v1334_v54  ;;  %v1335_v46 = vmul.f32 %v2711_v4, %v3423_v1  ;;  %v3432_v42 = vld [vmem:[#allocation17_spill] sm:$0xff]  ;;  %v3434_v21 = vld [vmem:[#allocation18_spill] sm:$0xff]  ;;  %v3436_v54 = vld [vmem:[#allocation19_spill] sm:$0xff] }
 0x20b   : > { %1728 = vst [vmem:[%s3326_s4 + $0x180] sm:$0xff] %v1664_v58  ;;  %v3424_v3 = vsub.f32 %v2657_v50, %v2469_v60  ;;  %1729 = vst [vmem:[%s3326_s4 + $0x188] sm:$0xff] %v1665_v12  ;;  %v1666_v8 = vsel %vm1538_vm2, %v1474_v47, %v1602_v39  ;;  %vm1539_vm3 = vcmp.gt.f32.partialorder %v1475_v32, 0.0  ;;  %v1603_v26 = vmul.f32 0.2, %v1475_v32 }
 0x20c   : > { %v3425_v35 = vsub.f32 %v2667_v15, %v2469_v60  ;;  %1730 = vst [vmem:[%s3326_s4 + $0x190] sm:$0xff] %v1666_v8  ;;  %v1476_v50 = vadd.f32 %v2751_v7, %v1405_v16  ;;  %v1406_v59 = vmul.f32 %v2722_v56, %v1335_v46  ;;  %v3426_v9 = vsub.f32 %v2669_v19, %v2469_v60 }
 0x20d   : > { %v1336_v36 = vmul.f32 %v2711_v4, %v3424_v3  ;;  %v1667_v24 = vsel %vm1539_vm3, %v1475_v32, %v1603_v26  ;;  %v3427_v38 = vsub.f32 %v2671_v6, %v2469_v60  ;;  %v3428_v40 = vsub.f32 %v2681_v51, %v2469_v60 }
 0x20e   : > { %v1337_v28 = vmul.f32 %v2711_v4, %v3425_v35  ;;  %v1338_v10 = vmul.f32 %v2711_v4, %v3426_v9  ;;  %1731 = vst [vmem:[%s3326_s4 + $0x198] sm:$0xff] %v1667_v24  ;;  %vm1540_vm4 = vcmp.gt.f32.partialorder %v1476_v50, 0.0  ;;  %v1604_v19 = vmul.f32 0.2, %v1476_v50 }
 0x20f   : > { %v1407_v0 = vmul.f32 %v2722_v56, %v1336_v36  ;;  %v1339_v22 = vmul.f32 %v2711_v4, %v3427_v38  ;;  %v1340_v23 = vmul.f32 %v2711_v4, %v3428_v40  ;;  %v1477_v29 = vadd.f32 %v2751_v7, %v1406_v59 }
 0x210   : > { %v1408_v15 = vmul.f32 %v2722_v56, %v1337_v28  ;;  %v1409_v6 = vmul.f32 %v2722_v56, %v1338_v10  ;;  %v1668_v55 = vsel %vm1540_vm4, %v1476_v50, %v1604_v19  ;;  %v3429_v41 = vsub.f32 %v2683_v49, %v2469_v60 }
 0x211   : > { %v1478_v27 = vadd.f32 %v2751_v7, %v1407_v0  ;;  %v1410_v52 = vmul.f32 %v2722_v56, %v1339_v22  ;;  %v1411_v51 = vmul.f32 %v2722_v56, %v1340_v23  ;;  %vm1541_vm5 = vcmp.gt.f32.partialorder %v1477_v29, 0.0  ;;  %1732 = vst [vmem:[%s3326_s4 + $0x1a0] sm:$0xff] %v1668_v55 }
 0x212   : > { %v1479_v57 = vadd.f32 %v2751_v7, %v1408_v15  ;;  %v1605_v30 = vmul.f32 0.2, %v1477_v29  ;;  %v1480_v18 = vadd.f32 %v2751_v7, %v1409_v6  ;;  %v1341_v63 = vmul.f32 %v2711_v4, %v3429_v41 }
 0x213   : > { %vm1542_vm6 = vcmp.gt.f32.partialorder %v1478_v27, 0.0  ;;  %v1606_v45 = vmul.f32 0.2, %v1478_v27  ;;  %v1481_v33 = vadd.f32 %v2751_v7, %v1410_v52  ;;  %v1482_v2 = vadd.f32 %v2751_v7, %v1411_v51 }
 0x214   : > { %vm1543_vm7 = vcmp.gt.f32.partialorder %v1479_v57, 0.0  ;;  %v1607_v31 = vmul.f32 0.2, %v1479_v57  ;;  %v1669_v13 = vsel %vm1541_vm5, %v1477_v29, %v1605_v30  ;;  %vm1544_vm8 = vcmp.gt.f32.partialorder %v1480_v18, 0.0 }
 0x215   : > { %1733 = vst [vmem:[%s3326_s4 + $0x1a8] sm:$0xff] %v1669_v13  ;;  %v1670_v5 = vsel %vm1542_vm6, %v1478_v27, %v1606_v45  ;;  %v1608_v34 = vmul.f32 0.2, %v1480_v18  ;;  %vm1545_vm9 = vcmp.gt.f32.partialorder %v1481_v33, 0.0  ;;  %v1609_v49 = vmul.f32 0.2, %v1481_v33 }
 0x216   : > { %v1671_v17 = vsel %vm1543_vm7, %v1479_v57, %v1607_v31  ;;  %1734 = vst [vmem:[%s3326_s4 + $0x1b0] sm:$0xff] %v1670_v5  ;;  %vm1546_vm10 = vcmp.gt.f32.partialorder %v1482_v2, 0.0  ;;  %v1610_v11 = vmul.f32 0.2, %v1482_v2  ;;  %v1412_v37 = vmul.f32 %v2722_v56, %v1341_v63 }
 0x217   : > { %1735 = vst [vmem:[%s3326_s4 + $0x1b8] sm:$0xff] %v1671_v17  ;;  %v1672_v61 = vsel %vm1544_vm8, %v1480_v18, %v1608_v34  ;;  %v3431_v48 = vsub.f32 %v3430_v14, %v2469_v60  ;;  %v3433_v43 = vsub.f32 %v3432_v42, %v2469_v60  ;;  %v1673_v20 = vsel %vm1545_vm9, %v1481_v33, %v1609_v49 }
 0x218   : > { %1736 = vst [vmem:[%s3326_s4 + $0x1c0] sm:$0xff] %v1672_v61  ;;  %v1674_v53 = vsel %vm1546_vm10, %v1482_v2, %v1610_v11  ;;  %v3435_v44 = vsub.f32 %v3434_v21, %v2469_v60  ;;  %v3437_v58 = vsub.f32 %v3436_v54, %v2469_v60  ;;  %1737 = vst [vmem:[%s3326_s4 + $0x1c8] sm:$0xff] %v1673_v20 }
 0x219   : > { %v1342_v25 = vmul.f32 %v2711_v4, %v3431_v48  ;;  %v1343_v47 = vmul.f32 %v2711_v4, %v3433_v43  ;;  %1738 = vst [vmem:[%s3326_s4 + $0x1d0] sm:$0xff] %v1674_v53  ;;  %v1483_v32 = vadd.f32 %v2751_v7, %v1412_v37 }
 0x21a   : > { %v1344_v62 = vmul.f32 %v2711_v4, %v3435_v44  ;;  %v1345_v39 = vmul.f32 %v2711_v4, %v3437_v58 }
 0x21b   : > { %v1413_v12 = vmul.f32 %v2722_v56, %v1342_v25  ;;  %v1414_v16 = vmul.f32 %v2722_v56, %v1343_v47  ;;  %vm1547_vm11 = vcmp.gt.f32.partialorder %v1483_v32, 0.0  ;;  %v1611_v4 = vmul.f32 0.2, %v1483_v32 }
 0x21c   : > { %v1415_v1 = vmul.f32 %v2722_v56, %v1344_v62  ;;  %v1416_v60 = vmul.f32 %v2722_v56, %v1345_v39 }
 0x21d   : > { %v1484_v46 = vadd.f32 %v2751_v7, %v1413_v12  ;;  %v1485_v3 = vadd.f32 %v2751_v7, %v1414_v16  ;;  %v1675_v26 = vsel %vm1547_vm11, %v1483_v32, %v1611_v4 }
 0x21e   : > { %v1486_v36 = vadd.f32 %v2751_v7, %v1415_v1  ;;  %v1487_v8 = vadd.f32 %v2751_v7, %v1416_v60  ;;  %1739 = vst [vmem:[%s3326_s4 + $0x1d8] sm:$0xff] %v1675_v26 }
 0x21f   : > { %vm1548_vm12 = vcmp.gt.f32.partialorder %v1484_v46, 0.0  ;;  %v1612_v35 = vmul.f32 0.2, %v1484_v46  ;;  %vm1549_vm13 = vcmp.gt.f32.partialorder %v1485_v3, 0.0  ;;  %v1613_v28 = vmul.f32 0.2, %v1485_v3 }
 0x220   : > { %vm1550_vm14 = vcmp.gt.f32.partialorder %v1486_v36, 0.0  ;;  %v1614_v56 = vmul.f32 0.2, %v1486_v36  ;;  %vm1551_vm15 = vcmp.gt.f32.partialorder %v1487_v8, 0.0  ;;  %v1615_v59 = vmul.f32 0.2, %v1487_v8 }
 0x221   : > { %v1676_v50 = vsel %vm1548_vm12, %v1484_v46, %v1612_v35  ;;  %v1677_v0 = vsel %vm1549_vm13, %v1485_v3, %v1613_v28 }
 0x222   : > { %1740 = vst [vmem:[%s3326_s4 + $0x1e0] sm:$0xff] %v1676_v50  ;;  %v1678_v7 = vsel %vm1550_vm14, %v1486_v36, %v1614_v56  ;;  %1741 = vst [vmem:[%s3326_s4 + $0x1e8] sm:$0xff] %v1677_v0  ;;  %v1679_v9 = vsel %vm1551_vm15, %v1487_v8, %v1615_v59 }
 0x223   : > { %1742 = vst [vmem:[%s3326_s4 + $0x1f0] sm:$0xff] %v1678_v7  ;;  %1743 = vst [vmem:[%s3326_s4 + $0x1f8] sm:$0xff] %v1679_v9 }
 0x224 PF: > { %s14_s17 = sadd.s32 1, %s2097_s17   ;;  %s3438_s15 = smov %s2093_s16 }
 0x225   : > { %p11_p7 = scmp.ge.s32.totalorder %s14_s17, 4   ;;  %s3439_s16 = smov %s3441_s18 }
 0x227   :  { %13 = sbr.rel (!%p11_p7) target bundleno = 2 (0x2), region = 80 }

// kernel: discriminator_forward.7
= control target key start
LH: loop header
LB: loop body
LE: loop exit
PB: predicated region body
PF: predicated region fallthrough
CT: control target
= control target key end

     0   :  { %s1152_s15 = smov 0   ;;  %s1154_s16 = smov 0   ;;  %s1469_s0 = inlined_call_operand.vmem [shape: bf16[128,256], index: 0, kind: input, shape index: {}]   ;;  %s1470_s1 = inlined_call_operand.vmem [shape: bf16[256,128], index: 1, kind: input, shape index: {}]   ;;  %s1471_s2 = inlined_call_operand.vmem [shape: f32[1,128], index: 2, kind: input, shape index: {}]   ;;  %s1472_s3 = inlined_call_operand.vmem [shape: f32[1,128], index: 3, kind: input, shape index: {}]   ;;  %s1473_s4 = inlined_call_operand.vmem [shape: f32[128,128], index: 4, kind: output, shape index: {}]  }
   0x1   :  { %s1156_s17 = smov 0  }
   0x2 LB: > { %s26_s18 = sadd.s32 1, %s1120_s16  ;;  %p912_p0 = scmp.ge.s32.totalorder %s1124_s17, 1  ;;  %s1124_s17 = sphi %s1156_s17, %s14_s17   ;;  %s1120_s16 = sphi %s1154_s16, %s1475_s16   ;;  %s1116_s15 = sphi %s1152_s15, %s1474_s15  }
   0x3   : > { %p28_p1 = scmp.ge.s32.totalorder %s26_s18, 2  ;;  %p186_p2 = scmp.lt.s32.totalorder %s1124_s17, 3 }
   0x5   : > { %s1477_s18 = smov (%p28_p1, %s26_s18), 0  ;;  %p187_p3 = pnand %p912_p0, %p186_p2 }
   0x6   : > { %p236_p4 = scmp.eq.s32.totalorder (!%p187_p3), %s1116_s15, 0 }
   0x7   : > { %190 = sbr.rel (%p187_p3) target bundleno = 380 (0x17c), region = 36 }
   0xc   : > { %241 = sbr.rel (!%p236_p4) target bundleno = 17 (0x11), region = 40  ;;  %v1126_v0 = vmov (%p236_p4), 0.0  }
   0xd   : > { %242 = vst [vmem:[#allocation3] sm:$0x1] (%p236_p4), %v1126_v0  ;;  %243 = vst [vmem:[#allocation4] sm:$0x1] (%p236_p4), %v1126_v0 }
  0x11 PF: > { %p914_p5 = scmp.ne.s32.totalorder %s1116_s15, 0 }
  0x13   : > { %246 = sbr.rel (%p914_p5) target bundleno = 317 (0x13d), region = 44 }
  0x18   : > { %v1060_v1 = vld [vmem:[%s1470_s1 + $0x78] sm:$0xff]   ;;  %v1062_v3 = vld [vmem:[%s1470_s1 + $0x70] sm:$0xff]   ;;  %v1064_v5 = vld [vmem:[%s1470_s1 + $0x68] sm:$0xff]  }
  0x19   : > { %v1061_v2 = vld [vmem:[%s1470_s1 + $0x38] sm:$0xff]   ;;  %955 = vmatprep.subr.bf16.mxu0 %v1060_v1  ;;  %1019 = vmatprep.subr.bf16.mxu1 %v1060_v1  ;;  %v1063_v4 = vld [vmem:[%s1470_s1 + $0x30] sm:$0xff]   ;;  %v1065_v6 = vld [vmem:[%s1470_s1 + $0x28] sm:$0xff]  }
  0x1a   : > { %956 = vmatpush3.bf16.msra.mxu0 %v1061_v2  ;;  %1027 = vmatpush3.bf16.msra.mxu1 %v1061_v2  ;;  %v1066_v7 = vld [vmem:[%s1470_s1 + $0x60] sm:$0xff]   ;;  %v1068_v9 = vld [vmem:[%s1470_s1 + $0x58] sm:$0xff]   ;;  %v1070_v11 = vld [vmem:[%s1470_s1 + $0x50] sm:$0xff]  }
  0x1b   : > { %957 = vmatprep.subr.bf16.mxu0 %v1062_v3  ;;  %1020 = vmatprep.subr.bf16.mxu1 %v1062_v3  ;;  %v1067_v8 = vld [vmem:[%s1470_s1 + $0x20] sm:$0xff]   ;;  %v1069_v10 = vld [vmem:[%s1470_s1 + $0x18] sm:$0xff]   ;;  %v1071_v13 = vld [vmem:[%s1470_s1 + $0x10] sm:$0xff]  }
  0x1c   : > { %v1078_v12 = vld [vmem:[%s1469_s0 + $0x4] ss:$8 sps:$4 sm:$0xff]   ;;  %v1076_v19 = vld [vmem:[%s1469_s0] ss:$8 sps:$4 sm:$0xff]   ;;  %v1079_v21 = vld [vmem:[%s1469_s0 + $0x14] ss:$8 sps:$4 sm:$0xff]  }
  0x1d   : > { %v1084_v14 = vld [vmem:[%s1469_s0 + $0x44] ss:$8 sps:$4 sm:$0xff]   ;;  %503 = vmatprep.mubr.bf16.mxu0 %v1078_v12  ;;  %v1082_v20 = vld [vmem:[%s1469_s0 + $0x40] ss:$8 sps:$4 sm:$0xff]   ;;  %v1088_v22 = vld [vmem:[%s1469_s0 + $0x54] ss:$8 sps:$4 sm:$0xff]  }
  0x1e   : > { %958 = vmatpush3.bf16.msra.mxu0 %v1063_v4  ;;  %1028 = vmatpush3.bf16.msra.mxu1 %v1063_v4  ;;  %v1072_v15 = vld [vmem:[%s1470_s1 + $0x48] sm:$0xff]   ;;  %v1074_v17 = vld [vmem:[%s1470_s1 + $0x40] sm:$0xff]   ;;  %v1081_v23 = vld [vmem:[%s1469_s0 + $0x10] ss:$8 sps:$4 sm:$0xff]  }
  0x1f   : > { %959 = vmatprep.subr.bf16.mxu0 %v1064_v5  ;;  %1021 = vmatprep.subr.bf16.mxu1 %v1064_v5  ;;  %v1073_v16 = vld [vmem:[%s1470_s1 + $0x8] sm:$0xff]   ;;  %v1075_v18 = vld [vmem:[%s1470_s1] sm:$0xff]   ;;  %v1090_v24 = vld [vmem:[%s1469_s0 + $0x50] ss:$8 sps:$4 sm:$0xff]  }
  0x20   : > { %535 = vmatprep.mubr.bf16.mxu1 %v1084_v14  ;;  %v1085_v25 = vld [vmem:[%s1469_s0 + $0x24] ss:$8 sps:$4 sm:$0xff]   ;;  %v1087_v27 = vld [vmem:[%s1469_s0 + $0x20] ss:$8 sps:$4 sm:$0xff]   ;;  %v1091_v29 = vld [vmem:[%s1469_s0 + $0x34] ss:$8 sps:$4 sm:$0xff]  }
  0x21   : > { %v1094_v26 = vld [vmem:[%s1469_s0 + $0x64] ss:$8 sps:$4 sm:$0xff]   ;;  %v1096_v28 = vld [vmem:[%s1469_s0 + $0x60] ss:$8 sps:$4 sm:$0xff]   ;;  %v1097_v30 = vld [vmem:[%s1469_s0 + $0x74] ss:$8 sps:$4 sm:$0xff]  }
  0x22   : > { %960 = vmatpush3.bf16.msra.mxu0 %v1065_v6  ;;  %1029 = vmatpush3.bf16.msra.mxu1 %v1065_v6  ;;  %v1093_v31 = vld [vmem:[%s1469_s0 + $0x30] ss:$8 sps:$4 sm:$0xff]  }
  0x23   : > { %961 = vmatprep.subr.bf16.mxu0 %v1066_v7  ;;  %1022 = vmatprep.subr.bf16.mxu1 %v1066_v7  ;;  %v1099_v32 = vld [vmem:[%s1469_s0 + $0x70] ss:$8 sps:$4 sm:$0xff]  }
  0x26   : > { %962 = vmatpush3.bf16.msra.mxu0 %v1067_v8  ;;  %1030 = vmatpush3.bf16.msra.mxu1 %v1067_v8 }
  0x27   : > { %963 = vmatprep.subr.bf16.mxu0 %v1068_v9  ;;  %1023 = vmatprep.subr.bf16.mxu1 %v1068_v9 }
  0x2a   : > { %964 = vmatpush3.bf16.msra.mxu0 %v1069_v10  ;;  %1031 = vmatpush3.bf16.msra.mxu1 %v1069_v10 }
  0x2b   : > { %965 = vmatprep.subr.bf16.mxu0 %v1070_v11  ;;  %1024 = vmatprep.subr.bf16.mxu1 %v1070_v11 }
  0x2e   : > { %966 = vmatpush3.bf16.msra.mxu0 %v1071_v13  ;;  %1032 = vmatpush3.bf16.msra.mxu1 %v1071_v13 }
  0x2f   : > { %967 = vmatprep.subr.bf16.mxu0 %v1072_v15  ;;  %1025 = vmatprep.subr.bf16.mxu1 %v1072_v15 }
  0x32   : > { %968 = vmatpush3.bf16.msra.mxu0 %v1073_v16  ;;  %1033 = vmatpush3.bf16.msra.mxu1 %v1073_v16 }
  0x33   : > { %969 = vmatprep.subr.bf16.mxu0 %v1074_v17  ;;  %1026 = vmatprep.subr.bf16.mxu1 %v1074_v17 }
  0x36   : > { %970 = vmatpush3.bf16.msra.mxu0 %v1075_v18  ;;  %1034 = vmatpush3.bf16.msra.mxu1 %v1075_v18 }
  0x39   : > { %504 = vmatmul.mubr.bf16.vlgmr.msra.gmra.mxu0 %v1076_v19  ;;  %536 = vmatmul.mubr.bf16.vlgmr.msra.gmra.mxu1 %v1082_v20 }
  0x3a   : > { %511 = vmatprep.mubr.bf16.mxu0 %v1079_v21  ;;  %543 = vmatprep.mubr.bf16.mxu1 %v1088_v22 }
  0x41   : > { %512 = vmatmul.mubr.bf16.gmra.mxu0 %v1081_v23  ;;  %544 = vmatmul.mubr.bf16.gmra.mxu1 %v1090_v24 }
  0x42   : > { %519 = vmatprep.mubr.bf16.mxu0 %v1085_v25  ;;  %551 = vmatprep.mubr.bf16.mxu1 %v1094_v26 }
  0x49   : > { %520 = vmatmul.mubr.bf16.gmra.mxu0 %v1087_v27  ;;  %552 = vmatmul.mubr.bf16.gmra.mxu1 %v1096_v28 }
  0x4a   : > { %527 = vmatprep.mubr.bf16.mxu0 %v1091_v29  ;;  %559 = vmatprep.mubr.bf16.mxu1 %v1097_v30 }
  0x51   : > { %528 = vmatmul.mubr.bf16.gmra.mxu0 %v1093_v31  ;;  %560 = vmatmul.mubr.bf16.gmra.mxu1 %v1099_v32 }
  0xf9   : > { %v971_v33 = vpop.f32.mrf.mxu0  ;;  %v995_v34 = vpop.f32.mrf.mxu1 }
  0xfb   : > { %v972_v35 = vpop.f32.mrf.mxu0  ;;  %v996_v36 = vpop.f32.mrf.mxu1 }
  0xfc   : > { %v973_v37 = vadd.f32 %v972_v35, %v971_v33  ;;  %v1270_v38 = vadd.f32 %v996_v36, %v995_v34 }
  0xfd   : > { %v974_v39 = vpop.f32.mrf.mxu0  ;;  %v998_v40 = vpop.f32.mrf.mxu1 }
  0xfe   : > { %634 = vst [vmem:[#allocation2 + $0x30] sm:$0xff] %v973_v37  ;;  %642 = vst [vmem:[#allocation2 + $0x40] sm:$0xff] %v1270_v38  ;;  %v593_v0 = vmul.f32 %v973_v37, %v973_v37 }
  0xff   : > { %v975_v41 = vpop.f32.mrf.mxu0  ;;  %v999_v42 = vpop.f32.mrf.mxu1 }
 0x100   : > { %v976_v43 = vadd.f32 %v975_v41, %v974_v39  ;;  %v1273_v44 = vadd.f32 %v999_v42, %v998_v40  ;;  %v601_v39 = vmul.f32 %v1270_v38, %v1270_v38 }
 0x101   : > { %v977_v45 = vpop.f32.mrf.mxu0  ;;  %v1001_v46 = vpop.f32.mrf.mxu1 }
 0x102   : > { %635 = vst [vmem:[#allocation2] sm:$0xff] %v976_v43  ;;  %643 = vst [vmem:[#allocation2 + $0x20] sm:$0xff] %v1273_v44  ;;  %v594_v59 = vmul.f32 %v976_v43, %v976_v43  ;;  %v569_v4 = vadd.f32 %v976_v43, %v973_v37  ;;  %v602_v42 = vmul.f32 %v1273_v44, %v1273_v44 }
 0x103   : > { %v978_v47 = vpop.f32.mrf.mxu0  ;;  %v1002_v48 = vpop.f32.mrf.mxu1 }
 0x104   : > { %v979_v49 = vadd.f32 %v978_v47, %v977_v45  ;;  %v1276_v50 = vadd.f32 %v1002_v48, %v1001_v46  ;;  %v609_v5 = vadd.f32 %v594_v59, %v593_v0 }
 0x105   : > { %v980_v51 = vpop.f32.mrf.mxu0  ;;  %v1004_v52 = vpop.f32.mrf.mxu1 }
 0x106   : > { %636 = vst [vmem:[#allocation2 + $0x58] sm:$0xff] %v979_v49  ;;  %644 = vst [vmem:[#allocation2 + $0x10] sm:$0xff] %v1276_v50  ;;  %v595_v1 = vmul.f32 %v979_v49, %v979_v49  ;;  %v570_v9 = vadd.f32 %v979_v49, %v569_v4  ;;  %v603_v46 = vmul.f32 %v1276_v50, %v1276_v50 }
 0x107   : > { %v981_v53 = vpop.f32.mrf.mxu0  ;;  %v1005_v54 = vpop.f32.mrf.mxu1 }
 0x108   : > { %v982_v55 = vadd.f32 %v981_v53, %v980_v51  ;;  %v1279_v56 = vadd.f32 %v1005_v54, %v1004_v52  ;;  %v610_v12 = vadd.f32 %v609_v5, %v595_v1 }
 0x109   : > { %v983_v57 = vpop.f32.mrf.mxu0  ;;  %v1007_v58 = vpop.f32.mrf.mxu1 }
 0x10a   : > { %637 = vst [vmem:[#allocation2 + $0x18] sm:$0xff] %v982_v55  ;;  %645 = vst [vmem:[#allocation2 + $0x38] sm:$0xff] %v1279_v56  ;;  %v596_v6 = vmul.f32 %v982_v55, %v982_v55  ;;  %v571_v15 = vadd.f32 %v982_v55, %v570_v9  ;;  %v604_v49 = vmul.f32 %v1279_v56, %v1279_v56 }
 0x10b   : > { %v984_v60 = vpop.f32.mrf.mxu0  ;;  %v1008_v61 = vpop.f32.mrf.mxu1 }
 0x10c   : > { %v985_v62 = vadd.f32 %v984_v60, %v983_v57  ;;  %v1009_v63 = vadd.f32 %v1008_v61, %v1007_v58  ;;  %v611_v17 = vadd.f32 %v610_v12, %v596_v6 }
 0x10d   : > { %v986_v2 = vpop.f32.mrf.mxu0  ;;  %v1010_v3 = vpop.f32.mrf.mxu1 }
 0x10e   : > { %638 = vst [vmem:[#allocation2 + $0x50] sm:$0xff] %v985_v62  ;;  %646 = vst [vmem:[#allocation2 + $0x60] sm:$0xff] %v1009_v63  ;;  %v597_v16 = vmul.f32 %v985_v62, %v985_v62  ;;  %v572_v20 = vadd.f32 %v985_v62, %v571_v15 }
 0x10f   : > { %v987_v7 = vpop.f32.mrf.mxu0  ;;  %v1011_v8 = vpop.f32.mrf.mxu1 }
 0x110   : > { %v988_v10 = vadd.f32 %v987_v7, %v986_v2  ;;  %v1012_v11 = vadd.f32 %v1011_v8, %v1010_v3  ;;  %v612_v26 = vadd.f32 %v611_v17, %v597_v16  ;;  %v568_v8 = vld [vmem:[#allocation3] sm:$0x1] }
 0x111   : > { %v989_v13 = vpop.f32.mrf.mxu0  ;;  %v1013_v14 = vpop.f32.mrf.mxu1 }
 0x112   : > { %639 = vst [vmem:[#allocation2 + $0x68] sm:$0xff] %v988_v10  ;;  %647 = vst [vmem:[#allocation2 + $0x70] sm:$0xff] %v1012_v11  ;;  %v598_v21 = vmul.f32 %v988_v10, %v988_v10  ;;  %v573_v27 = vadd.f32 %v988_v10, %v572_v20  ;;  %v606_v57 = vmul.f32 %v1012_v11, %v1012_v11 }
 0x113   : > { %v990_v18 = vpop.f32.mrf.mxu0  ;;  %v1014_v19 = vpop.f32.mrf.mxu1 }
 0x114   : > { %v991_v22 = vadd.f32 %v990_v18, %v989_v13  ;;  %v1015_v23 = vadd.f32 %v1014_v19, %v1013_v14  ;;  %v613_v31 = vadd.f32 %v612_v26, %v598_v21 }
 0x115   : > { %v992_v24 = vpop.f32.mrf.mxu0  ;;  %v1016_v25 = vpop.f32.mrf.mxu1 }
 0x116   : > { %v599_v28 = vmul.f32 %v991_v22, %v991_v22  ;;  %640 = vst [vmem:[#allocation2 + $0x8] sm:$0xff] %v991_v22  ;;  %648 = vst [vmem:[#allocation2 + $0x78] sm:$0xff] %v1015_v23  ;;  %v574_v32 = vadd.f32 %v991_v22, %v573_v27  ;;  %v607_v60 = vmul.f32 %v1015_v23, %v1015_v23 }
 0x117   : > { %v993_v29 = vpop.f32.mrf.mxu0  ;;  %v1017_v30 = vpop.f32.mrf.mxu1 }
 0x118   : > { %v994_v33 = vadd.f32 %v993_v29, %v992_v24  ;;  %v1018_v34 = vadd.f32 %v1017_v30, %v1016_v25  ;;  %v614_v35 = vadd.f32 %v613_v31, %v599_v28 }
 0x11a   : > { %v575_v36 = vadd.f32 %v994_v33, %v574_v32  ;;  %v600_v37 = vmul.f32 %v994_v33, %v994_v33  ;;  %641 = vst [vmem:[#allocation2 + $0x48] sm:$0xff] %v994_v33  ;;  %649 = vst [vmem:[#allocation2 + $0x28] sm:$0xff] %v1018_v34  ;;  %v608_v0 = vmul.f32 %v1018_v34, %v1018_v34 }
 0x11c   : > { %v576_v40 = vadd.f32 %v1270_v38, %v575_v36  ;;  %v615_v41 = vadd.f32 %v614_v35, %v600_v37  ;;  %v605_v38 = vmul.f32 %v1009_v63, %v1009_v63 }
 0x11e   : > { %v577_v43 = vadd.f32 %v1273_v44, %v576_v40  ;;  %v616_v45 = vadd.f32 %v615_v41, %v601_v39 }
 0x120   : > { %v617_v47 = vadd.f32 %v616_v45, %v602_v42  ;;  %v578_v48 = vadd.f32 %v1276_v50, %v577_v43 }
 0x122   : > { %v579_v51 = vadd.f32 %v1279_v56, %v578_v48  ;;  %v618_v52 = vadd.f32 %v617_v47, %v603_v46 }
 0x124   : > { %v580_v53 = vadd.f32 %v1009_v63, %v579_v51  ;;  %v619_v54 = vadd.f32 %v618_v52, %v604_v49 }
 0x126   : > { %v581_v55 = vadd.f32 %v1012_v11, %v580_v53  ;;  %v620_v58 = vadd.f32 %v619_v54, %v605_v38  ;;  %v592_v11 = vld [vmem:[#allocation4] sm:$0x1] }
 0x128   : > { %v621_v44 = vadd.f32 %v620_v58, %v606_v57  ;;  %v582_v59 = vadd.f32 %v1015_v23, %v581_v55 }
 0x12a   : > { %v622_v61 = vadd.f32 %v621_v44, %v607_v60  ;;  %v583_v62 = vadd.f32 %v1018_v34, %v582_v59 }
 0x12c   : > { %v584_v1 = vrot.slane %v583_v62, 4  ;;  %v623_v50 = vadd.f32 %v622_v61, %v608_v0 }
 0x12e   : > { %v585_v2 = vadd.f32 %v584_v1, %v583_v62  ;;  %v624_v3 = vrot.slane %v623_v50, 4 }
 0x130   : > { %v586_v4 = vrot.slane %v585_v2, 2  ;;  %v625_v5 = vadd.f32 %v624_v3, %v623_v50 }
 0x132   : > { %v587_v56 = vadd.f32 %v586_v4, %v585_v2  ;;  %v626_v6 = vrot.slane %v625_v5, 2 }
 0x134   : > { %v588_v7 = vrot.slane %v587_v56, 1  ;;  %v627_v63 = vadd.f32 %v626_v6, %v625_v5 }
 0x136   : > { %v589_v9 = vadd.f32 %v588_v7, %v587_v56  ;;  %v628_v10 = vrot.slane %v627_v63, 1 }
 0x138   : > { %v590_v12 = vadd.f32 %v589_v9, %v568_v8  ;;  %v629_v13 = vadd.f32 %v628_v10, %v627_v63 }
 0x13a   : > { %591 = vst [vmem:[#allocation3] sm:$0x1] %v590_v12  ;;  %v630_v14 = vadd.f32 %v629_v13, %v592_v11 }
 0x13c   : > { %631 = vst [vmem:[#allocation4] sm:$0x1] %v630_v14 }
 0x13d PF: > { %p947_p6 = scmp.ne.s32.totalorder %s1116_s15, 1 }
 0x13f   : > { %653 = sbr.rel (%p947_p6) target bundleno = 380 (0x17c), region = 48 }
 0x144   : > { %v654_v15 = vld [vmem:[#allocation3] sm:$0x1]  ;;  %v656_v16 = vld [vmem:[#allocation4] sm:$0x1]  ;;  %v680_v21 = vlaneseq  ;;  %v663_v26 = vld [vmem:[#allocation2 + $0x30] sm:$0xff] }
 0x145   : > { %v655_v17 = vmul.f32 0.0078125, %v654_v15  ;;  %v657_v18 = vmul.f32 0.0078125, %v656_v16  ;;  %v664_v28 = vld [vmem:[#allocation2] sm:$0xff]  ;;  %v665_v29 = vld [vmem:[#allocation2 + $0x58] sm:$0xff]  ;;  %v667_v31 = vld [vmem:[#allocation2 + $0x50] sm:$0xff] }
 0x146   : > { %v681_v24 = vshrl.u32 %v680_v21, 7  ;;  %v666_v30 = vld [vmem:[#allocation2 + $0x18] sm:$0xff]  ;;  %v668_v32 = vld [vmem:[#allocation2 + $0x68] sm:$0xff]  ;;  %v1297_v35 = vld [vmem:[#allocation2 + $0x40] sm:$0xff] }
 0x147   : > { %v658_v19 = vmul.f32 %v655_v17, %v655_v17  ;;  %v669_v33 = vld [vmem:[#allocation2 + $0x8] sm:$0xff]  ;;  %v1299_v36 = vld [vmem:[#allocation2 + $0x20] sm:$0xff]  ;;  %v1302_v39 = vld [vmem:[#allocation2 + $0x10] sm:$0xff] }
 0x148   : > { %v682_v25 = vsub.s32 0, %v681_v24  ;;  %v670_v34 = vld [vmem:[#allocation2 + $0x48] sm:$0xff]  ;;  %v1304_v40 = vld [vmem:[#allocation2 + $0x38] sm:$0xff]  ;;  %v1306_v41 = vld [vmem:[#allocation2 + $0x60] sm:$0xff] }
 0x149   : > { %v659_v20 = vsub.f32 %v657_v18, %v658_v19  ;;  %v1312_v47 = vld [vmem:[#allocation2 + $0x70] sm:$0xff]  ;;  %v1314_v48 = vld [vmem:[#allocation2 + $0x78] sm:$0xff]  ;;  %v1316_v49 = vld [vmem:[#allocation2 + $0x28] sm:$0xff] }
 0x14a   : > { %v1295_v27 = vrot.slane %v655_v17, %v682_v25  ;;  %v1334_v59 = vld [vmem:[%s1471_s2] ss:$0 sm:$0xff] }
 0x14b   : > { %v660_v22 = vmax.f32 %v659_v20, 0.0  ;;  %v1351_v4 = vld [vmem:[%s1472_s3] ss:$0 sm:$0xff] }
 0x14c   : > { %v685_v37 = vsub.f32 %v663_v26, %v1295_v27  ;;  %v686_v42 = vsub.f32 %v664_v28, %v1295_v27  ;;  %v687_v43 = vsub.f32 %v665_v29, %v1295_v27  ;;  %v688_v45 = vsub.f32 %v666_v30, %v1295_v27 }
 0x14d   : > { %v701_v23 = vadd.f32 1e-05, %v660_v22  ;;  %v689_v46 = vsub.f32 %v667_v31, %v1295_v27  ;;  %v690_v52 = vsub.f32 %v668_v32, %v1295_v27  ;;  %v691_v38 = vsub.f32 %v669_v33, %v1295_v27 }
 0x14e   : > { %v692_v53 = vsub.f32 %v670_v34, %v1295_v27  ;;  %v693_v54 = vsub.f32 %v1297_v35, %v1295_v27  ;;  %v694_v57 = vsub.f32 %v1299_v36, %v1295_v27  ;;  %v695_v58 = vsub.f32 %v1302_v39, %v1295_v27 }
 0x14f   : > { %1100 = vrsqrt.f32 %v701_v23  ;;  %v696_v44 = vsub.f32 %v1304_v40, %v1295_v27  ;;  %v697_v60 = vsub.f32 %v1306_v41, %v1295_v27  ;;  %v698_v61 = vsub.f32 %v1312_v47, %v1295_v27 }
 0x150   : > { %v699_v62 = vsub.f32 %v1314_v48, %v1295_v27  ;;  %v700_v0 = vsub.f32 %v1316_v49, %v1295_v27 }
 0x15c   : > { %v1101_v51 = vpop.eup %1100 }
 0x15d   : > { %v1323_v55 = vrot.slane %v1101_v51, %v682_v25 }
 0x15f   : > { %v709_v1 = vmul.f32 %v1323_v55, %v685_v37  ;;  %v710_v50 = vmul.f32 %v1323_v55, %v686_v42  ;;  %v711_v2 = vmul.f32 %v1323_v55, %v687_v43  ;;  %v712_v3 = vmul.f32 %v1323_v55, %v688_v45 }
 0x160   : > { %v713_v5 = vmul.f32 %v1323_v55, %v689_v46  ;;  %v714_v56 = vmul.f32 %v1323_v55, %v690_v52  ;;  %v715_v6 = vmul.f32 %v1323_v55, %v691_v38  ;;  %v716_v7 = vmul.f32 %v1323_v55, %v692_v53 }
 0x161   : > { %v732_v63 = vmul.f32 %v1334_v59, %v709_v1  ;;  %v733_v8 = vmul.f32 %v1334_v59, %v710_v50  ;;  %v734_v9 = vmul.f32 %v1334_v59, %v711_v2  ;;  %v735_v10 = vmul.f32 %v1334_v59, %v712_v3 }
 0x162   : > { %v736_v11 = vmul.f32 %v1334_v59, %v713_v5  ;;  %v737_v12 = vmul.f32 %v1334_v59, %v714_v56  ;;  %v738_v13 = vmul.f32 %v1334_v59, %v715_v6  ;;  %v739_v14 = vmul.f32 %v1334_v59, %v716_v7 }
 0x163   : > { %v755_v15 = vadd.f32 %v1351_v4, %v732_v63  ;;  %v756_v16 = vadd.f32 %v1351_v4, %v733_v8  ;;  %v757_v17 = vadd.f32 %v1351_v4, %v734_v9  ;;  %v758_v18 = vadd.f32 %v1351_v4, %v735_v10 }
 0x164   : > { %v759_v19 = vadd.f32 %v1351_v4, %v736_v11  ;;  %v760_v20 = vadd.f32 %v1351_v4, %v737_v12  ;;  %v761_v21 = vadd.f32 %v1351_v4, %v738_v13  ;;  %v762_v22 = vadd.f32 %v1351_v4, %v739_v14 }
 0x165   : > { %vm771_vm0 = vcmp.gt.f32.partialorder %v755_v15, 0.0  ;;  %v787_v23 = vmul.f32 0.2, %v755_v15  ;;  %vm772_vm1 = vcmp.gt.f32.partialorder %v756_v16, 0.0  ;;  %v788_v24 = vmul.f32 0.2, %v756_v16 }
 0x166   : > { %vm773_vm2 = vcmp.gt.f32.partialorder %v757_v17, 0.0  ;;  %v789_v25 = vmul.f32 0.2, %v757_v17  ;;  %vm774_vm3 = vcmp.gt.f32.partialorder %v758_v18, 0.0  ;;  %v790_v26 = vmul.f32 0.2, %v758_v18 }
 0x167   : > { %v803_v28 = vsel %vm771_vm0, %v755_v15, %v787_v23  ;;  %v804_v29 = vsel %vm772_vm1, %v756_v16, %v788_v24  ;;  %vm775_vm4 = vcmp.gt.f32.partialorder %v759_v19, 0.0  ;;  %v791_v30 = vmul.f32 0.2, %v759_v19 }
 0x168   : > { %819 = vst [vmem:[%s1473_s4] sm:$0xff] %v803_v28  ;;  %820 = vst [vmem:[%s1473_s4 + $0x8] sm:$0xff] %v804_v29  ;;  %v805_v31 = vsel %vm773_vm2, %v757_v17, %v789_v25  ;;  %v806_v32 = vsel %vm774_vm3, %v758_v18, %v790_v26  ;;  %vm776_vm5 = vcmp.gt.f32.partialorder %v760_v20, 0.0  ;;  %v792_v33 = vmul.f32 0.2, %v760_v20 }
 0x169   : > { %821 = vst [vmem:[%s1473_s4 + $0x10] sm:$0xff] %v805_v31  ;;  %822 = vst [vmem:[%s1473_s4 + $0x18] sm:$0xff] %v806_v32  ;;  %v807_v34 = vsel %vm775_vm4, %v759_v19, %v791_v30  ;;  %vm777_vm6 = vcmp.gt.f32.partialorder %v761_v21, 0.0  ;;  %v793_v35 = vmul.f32 0.2, %v761_v21  ;;  %vm778_vm7 = vcmp.gt.f32.partialorder %v762_v22, 0.0 }
 0x16a   : > { %823 = vst [vmem:[%s1473_s4 + $0x20] sm:$0xff] %v807_v34  ;;  %v808_v36 = vsel %vm776_vm5, %v760_v20, %v792_v33  ;;  %v794_v37 = vmul.f32 0.2, %v762_v22  ;;  %v717_v41 = vmul.f32 %v1323_v55, %v693_v54  ;;  %v718_v42 = vmul.f32 %v1323_v55, %v694_v57 }
 0x16b   : > { %824 = vst [vmem:[%s1473_s4 + $0x28] sm:$0xff] %v808_v36  ;;  %v809_v43 = vsel %vm777_vm6, %v761_v21, %v793_v35  ;;  %v719_v45 = vmul.f32 %v1323_v55, %v695_v58  ;;  %v720_v46 = vmul.f32 %v1323_v55, %v696_v44  ;;  %v721_v51 = vmul.f32 %v1323_v55, %v697_v60 }
 0x16c   : > { %825 = vst [vmem:[%s1473_s4 + $0x30] sm:$0xff] %v809_v43  ;;  %v810_v52 = vsel %vm778_vm7, %v762_v22, %v794_v37  ;;  %v740_v38 = vmul.f32 %v1334_v59, %v717_v41  ;;  %v741_v53 = vmul.f32 %v1334_v59, %v718_v42  ;;  %v722_v39 = vmul.f32 %v1323_v55, %v698_v61 }
 0x16d   : > { %826 = vst [vmem:[%s1473_s4 + $0x38] sm:$0xff] %v810_v52  ;;  %v742_v40 = vmul.f32 %v1334_v59, %v719_v45  ;;  %v743_v54 = vmul.f32 %v1334_v59, %v720_v46  ;;  %v744_v57 = vmul.f32 %v1334_v59, %v721_v51  ;;  %v723_v58 = vmul.f32 %v1323_v55, %v699_v62 }
 0x16e   : > { %v763_v44 = vadd.f32 %v1351_v4, %v740_v38  ;;  %v764_v47 = vadd.f32 %v1351_v4, %v741_v53  ;;  %v745_v60 = vmul.f32 %v1334_v59, %v722_v39  ;;  %v724_v61 = vmul.f32 %v1323_v55, %v700_v0 }
 0x16f   : > { %v765_v1 = vadd.f32 %v1351_v4, %v742_v40  ;;  %v766_v50 = vadd.f32 %v1351_v4, %v743_v54  ;;  %v767_v2 = vadd.f32 %v1351_v4, %v744_v57  ;;  %v746_v48 = vmul.f32 %v1334_v59, %v723_v58 }
 0x170   : > { %vm779_vm8 = vcmp.gt.f32.partialorder %v763_v44, 0.0  ;;  %v795_v62 = vmul.f32 0.2, %v763_v44  ;;  %vm780_vm9 = vcmp.gt.f32.partialorder %v764_v47, 0.0  ;;  %v796_v3 = vmul.f32 0.2, %v764_v47 }
 0x171   : > { %vm781_vm10 = vcmp.gt.f32.partialorder %v765_v1, 0.0  ;;  %v797_v5 = vmul.f32 0.2, %v765_v1  ;;  %vm782_vm11 = vcmp.gt.f32.partialorder %v766_v50, 0.0  ;;  %v798_v56 = vmul.f32 0.2, %v766_v50 }
 0x172   : > { %v811_v6 = vsel %vm779_vm8, %v763_v44, %v795_v62  ;;  %v812_v27 = vsel %vm780_vm9, %v764_v47, %v796_v3  ;;  %vm783_vm12 = vcmp.gt.f32.partialorder %v767_v2, 0.0  ;;  %v799_v49 = vmul.f32 0.2, %v767_v2 }
 0x173   : > { %827 = vst [vmem:[%s1473_s4 + $0x40] sm:$0xff] %v811_v6  ;;  %828 = vst [vmem:[%s1473_s4 + $0x48] sm:$0xff] %v812_v27  ;;  %v813_v55 = vsel %vm781_vm10, %v765_v1, %v797_v5  ;;  %v814_v0 = vsel %vm782_vm11, %v766_v50, %v798_v56  ;;  %v768_v7 = vadd.f32 %v1351_v4, %v745_v60 }
 0x174   : > { %v769_v63 = vadd.f32 %v1351_v4, %v746_v48  ;;  %829 = vst [vmem:[%s1473_s4 + $0x50] sm:$0xff] %v813_v55  ;;  %830 = vst [vmem:[%s1473_s4 + $0x58] sm:$0xff] %v814_v0  ;;  %v815_v8 = vsel %vm783_vm12, %v767_v2, %v799_v49  ;;  %v747_v9 = vmul.f32 %v1334_v59, %v724_v61 }
 0x175   : > { %831 = vst [vmem:[%s1473_s4 + $0x60] sm:$0xff] %v815_v8  ;;  %vm784_vm13 = vcmp.gt.f32.partialorder %v768_v7, 0.0  ;;  %v800_v10 = vmul.f32 0.2, %v768_v7 }
 0x176   : > { %vm785_vm14 = vcmp.gt.f32.partialorder %v769_v63, 0.0  ;;  %v801_v11 = vmul.f32 0.2, %v769_v63  ;;  %v770_v12 = vadd.f32 %v1351_v4, %v747_v9 }
 0x177   : > { %v816_v13 = vsel %vm784_vm13, %v768_v7, %v800_v10 }
 0x178   : > { %v817_v14 = vsel %vm785_vm14, %v769_v63, %v801_v11  ;;  %832 = vst [vmem:[%s1473_s4 + $0x68] sm:$0xff] %v816_v13  ;;  %vm786_vm15 = vcmp.gt.f32.partialorder %v770_v12, 0.0  ;;  %v802_v59 = vmul.f32 0.2, %v770_v12 }
 0x179   : > { %833 = vst [vmem:[%s1473_s4 + $0x70] sm:$0xff] %v817_v14 }
 0x17a   : > { %v818_v15 = vsel %vm786_vm15, %v770_v12, %v802_v59 }
 0x17b   : > { %834 = vst [vmem:[%s1473_s4 + $0x78] sm:$0xff] %v818_v15 }
 0x17c PF: > { %s14_s17 = sadd.s32 1, %s1124_s17   ;;  %s1474_s15 = smov %s1120_s16 }
 0x17d   : > { %p11_p7 = scmp.ge.s32.totalorder %s14_s17, 4   ;;  %s1475_s16 = smov %s1477_s18 }
 0x17f   :  { %13 = sbr.rel (!%p11_p7) target bundleno = 2 (0x2), region = 80 }

// kernel: discriminator_forward.8
= control target key start
LH: loop header
LB: loop body
LE: loop exit
PB: predicated region body
PF: predicated region fallthrough
CT: control target
= control target key end

     0   :  { %s1065_s15 = smov 0   ;;  %s1067_s16 = smov 0   ;;  %s1235_s0 = inlined_call_operand.vmem [shape: bf16[32,512], index: 0, kind: input, shape index: {}]   ;;  %s1236_s1 = inlined_call_operand.vmem [shape: bf16[512,128], index: 1, kind: input, shape index: {}]   ;;  %s1237_s2 = inlined_call_operand.vmem [shape: f32[1,128], index: 2, kind: input, shape index: {}]   ;;  %s1238_s3 = inlined_call_operand.vmem [shape: f32[1,128], index: 3, kind: input, shape index: {}]   ;;  %s1239_s4 = inlined_call_operand.vmem [shape: f32[32,128], index: 4, kind: output, shape index: {}]  }
   0x1   :  { %s1069_s17 = smov 0  }
   0x2 LB: > { %s26_s18 = sadd.s32 1, %s1033_s16  ;;  %p837_p0 = scmp.ge.s32.totalorder %s1037_s17, 1  ;;  %s1037_s17 = sphi %s1069_s17, %s14_s17   ;;  %s1033_s16 = sphi %s1067_s16, %s1241_s16   ;;  %s1029_s15 = sphi %s1065_s15, %s1240_s15  }
   0x3   : > { %p28_p1 = scmp.ge.s32.totalorder %s26_s18, 2  ;;  %p186_p2 = scmp.lt.s32.totalorder %s1037_s17, 3 }
   0x5   : > { %s1243_s18 = smov (%p28_p1, %s26_s18), 0  ;;  %p187_p3 = pnand %p837_p0, %p186_p2 }
   0x6   : > { %p236_p4 = scmp.eq.s32.totalorder (!%p187_p3), %s1029_s15, 0 }
   0x7   : > { %190 = sbr.rel (%p187_p3) target bundleno = 334 (0x14e), region = 36 }
   0xc   : > { %241 = sbr.rel (!%p236_p4) target bundleno = 17 (0x11), region = 40  ;;  %v1039_v0 = vmov (%p236_p4), 0.0  }
   0xd   : > { %242 = vst [vmem:[#allocation3] sm:$0x1] (%p236_p4), %v1039_v0  ;;  %243 = vst [vmem:[#allocation4] sm:$0x1] (%p236_p4), %v1039_v0 }
  0x11 PF: > { %p839_p5 = scmp.ne.s32.totalorder %s1029_s15, 0 }
  0x13   : > { %246 = sbr.rel (%p839_p5) target bundleno = 289 (0x121), region = 44 }
  0x18   : > { %v969_v1 = vld [vmem:[%s1236_s1 + $0x78] sm:$0xff]   ;;  %v973_v5 = vld [vmem:[%s1236_s1 + $0x70] sm:$0xff]   ;;  %v977_v9 = vld [vmem:[%s1236_s1 + $0x68] sm:$0xff]  }
  0x19   : > { %v970_v2 = vld [vmem:[%s1236_s1 + $0xf8] sm:$0xff]   ;;  %888 = vmatprep.subr.bf16.mxu0 %v969_v1  ;;  %v974_v6 = vld [vmem:[%s1236_s1 + $0xf0] sm:$0xff]   ;;  %v978_v10 = vld [vmem:[%s1236_s1 + $0xe8] sm:$0xff]  }
  0x1a   : > { %v971_v3 = vld [vmem:[%s1236_s1 + $0x38] sm:$0xff]   ;;  %916 = vmatprep.subr.bf16.mxu1 %v970_v2  ;;  %v975_v7 = vld [vmem:[%s1236_s1 + $0x30] sm:$0xff]   ;;  %v979_v11 = vld [vmem:[%s1236_s1 + $0x28] sm:$0xff]  }
  0x1b   : > { %v972_v4 = vld [vmem:[%s1236_s1 + $0xb8] sm:$0xff]   ;;  %889 = vmatpush3.bf16.msra.mxu0 %v971_v3  ;;  %v976_v8 = vld [vmem:[%s1236_s1 + $0xb0] sm:$0xff]   ;;  %v980_v12 = vld [vmem:[%s1236_s1 + $0xa8] sm:$0xff]  }
  0x1c   : > { %917 = vmatpush3.bf16.msra.mxu1 %v972_v4  ;;  %890 = vmatprep.subr.bf16.mxu0 %v973_v5  ;;  %v981_v13 = vld [vmem:[%s1236_s1 + $0x60] sm:$0xff]   ;;  %v985_v17 = vld [vmem:[%s1236_s1 + $0x58] sm:$0xff]   ;;  %v989_v21 = vld [vmem:[%s1236_s1 + $0x50] sm:$0xff]  }
  0x1d   : > { %918 = vmatprep.subr.bf16.mxu1 %v974_v6  ;;  %v982_v14 = vld [vmem:[%s1236_s1 + $0xe0] sm:$0xff]   ;;  %v986_v18 = vld [vmem:[%s1236_s1 + $0xd8] sm:$0xff]   ;;  %v990_v22 = vld [vmem:[%s1236_s1 + $0xd0] sm:$0xff]  }
  0x1e   : > { %v983_v15 = vld [vmem:[%s1236_s1 + $0x20] sm:$0xff]   ;;  %v987_v19 = vld [vmem:[%s1236_s1 + $0x18] sm:$0xff]   ;;  %v991_v23 = vld [vmem:[%s1236_s1 + $0x10] sm:$0xff]  }
  0x1f   : > { %891 = vmatpush3.bf16.msra.mxu0 %v975_v7  ;;  %v984_v16 = vld [vmem:[%s1236_s1 + $0xa0] sm:$0xff]   ;;  %v988_v20 = vld [vmem:[%s1236_s1 + $0x98] sm:$0xff]   ;;  %v992_v24 = vld [vmem:[%s1236_s1 + $0x90] sm:$0xff]  }
  0x20   : > { %919 = vmatpush3.bf16.msra.mxu1 %v976_v8  ;;  %892 = vmatprep.subr.bf16.mxu0 %v977_v9  ;;  %v993_v25 = vld [vmem:[%s1236_s1 + $0x48] sm:$0xff]   ;;  %v997_v29 = vld [vmem:[%s1236_s1 + $0x40] sm:$0xff]  }
  0x21   : > { %920 = vmatprep.subr.bf16.mxu1 %v978_v10  ;;  %v994_v26 = vld [vmem:[%s1236_s1 + $0xc8] sm:$0xff]   ;;  %v998_v30 = vld [vmem:[%s1236_s1 + $0xc0] sm:$0xff]  }
  0x22   : > { %v995_v27 = vld [vmem:[%s1236_s1 + $0x8] sm:$0xff]   ;;  %v999_v31 = vld [vmem:[%s1236_s1] sm:$0xff]  }
  0x23   : > { %893 = vmatpush3.bf16.msra.mxu0 %v979_v11  ;;  %v996_v28 = vld [vmem:[%s1236_s1 + $0x88] sm:$0xff]   ;;  %v1000_v32 = vld [vmem:[%s1236_s1 + $0x80] sm:$0xff]  }
  0x24   : > { %921 = vmatpush3.bf16.msra.mxu1 %v980_v12  ;;  %894 = vmatprep.subr.bf16.mxu0 %v981_v13  ;;  %v1001_v33 = vld [vmem:[%s1235_s0] ss:$16 sps:$4 sm:$0xff]   ;;  %v1003_v34 = vld [vmem:[%s1235_s0 + $0x4] ss:$16 sps:$4 sm:$0xff]   ;;  %v1004_v35 = vld [vmem:[%s1235_s0 + $0x8] ss:$16 sps:$4 sm:$0xff]  }
  0x25   : > { %922 = vmatprep.subr.bf16.mxu1 %v982_v14  ;;  %v1006_v36 = vld [vmem:[%s1235_s0 + $0xc] ss:$16 sps:$4 sm:$0xff]   ;;  %583 = vmatprep.mubr.bf16.mxu0 %v1003_v34  ;;  %v1007_v37 = vld [vmem:[%s1235_s0 + $0x24] ss:$16 sps:$4 sm:$0xff]   ;;  %v1011_v39 = vld [vmem:[%s1235_s0 + $0x20] ss:$16 sps:$4 sm:$0xff]  }
  0x26   : > { %632 = vmatprep.mubr.bf16.mxu1 %v1006_v36  ;;  %v1009_v38 = vld [vmem:[%s1235_s0 + $0x2c] ss:$16 sps:$4 sm:$0xff]   ;;  %v1012_v40 = vld [vmem:[%s1235_s0 + $0x28] ss:$16 sps:$4 sm:$0xff]  }
  0x27   : > { %895 = vmatpush3.bf16.msra.mxu0 %v983_v15 }
  0x28   : > { %923 = vmatpush3.bf16.msra.mxu1 %v984_v16  ;;  %896 = vmatprep.subr.bf16.mxu0 %v985_v17 }
  0x29   : > { %924 = vmatprep.subr.bf16.mxu1 %v986_v18 }
  0x2b   : > { %897 = vmatpush3.bf16.msra.mxu0 %v987_v19 }
  0x2c   : > { %925 = vmatpush3.bf16.msra.mxu1 %v988_v20  ;;  %898 = vmatprep.subr.bf16.mxu0 %v989_v21 }
  0x2d   : > { %926 = vmatprep.subr.bf16.mxu1 %v990_v22 }
  0x2f   : > { %899 = vmatpush3.bf16.msra.mxu0 %v991_v23 }
  0x30   : > { %927 = vmatpush3.bf16.msra.mxu1 %v992_v24  ;;  %900 = vmatprep.subr.bf16.mxu0 %v993_v25  ;;  %v649_v24 = vld [vmem:[#allocation3] sm:$0x1] }
  0x31   : > { %928 = vmatprep.subr.bf16.mxu1 %v994_v26 }
  0x33   : > { %901 = vmatpush3.bf16.msra.mxu0 %v995_v27  ;;  %v661_v27 = vld [vmem:[#allocation4] sm:$0x1] }
  0x34   : > { %929 = vmatpush3.bf16.msra.mxu1 %v996_v28  ;;  %902 = vmatprep.subr.bf16.mxu0 %v997_v29 }
  0x35   : > { %930 = vmatprep.subr.bf16.mxu1 %v998_v30 }
  0x37   : > { %903 = vmatpush3.bf16.msra.mxu0 %v999_v31 }
  0x38   : > { %931 = vmatpush3.bf16.msra.mxu1 %v1000_v32 }
  0x3a   : > { %584 = vmatmul.mubr.bf16.vlgmr.msra.gmra.mxu0 %v1001_v33 }
  0x3b   : > { %633 = vmatmul.mubr.bf16.vlgmr.msra.gmra.mxu1 %v1004_v35  ;;  %591 = vmatprep.mubr.bf16.mxu0 %v1007_v37 }
  0x3c   : > { %640 = vmatprep.mubr.bf16.mxu1 %v1009_v38 }
  0x42   : > { %592 = vmatmul.mubr.bf16.gmra.mxu0 %v1011_v39 }
  0x43   : > { %641 = vmatmul.mubr.bf16.gmra.mxu1 %v1012_v40 }
  0xfa   : > { %v904_v41 = vpop.f32.mrf.mxu0 }
  0xfb   : > { %v932_v42 = vpop.f32.mrf.mxu1 }
  0xfc   : > { %v905_v43 = vpop.f32.mrf.mxu0 }
  0xfd   : > { %v906_v44 = vadd.f32 %v905_v43, %v904_v41  ;;  %v933_v45 = vpop.f32.mrf.mxu1 }
  0xfe   : > { %v934_v46 = vadd.f32 %v933_v45, %v932_v42  ;;  %v907_v47 = vpop.f32.mrf.mxu0 }
  0xff   : > { %v935_v48 = vpop.f32.mrf.mxu1 }
 0x100   : > { %v635_v49 = vadd.f32 %v934_v46, %v906_v44  ;;  %v908_v50 = vpop.f32.mrf.mxu0 }
 0x101   : > { %v909_v51 = vadd.f32 %v908_v50, %v907_v47  ;;  %v936_v52 = vpop.f32.mrf.mxu1 }
 0x102   : > { %679 = vst [vmem:[#allocation2 + $0x10] sm:$0xff] %v635_v49  ;;  %v937_v53 = vadd.f32 %v936_v52, %v935_v48  ;;  %v910_v54 = vpop.f32.mrf.mxu0  ;;  %v662_v4 = vmul.f32 %v635_v49, %v635_v49 }
 0x103   : > { %v938_v55 = vpop.f32.mrf.mxu1 }
 0x104   : > { %v638_v56 = vadd.f32 %v937_v53, %v909_v51  ;;  %v911_v57 = vpop.f32.mrf.mxu0 }
 0x105   : > { %v912_v58 = vadd.f32 %v911_v57, %v910_v54  ;;  %v939_v59 = vpop.f32.mrf.mxu1 }
 0x106   : > { %680 = vst [vmem:[#allocation2] sm:$0xff] %v638_v56  ;;  %v940_v60 = vadd.f32 %v939_v59, %v938_v55  ;;  %v913_v61 = vpop.f32.mrf.mxu0  ;;  %v663_v63 = vmul.f32 %v638_v56, %v638_v56  ;;  %v650_v5 = vadd.f32 %v638_v56, %v635_v49 }
 0x107   : > { %v941_v62 = vpop.f32.mrf.mxu1 }
 0x108   : > { %v643_v0 = vadd.f32 %v940_v60, %v912_v58  ;;  %v914_v1 = vpop.f32.mrf.mxu0  ;;  %v666_v8 = vadd.f32 %v663_v63, %v662_v4 }
 0x109   : > { %v915_v2 = vadd.f32 %v914_v1, %v913_v61  ;;  %v942_v3 = vpop.f32.mrf.mxu1 }
 0x10a   : > { %v664_v6 = vmul.f32 %v643_v0, %v643_v0  ;;  %681 = vst [vmem:[#allocation2 + $0x18] sm:$0xff] %v643_v0  ;;  %v943_v7 = vadd.f32 %v942_v3, %v941_v62  ;;  %v651_v9 = vadd.f32 %v650_v5, %v643_v0 }
 0x10c   : > { %v646_v10 = vadd.f32 %v943_v7, %v915_v2  ;;  %v667_v11 = vadd.f32 %v666_v8, %v664_v6 }
 0x10e   : > { %v652_v12 = vadd.f32 %v651_v9, %v646_v10  ;;  %v665_v13 = vmul.f32 %v646_v10, %v646_v10  ;;  %682 = vst [vmem:[#allocation2 + $0x8] sm:$0xff] %v646_v10 }
 0x110   : > { %v653_v14 = vrot.slane %v652_v12, 4  ;;  %v668_v15 = vadd.f32 %v667_v11, %v665_v13 }
 0x112   : > { %v654_v16 = vadd.f32 %v653_v14, %v652_v12  ;;  %v669_v17 = vrot.slane %v668_v15, 4 }
 0x114   : > { %v655_v18 = vrot.slane %v654_v16, 2  ;;  %v670_v19 = vadd.f32 %v669_v17, %v668_v15 }
 0x116   : > { %v656_v20 = vadd.f32 %v655_v18, %v654_v16  ;;  %v671_v21 = vrot.slane %v670_v19, 2 }
 0x118   : > { %v657_v22 = vrot.slane %v656_v20, 1  ;;  %v672_v23 = vadd.f32 %v671_v21, %v670_v19 }
 0x11a   : > { %v658_v25 = vadd.f32 %v657_v22, %v656_v20  ;;  %v673_v26 = vrot.slane %v672_v23, 1 }
 0x11c   : > { %v659_v28 = vadd.f32 %v658_v25, %v649_v24  ;;  %v674_v29 = vadd.f32 %v673_v26, %v672_v23 }
 0x11e   : > { %660 = vst [vmem:[#allocation3] sm:$0x1] %v659_v28  ;;  %v675_v30 = vadd.f32 %v674_v29, %v661_v27 }
 0x120   : > { %676 = vst [vmem:[#allocation4] sm:$0x1] %v675_v30 }
 0x121 PF: > { %p880_p6 = scmp.ne.s32.totalorder %s1029_s15, 1 }
 0x123   : > { %686 = sbr.rel (%p880_p6) target bundleno = 334 (0x14e), region = 48 }
 0x128   : > { %v687_v31 = vld [vmem:[#allocation3] sm:$0x1]  ;;  %v689_v32 = vld [vmem:[#allocation4] sm:$0x1]  ;;  %v701_v38 = vlaneseq  ;;  %v696_v42 = vld [vmem:[#allocation2 + $0x10] sm:$0xff] }
 0x129   : > { %v688_v33 = vmul.f32 0.03125, %v687_v31  ;;  %v690_v34 = vmul.f32 0.03125, %v689_v32  ;;  %v697_v44 = vld [vmem:[#allocation2] sm:$0xff]  ;;  %v698_v45 = vld [vmem:[#allocation2 + $0x18] sm:$0xff]  ;;  %v699_v46 = vld [vmem:[#allocation2 + $0x8] sm:$0xff] }
 0x12a   : > { %v702_v40 = vshrl.u32 %v701_v38, 7  ;;  %v881_v53 = vld [vmem:[%s1237_s2] ss:$0 sm:$0xff] }
 0x12b   : > { %v691_v35 = vmul.f32 %v688_v33, %v688_v33  ;;  %v882_v58 = vld [vmem:[%s1238_s3] ss:$0 sm:$0xff] }
 0x12c   : > { %v703_v41 = vsub.s32 0, %v702_v40 }
 0x12d   : > { %v692_v36 = vsub.f32 %v690_v34, %v691_v35 }
 0x12e   : > { %v704_v43 = vrot.slane %v688_v33, %v703_v41 }
 0x12f   : > { %v693_v37 = vmax.f32 %v692_v36, 0.0 }
 0x130   : > { %v706_v47 = vsub.f32 %v696_v42, %v704_v43  ;;  %v707_v48 = vsub.f32 %v697_v44, %v704_v43  ;;  %v708_v49 = vsub.f32 %v698_v45, %v704_v43  ;;  %v709_v50 = vsub.f32 %v699_v46, %v704_v43 }
 0x131   : > { %v710_v39 = vadd.f32 1e-05, %v693_v37 }
 0x133   : > { %1013 = vrsqrt.f32 %v710_v39 }
 0x140   : > { %v1014_v51 = vpop.eup %1013 }
 0x141   : > { %v716_v52 = vrot.slane %v1014_v51, %v703_v41 }
 0x143   : > { %v718_v54 = vmul.f32 %v716_v52, %v706_v47  ;;  %v719_v55 = vmul.f32 %v716_v52, %v707_v48  ;;  %v720_v56 = vmul.f32 %v716_v52, %v708_v49  ;;  %v721_v57 = vmul.f32 %v716_v52, %v709_v50 }
 0x145   : > { %v729_v59 = vmul.f32 %v881_v53, %v718_v54  ;;  %v730_v60 = vmul.f32 %v881_v53, %v719_v55  ;;  %v731_v61 = vmul.f32 %v881_v53, %v720_v56  ;;  %v732_v62 = vmul.f32 %v881_v53, %v721_v57 }
 0x147   : > { %v740_v63 = vadd.f32 %v882_v58, %v729_v59  ;;  %v741_v0 = vadd.f32 %v882_v58, %v730_v60  ;;  %v742_v1 = vadd.f32 %v882_v58, %v731_v61  ;;  %v743_v2 = vadd.f32 %v882_v58, %v732_v62 }
 0x149   : > { %vm744_vm0 = vcmp.gt.f32.partialorder %v740_v63, 0.0  ;;  %v748_v3 = vmul.f32 0.2, %v740_v63  ;;  %vm745_vm1 = vcmp.gt.f32.partialorder %v741_v0, 0.0  ;;  %v749_v4 = vmul.f32 0.2, %v741_v0 }
 0x14a   : > { %vm746_vm2 = vcmp.gt.f32.partialorder %v742_v1, 0.0  ;;  %v750_v5 = vmul.f32 0.2, %v742_v1  ;;  %vm747_vm3 = vcmp.gt.f32.partialorder %v743_v2, 0.0  ;;  %v751_v6 = vmul.f32 0.2, %v743_v2 }
 0x14b   : > { %v752_v7 = vsel %vm744_vm0, %v740_v63, %v748_v3  ;;  %v753_v8 = vsel %vm745_vm1, %v741_v0, %v749_v4 }
 0x14c   : > { %756 = vst [vmem:[%s1239_s4] sm:$0xff] %v752_v7  ;;  %757 = vst [vmem:[%s1239_s4 + $0x8] sm:$0xff] %v753_v8  ;;  %v754_v9 = vsel %vm746_vm2, %v742_v1, %v750_v5  ;;  %v755_v10 = vsel %vm747_vm3, %v743_v2, %v751_v6 }
 0x14d   : > { %758 = vst [vmem:[%s1239_s4 + $0x10] sm:$0xff] %v754_v9  ;;  %759 = vst [vmem:[%s1239_s4 + $0x18] sm:$0xff] %v755_v10 }
 0x14e PF: > { %s14_s17 = sadd.s32 1, %s1037_s17   ;;  %s1240_s15 = smov %s1033_s16 }
 0x14f   : > { %p11_p7 = scmp.ge.s32.totalorder %s14_s17, 4   ;;  %s1241_s16 = smov %s1243_s18 }
 0x151   :  { %13 = sbr.rel (!%p11_p7) target bundleno = 2 (0x2), region = 80 }

// kernel: discriminator_forward.9
= control target key start
LH: loop header
LB: loop body
LE: loop exit
PB: predicated region body
PF: predicated region fallthrough
CT: control target
= control target key end

     0   :  { %s1185_s1 = inlined_call_operand.vmem [shape: bf16[1024,128], index: 1, kind: input, shape index: {}]   ;;  %s1186_s0 = inlined_call_operand.vmem [shape: bf16[8,1024], index: 0, kind: input, shape index: {}]   ;;  %s1187_s2 = inlined_call_operand.vmem [shape: f32[8,128], index: 2, kind: output, shape index: {}]  }
   0x1   :  { %v887_v0 = vld [vmem:[%s1185_s1 + $0x78] sm:$0xff]   ;;  %v891_v4 = vld [vmem:[%s1185_s1 + $0x70] sm:$0xff]   ;;  %v895_v8 = vld [vmem:[%s1185_s1 + $0x68] sm:$0xff]  }
   0x2   :  { %v888_v1 = vld [vmem:[%s1185_s1 + $0xf8] sm:$0xff]   ;;  %799 = vmatprep.subr.bf16.mxu0 %v887_v0  ;;  %v892_v5 = vld [vmem:[%s1185_s1 + $0xf0] sm:$0xff]   ;;  %v896_v9 = vld [vmem:[%s1185_s1 + $0xe8] sm:$0xff]  }
   0x3   :  { %v889_v2 = vld [vmem:[%s1185_s1 + $0x38] sm:$0xff]   ;;  %821 = vmatprep.subr.bf16.mxu1 %v888_v1  ;;  %v893_v6 = vld [vmem:[%s1185_s1 + $0x30] sm:$0xff]   ;;  %v897_v10 = vld [vmem:[%s1185_s1 + $0x28] sm:$0xff]  }
   0x4   :  { %v890_v3 = vld [vmem:[%s1185_s1 + $0xb8] sm:$0xff]   ;;  %800 = vmatpush3.bf16.msra.mxu0 %v889_v2  ;;  %v894_v7 = vld [vmem:[%s1185_s1 + $0xb0] sm:$0xff]   ;;  %v898_v11 = vld [vmem:[%s1185_s1 + $0xa8] sm:$0xff]  }
   0x5   :  { %822 = vmatpush3.bf16.msra.mxu1 %v890_v3  ;;  %801 = vmatprep.subr.bf16.mxu0 %v891_v4  ;;  %v899_v12 = vld [vmem:[%s1185_s1 + $0x60] sm:$0xff]   ;;  %v903_v16 = vld [vmem:[%s1185_s1 + $0x58] sm:$0xff]   ;;  %v907_v20 = vld [vmem:[%s1185_s1 + $0x50] sm:$0xff]  }
   0x6   :  { %823 = vmatprep.subr.bf16.mxu1 %v892_v5  ;;  %v900_v13 = vld [vmem:[%s1185_s1 + $0xe0] sm:$0xff]   ;;  %v904_v17 = vld [vmem:[%s1185_s1 + $0xd8] sm:$0xff]   ;;  %v908_v21 = vld [vmem:[%s1185_s1 + $0xd0] sm:$0xff]  }
   0x7   :  { %v901_v14 = vld [vmem:[%s1185_s1 + $0x20] sm:$0xff]   ;;  %v905_v18 = vld [vmem:[%s1185_s1 + $0x18] sm:$0xff]   ;;  %v909_v22 = vld [vmem:[%s1185_s1 + $0x10] sm:$0xff]  }
   0x8   :  { %802 = vmatpush3.bf16.msra.mxu0 %v893_v6  ;;  %v902_v15 = vld [vmem:[%s1185_s1 + $0xa0] sm:$0xff]   ;;  %v906_v19 = vld [vmem:[%s1185_s1 + $0x98] sm:$0xff]   ;;  %v910_v23 = vld [vmem:[%s1185_s1 + $0x90] sm:$0xff]  }
   0x9   :  { %824 = vmatpush3.bf16.msra.mxu1 %v894_v7  ;;  %803 = vmatprep.subr.bf16.mxu0 %v895_v8  ;;  %v911_v24 = vld [vmem:[%s1185_s1 + $0x48] sm:$0xff]   ;;  %v915_v28 = vld [vmem:[%s1185_s1 + $0x40] sm:$0xff]   ;;  %v923_v38 = vld [vmem:[%s1185_s1 + $0x178] sm:$0xff]  }
   0xa   :  { %825 = vmatprep.subr.bf16.mxu1 %v896_v9  ;;  %v912_v25 = vld [vmem:[%s1185_s1 + $0xc8] sm:$0xff]   ;;  %v916_v29 = vld [vmem:[%s1185_s1 + $0xc0] sm:$0xff]   ;;  %v924_v39 = vld [vmem:[%s1185_s1 + $0x1f8] sm:$0xff]  }
   0xb   :  { %v913_v26 = vld [vmem:[%s1185_s1 + $0x8] sm:$0xff]   ;;  %v917_v30 = vld [vmem:[%s1185_s1] sm:$0xff]   ;;  %v925_v40 = vld [vmem:[%s1185_s1 + $0x138] sm:$0xff]  }
   0xc   :  { %804 = vmatpush3.bf16.msra.mxu0 %v897_v10  ;;  %v914_v27 = vld [vmem:[%s1185_s1 + $0x88] sm:$0xff]   ;;  %v918_v31 = vld [vmem:[%s1185_s1 + $0x80] sm:$0xff]   ;;  %v926_v41 = vld [vmem:[%s1185_s1 + $0x1b8] sm:$0xff]  }
   0xd   :  { %826 = vmatpush3.bf16.msra.mxu1 %v898_v11  ;;  %805 = vmatprep.subr.bf16.mxu0 %v899_v12  ;;  %v12_v32 = vld [vmem:[%s1186_s0] sm:$0xff]  ;;  %v13_v33 = vld [vmem:[%s1186_s0 + $0x8] sm:$0xff]  ;;  %v927_v42 = vld [vmem:[%s1185_s1 + $0x170] sm:$0xff]  }
   0xe   :  { %827 = vmatprep.subr.bf16.mxu1 %v900_v13  ;;  %v727_v34 = vcombine.low %v12_v32, %v12_v32  ;;  %v728_v35 = vcombine.high %v12_v32, %v12_v32  ;;  %v729_v36 = vcombine.low %v13_v33, %v13_v33  ;;  %v730_v37 = vcombine.high %v13_v33, %v13_v33  ;;  %v928_v43 = vld [vmem:[%s1185_s1 + $0x1f0] sm:$0xff]   ;;  %v931_v46 = vld [vmem:[%s1185_s1 + $0x168] sm:$0xff]   ;;  %v935_v50 = vld [vmem:[%s1185_s1 + $0x160] sm:$0xff]  }
   0xf   :  { %v929_v44 = vld [vmem:[%s1185_s1 + $0x130] sm:$0xff]   ;;  %v932_v47 = vld [vmem:[%s1185_s1 + $0x1e8] sm:$0xff]   ;;  %v936_v51 = vld [vmem:[%s1185_s1 + $0x1e0] sm:$0xff]  }
  0x10   :  { %806 = vmatpush3.bf16.msra.mxu0 %v901_v14  ;;  %588 = vmatprep.mubr.bf16.mxu0 %v728_v35  ;;  %v930_v45 = vld [vmem:[%s1185_s1 + $0x1b0] sm:$0xff]   ;;  %v933_v48 = vld [vmem:[%s1185_s1 + $0x128] sm:$0xff]   ;;  %v937_v52 = vld [vmem:[%s1185_s1 + $0x120] sm:$0xff]  }
  0x11   :  { %828 = vmatpush3.bf16.msra.mxu1 %v902_v15  ;;  %807 = vmatprep.subr.bf16.mxu0 %v903_v16  ;;  %v934_v49 = vld [vmem:[%s1185_s1 + $0x1a8] sm:$0xff]   ;;  %v938_v53 = vld [vmem:[%s1185_s1 + $0x1a0] sm:$0xff]   ;;  %v939_v54 = vld [vmem:[%s1185_s1 + $0x158] sm:$0xff]  }
  0x12   :  { %829 = vmatprep.subr.bf16.mxu1 %v904_v17  ;;  %628 = vmatprep.mubr.bf16.mxu1 %v730_v37  ;;  %v940_v55 = vld [vmem:[%s1185_s1 + $0x1d8] sm:$0xff]   ;;  %v943_v58 = vld [vmem:[%s1185_s1 + $0x150] sm:$0xff]   ;;  %v947_v62 = vld [vmem:[%s1185_s1 + $0x148] sm:$0xff]  }
  0x13   :  { %v941_v56 = vld [vmem:[%s1185_s1 + $0x118] sm:$0xff]   ;;  %v944_v59 = vld [vmem:[%s1185_s1 + $0x1d0] sm:$0xff]   ;;  %v948_v63 = vld [vmem:[%s1185_s1 + $0x1c8] sm:$0xff]  }
  0x14   :  { %808 = vmatpush3.bf16.msra.mxu0 %v905_v18  ;;  %v942_v57 = vld [vmem:[%s1185_s1 + $0x198] sm:$0xff]   ;;  %v945_v60 = vld [vmem:[%s1185_s1 + $0x110] sm:$0xff]   ;;  %v949_v0 = vld [vmem:[%s1185_s1 + $0x108] sm:$0xff]  }
  0x15   :  { %830 = vmatpush3.bf16.msra.mxu1 %v906_v19  ;;  %809 = vmatprep.subr.bf16.mxu0 %v907_v20  ;;  %v946_v61 = vld [vmem:[%s1185_s1 + $0x190] sm:$0xff]   ;;  %v950_v1 = vld [vmem:[%s1185_s1 + $0x188] sm:$0xff]   ;;  %v951_v2 = vld [vmem:[%s1185_s1 + $0x140] sm:$0xff]  }
  0x16   :  { %831 = vmatprep.subr.bf16.mxu1 %v908_v21  ;;  %v952_v3 = vld [vmem:[%s1185_s1 + $0x1c0] sm:$0xff]   ;;  %v14_v6 = vld [vmem:[%s1186_s0 + $0x10] sm:$0xff]  ;;  %v15_v9 = vld [vmem:[%s1186_s0 + $0x18] sm:$0xff] }
  0x17   :  { %v953_v4 = vld [vmem:[%s1185_s1 + $0x100] sm:$0xff]   ;;  %v731_v7 = vcombine.low %v14_v6, %v14_v6  ;;  %v732_v8 = vcombine.high %v14_v6, %v14_v6  ;;  %v733_v10 = vcombine.low %v15_v9, %v15_v9  ;;  %v734_v11 = vcombine.high %v15_v9, %v15_v9 }
  0x18   :  { %810 = vmatpush3.bf16.msra.mxu0 %v909_v22  ;;  %v954_v5 = vld [vmem:[%s1185_s1 + $0x180] sm:$0xff]  }
  0x19   :  { %832 = vmatpush3.bf16.msra.mxu1 %v910_v23  ;;  %811 = vmatprep.subr.bf16.mxu0 %v911_v24 }
  0x1a   :  { %833 = vmatprep.subr.bf16.mxu1 %v912_v25 }
  0x1c   :  { %812 = vmatpush3.bf16.msra.mxu0 %v913_v26 }
  0x1d   :  { %834 = vmatpush3.bf16.msra.mxu1 %v914_v27  ;;  %813 = vmatprep.subr.bf16.mxu0 %v915_v28 }
  0x1e   :  { %835 = vmatprep.subr.bf16.mxu1 %v916_v29 }
  0x20   :  { %814 = vmatpush3.bf16.msra.mxu0 %v917_v30 }
  0x21   :  { %836 = vmatpush3.bf16.msra.mxu1 %v918_v31  ;;  %843 = vmatprep.subr.bf16.mxu0 %v923_v38 }
  0x22   :  { %865 = vmatprep.subr.bf16.mxu1 %v924_v39 }
  0x23   :  { %589 = vmatmul.mubr.bf16.vlgmr.msra.gmra.mxu0 %v727_v34 }
  0x24   :  { %629 = vmatmul.mubr.bf16.vlgmr.msra.gmra.mxu1 %v729_v36  ;;  %844 = vmatpush3.bf16.msra.mxu0 %v925_v40 }
  0x25   :  { %866 = vmatpush3.bf16.msra.mxu1 %v926_v41  ;;  %845 = vmatprep.subr.bf16.mxu0 %v927_v42 }
  0x26   :  { %867 = vmatprep.subr.bf16.mxu1 %v928_v43  ;;  %668 = vmatprep.mubr.bf16.mxu0 %v732_v8 }
  0x27   :  { %708 = vmatprep.mubr.bf16.mxu1 %v734_v11 }
  0x28   :  { %846 = vmatpush3.bf16.msra.mxu0 %v929_v44 }
  0x29   :  { %868 = vmatpush3.bf16.msra.mxu1 %v930_v45  ;;  %847 = vmatprep.subr.bf16.mxu0 %v931_v46 }
  0x2a   :  { %869 = vmatprep.subr.bf16.mxu1 %v932_v47 }
  0x2c   :  { %848 = vmatpush3.bf16.msra.mxu0 %v933_v48 }
  0x2d   :  { %870 = vmatpush3.bf16.msra.mxu1 %v934_v49  ;;  %849 = vmatprep.subr.bf16.mxu0 %v935_v50 }
  0x2e   :  { %871 = vmatprep.subr.bf16.mxu1 %v936_v51 }
  0x30   :  { %850 = vmatpush3.bf16.msra.mxu0 %v937_v52 }
  0x31   :  { %872 = vmatpush3.bf16.msra.mxu1 %v938_v53  ;;  %851 = vmatprep.subr.bf16.mxu0 %v939_v54 }
  0x32   :  { %873 = vmatprep.subr.bf16.mxu1 %v940_v55 }
  0x34   :  { %852 = vmatpush3.bf16.msra.mxu0 %v941_v56 }
  0x35   :  { %874 = vmatpush3.bf16.msra.mxu1 %v942_v57  ;;  %853 = vmatprep.subr.bf16.mxu0 %v943_v58 }
  0x36   :  { %875 = vmatprep.subr.bf16.mxu1 %v944_v59 }
  0x38   :  { %854 = vmatpush3.bf16.msra.mxu0 %v945_v60 }
  0x39   :  { %876 = vmatpush3.bf16.msra.mxu1 %v946_v61  ;;  %855 = vmatprep.subr.bf16.mxu0 %v947_v62 }
  0x3a   :  { %877 = vmatprep.subr.bf16.mxu1 %v948_v63 }
  0x3c   :  { %856 = vmatpush3.bf16.msra.mxu0 %v949_v0 }
  0x3d   :  { %878 = vmatpush3.bf16.msra.mxu1 %v950_v1  ;;  %857 = vmatprep.subr.bf16.mxu0 %v951_v2 }
  0x3e   :  { %879 = vmatprep.subr.bf16.mxu1 %v952_v3 }
  0x40   :  { %858 = vmatpush3.bf16.msra.mxu0 %v953_v4 }
  0x41   :  { %880 = vmatpush3.bf16.msra.mxu1 %v954_v5 }
  0x43   :  { %669 = vmatmul.mubr.bf16.vlgmr.msra.gmra.mxu0 %v731_v7 }
  0x44   :  { %709 = vmatmul.mubr.bf16.vlgmr.msra.gmra.mxu1 %v733_v10 }
  0xe3   :  { %v815_v12 = vpop.f32.mrf.mxu0 }
  0xe4   :  { %v837_v13 = vpop.f32.mrf.mxu1 }
  0xe5   :  { %v816_v14 = vpop.f32.mrf.mxu0 }
  0xe6   :  { %v838_v15 = vpop.f32.mrf.mxu1  ;;  %v817_v20 = vadd.f32 %v816_v14, %v815_v12 }
  0xe7   :  { %v818_v16 = vpop.f32.mrf.mxu0  ;;  %v839_v21 = vadd.f32 %v838_v15, %v837_v13 }
  0xe8   :  { %v840_v17 = vpop.f32.mrf.mxu1 }
  0xe9   :  { %v819_v18 = vpop.f32.mrf.mxu0  ;;  %v631_v26 = vadd.f32 %v839_v21, %v817_v20 }
  0xea   :  { %v841_v19 = vpop.f32.mrf.mxu1 }
 0x103   :  { %v859_v22 = vpop.f32.mrf.mxu0 }
 0x104   :  { %v881_v23 = vpop.f32.mrf.mxu1 }
 0x105   :  { %v860_v24 = vpop.f32.mrf.mxu0 }
 0x106   :  { %v882_v25 = vpop.f32.mrf.mxu1  ;;  %v861_v27 = vadd.f32 %v860_v24, %v859_v22 }
 0x107   :  { %v862_v28 = vpop.f32.mrf.mxu0  ;;  %v883_v31 = vadd.f32 %v882_v25, %v881_v23 }
 0x108   :  { %v884_v29 = vpop.f32.mrf.mxu1  ;;  %v671_v30 = vadd.f32 %v861_v27, %v631_v26 }
 0x109   :  { %v863_v32 = vpop.f32.mrf.mxu0 }
 0x10a   :  { %v885_v33 = vpop.f32.mrf.mxu1  ;;  %v711_v34 = vadd.f32 %v883_v31, %v671_v30 }
 0x10c   :  { %v716_v35 = vsub.f32 0.0, %v711_v34 }
 0x10e   :  { %v717_v36 = vmul.f32 1.442695, %v716_v35 }
 0x110   :  { %959 = vpow2.f32 %v717_v36 }
 0x11d   :  { %v960_v37 = vpop.eup %959 }
 0x11e   :  { %v719_v38 = vadd.f32 1.0, %v960_v37 }
 0x120   :  { %961 = vrcp.f32 %v719_v38 }
 0x12d   :  { %v962_v39 = vpop.eup %961 }
 0x12e   :  { %722 = vst [vmem:[%s1187_s2] sm:$0xff] %v962_v39 }

</bundles_post_ra>
